<compile_context>
chip_gen: v7x
topology: tpu7x:2x2x1
jax: 0.10.0
libtpu: 0.0.40
codegen_flags: <defaults>
</compile_context>

<pallas_src>
import jax
import jax.numpy as jnp
from jax.experimental import pallas as pl
from jax.experimental.pallas import tpu as pltpu

H = W = 14
P_VALID = H * W              # 196 flat spatial positions (all valid)
SP = 16                      # zero-bordered spatial side
P_PAD = SP * SP              # 256 bordered lane positions
C_IN = 1408
C_MID = 128
C_OUT = 32
EPS = 1e-5

# tap enumeration order must match the weight layout built in prepare_params()
_TAPS = [(dy, dx) for dy in range(3) for dx in range(3)]


def _fused_kernel(x_ref, w1_ref, w2_ref, p_ref, gamma_ref, beta_ref, o_ref):
    # ---- conv1x1 (transposed): y[c, q] over the 196 flat positions ---------
    x_bf = x_ref[...].astype(jnp.bfloat16)                       # (C_IN, 196)
    y = jnp.dot(w1_ref[...], x_bf,
                preferred_element_type=jnp.float32)               # (C_MID, 196) f32

    # ---- BatchNorm (training batch stats) + ReLU; lane-axis reductions -----
    # TODO(synk): running_mean / running_var of the torch module are not
    # updated (stateful training side effect, not part of the forward output).
    inv_n = jnp.float32(1.0 / P_VALID)
    mean = jnp.sum(y, axis=1, keepdims=True) * inv_n              # (C_MID, 1)
    d = y - mean
    var = jnp.sum(d * d, axis=1, keepdims=True) * inv_n           # biased var
    scale = jax.lax.rsqrt(var + EPS) * gamma_ref[...]             # (C_MID, 1)
    y_act = jnp.maximum(d * scale + beta_ref[...], 0.0)           # (C_MID, 196)
    y_act = y_act.astype(jnp.bfloat16)

    # ---- scatter flat(196) -> zero-bordered 16x16 grid (256 lanes) ---------
    # p_ref is an exact 0/1 matrix, so this matmul just relays bf16 values.
    y_b = jnp.dot(y_act, p_ref[...],
                  preferred_element_type=jnp.float32)             # (C_MID, 256) f32

    # ---- 3x3 conv: 9 accumulating matmuls; each tap is a static lane roll --
    acc = None
    for k, (dy, dx) in enumerate(_TAPS):
        s = (dy - 1) * SP + (dx - 1)           # lane shift of tap (dy, dx)
        tap = y_b if s == 0 else pltpu.roll(y_b, shift=(-s) % P_PAD, axis=1)
        w2_k = w2_ref[k * C_OUT:(k + 1) * C_OUT, :]               # (C_OUT, C_MID)
        part = jnp.dot(w2_k, tap.astype(jnp.bfloat16),
                       preferred_element_type=jnp.float32)        # (C_OUT, 256)
        acc = part if acc is None else acc + part
    o_ref[...] = acc


def fused_conv_bn_relu_conv(x2d, w1_2d, w2_stack, p_mat, gamma2d, beta2d):
    return pl.pallas_call(
        _fused_kernel,
        out_shape=jax.ShapeDtypeStruct((C_OUT, P_PAD), jnp.float32),
        grid=(1,),
        in_specs=[
            pl.BlockSpec((C_IN, P_VALID), lambda i: (0, 0)),
            pl.BlockSpec((C_MID, C_IN), lambda i: (0, 0)),
            pl.BlockSpec((9 * C_OUT, C_MID), lambda i: (0, 0)),
            pl.BlockSpec((P_VALID, P_PAD), lambda i: (0, 0)),
            pl.BlockSpec((C_MID, 1), lambda i: (0, 0)),
            pl.BlockSpec((C_MID, 1), lambda i: (0, 0)),
        ],
        out_specs=pl.BlockSpec((C_OUT, P_PAD), lambda i: (0, 0)),
        compiler_params=pltpu.CompilerParams(
            dimension_semantics=("arbitrary",)),
    )(x2d, w1_2d, w2_stack, p_mat, gamma2d, beta2d)


def prepare_params(w1_oihw, w2_oihw, gamma, beta):
    """Static weight / scatter-matrix re-layout; runs once, outside the jitted forward."""
    w1_2d = w1_oihw[:, :, 0, 0].astype(jnp.bfloat16)              # (C_MID, C_IN)
    # (O,I,KH,KW) -> (KH,KW,O,I) -> (9*C_OUT, C_MID); tap k=dy*3+dx at rows [k*32,(k+1)*32)
    w2_stack = jnp.transpose(w2_oihw, (2, 3, 0, 1)).reshape(9 * C_OUT, C_MID)
    w2_stack = w2_stack.astype(jnp.bfloat16)
    # exact 0/1 scatter: flat position q -> bordered lane (q//14+1)*16 + (q%14+1)
    q = jnp.arange(P_VALID)
    tgt = (q // W + 1) * SP + (q % W + 1)
    p_mat = (tgt[:, None] == jnp.arange(P_PAD)[None, :]).astype(jnp.bfloat16)
    return (w1_2d, w2_stack, p_mat,
            gamma.reshape(C_MID, 1), beta.reshape(C_MID, 1))


def forward(x_nchw, w1_2d, w2_stack, p_mat, gamma2d, beta2d):
    # TODO(synk): batch size is fixed at 1 (as in the module spec input).
    assert x_nchw.shape == (1, C_IN, H, W)
    x2d = x_nchw.reshape(C_IN, H * W)          # free reshape; stays f32, cast in-kernel
    out_b = fused_conv_bn_relu_conv(x2d, w1_2d, w2_stack, p_mat, gamma2d, beta2d)
    out = out_b.reshape(C_OUT, SP, SP)[:, 1:1 + H, 1:1 + W]       # (32, 14, 14)
    return out.reshape(1, C_OUT, H, W)


def reference(x, w1, w2, gamma, beta):
    """Pure-JAX f32 reference of the torch module forward (training-mode BN)."""
    dn = ('NCHW', 'OIHW', 'NCHW')
    y = jax.lax.conv_general_dilated(x, w1, (1, 1), 'VALID', dimension_numbers=dn)
    mean = jnp.mean(y, axis=(0, 2, 3), keepdims=True)
    var = jnp.var(y, axis=(0, 2, 3), keepdims=True)               # biased, as torch BN train
    yn = (y - mean) * jax.lax.rsqrt(var + EPS)
    yn = yn * gamma.reshape(1, -1, 1, 1) + beta.reshape(1, -1, 1, 1)
    ya = jnp.maximum(yn, 0.0)
    return jax.lax.conv_general_dilated(ya, w2, (1, 1), ((1, 1), (1, 1)),
                                        dimension_numbers=dn)


if __name__ == "__main__":
    key = jax.random.PRNGKey(0)
    kx, k1, k2, kg, kb = jax.random.split(key, 5)
    # shapes fixed by the module's __init__ / spec input
    x = jax.random.normal(kx, (1, C_IN, H, W), dtype=jnp.float32)
    w1 = jax.random.normal(k1, (C_MID, C_IN, 1, 1), dtype=jnp.float32) * 0.02
    w2 = jax.random.normal(k2, (C_OUT, C_MID, 3, 3), dtype=jnp.float32) * 0.05
    gamma = 1.0 + 0.1 * jax.random.normal(kg, (C_MID,), dtype=jnp.float32)
    beta = 0.1 * jax.random.normal(kb, (C_MID,), dtype=jnp.float32)

    params = prepare_params(w1, w2, gamma, beta)   # hoisted: runs once, not per call
    out = jax.jit(forward)(x, *params)
    jax.block_until_ready(out)
    assert out.shape == (1, C_OUT, H, W) and out.dtype == jnp.float32

    ref = reference(x, w1, w2, gamma, beta)
    err = float(jnp.max(jnp.abs(out - ref)))
    scale = float(jnp.max(jnp.abs(ref))) + 1e-6
    assert err / scale < 5e-2, f"max abs error {err} vs reference scale {scale}"
    print("KERNEL_OK")
</pallas_src>

<mosaic_0001>
module attributes {stable_mosaic.version = 11 : i64} {
  func.func @_fused_kernel(%arg0: i32, %arg1: memref<1408x196xf32, #tpu.memory_space<vmem>>, %arg2: memref<128x1408xbf16, #tpu.memory_space<vmem>>, %arg3: memref<288x128xbf16, #tpu.memory_space<vmem>>, %arg4: memref<196x256xbf16, #tpu.memory_space<vmem>>, %arg5: memref<128x1xf32, #tpu.memory_space<vmem>>, %arg6: memref<128x1xf32, #tpu.memory_space<vmem>>, %arg7: memref<32x256xf32, #tpu.memory_space<vmem>>) attributes {dimension_semantics = [#tpu.dimension_semantics<arbitrary>], iteration_bounds = array<i64: 1>, scalar_prefetch = 0 : i64, scratch_operands = 0 : i64, tpu.core_type = #tpu.core_type<tc>, window_params = [{pipeline_mode = #tpu.pipeline_mode<synchronous>, transform_indices = @transform_0, window_bounds = array<i64: 1408, 196>}, {pipeline_mode = #tpu.pipeline_mode<synchronous>, transform_indices = @transform_1, window_bounds = array<i64: 128, 1408>}, {pipeline_mode = #tpu.pipeline_mode<synchronous>, transform_indices = @transform_2, window_bounds = array<i64: 288, 128>}, {pipeline_mode = #tpu.pipeline_mode<synchronous>, transform_indices = @transform_3, window_bounds = array<i64: 196, 256>}, {pipeline_mode = #tpu.pipeline_mode<synchronous>, transform_indices = @transform_4, window_bounds = array<i64: 128, 1>}, {pipeline_mode = #tpu.pipeline_mode<synchronous>, transform_indices = @transform_5, window_bounds = array<i64: 128, 1>}, {pipeline_mode = #tpu.pipeline_mode<synchronous>, transform_indices = @transform_6, window_bounds = array<i64: 32, 256>}]} {
    %c0 = arith.constant 0 : index
    %c0_0 = arith.constant 0 : index
    %0 = vector.load %arg1[%c0, %c0_0] : memref<1408x196xf32, #tpu.memory_space<vmem>>, vector<1408x196xf32>
    %1 = arith.truncf %0 : vector<1408x196xf32> to vector<1408x196xbf16>
    %c0_1 = arith.constant 0 : index
    %c0_2 = arith.constant 0 : index
    %2 = vector.load %arg2[%c0_1, %c0_2] : memref<128x1408xbf16, #tpu.memory_space<vmem>>, vector<128x1408xbf16>
    %cst = arith.constant dense<0.000000e+00> : vector<128x196xf32>
    %3 = tpu.matmul %2, %1, %cst {dimension_numbers = #tpu.dot_dimension_numbers<[1], [0], [0], [1], [0, 0, 1, 1], [], []>} : vector<128x1408xbf16>, vector<1408x196xbf16>, vector<128x196xf32> -> vector<128x196xf32>
    %cst_3 = arith.constant dense<0.000000e+00> : vector<128xf32>
    %4 = vector.multi_reduction <add>, %3, %cst_3 [1] : vector<128x196xf32> to vector<128xf32>
    %5 = vector.shape_cast %4 : vector<128xf32> to vector<128x1xf32>
    %cst_4 = arith.constant 0.00510204071 : f32
    %6 = vector.broadcast %cst_4 : f32 to vector<128x1xf32>
    %7 = arith.mulf %5, %6 : vector<128x1xf32>
    %8 = vector.broadcast %7 : vector<128x1xf32> to vector<128x196xf32>
    %9 = arith.subf %3, %8 : vector<128x196xf32>
    %10 = arith.mulf %9, %9 : vector<128x196xf32>
    %cst_5 = arith.constant dense<0.000000e+00> : vector<128xf32>
    %11 = vector.multi_reduction <add>, %10, %cst_5 [1] : vector<128x196xf32> to vector<128xf32>
    %12 = vector.shape_cast %11 : vector<128xf32> to vector<128x1xf32>
    %cst_6 = arith.constant 0.00510204071 : f32
    %13 = vector.broadcast %cst_6 : f32 to vector<128x1xf32>
    %14 = arith.mulf %12, %13 : vector<128x1xf32>
    %cst_7 = arith.constant 9.99999974E-6 : f32
    %15 = vector.broadcast %cst_7 : f32 to vector<128x1xf32>
    %16 = arith.addf %14, %15 : vector<128x1xf32>
    %17 = math.rsqrt %16 : vector<128x1xf32>
    %c0_8 = arith.constant 0 : index
    %c0_9 = arith.constant 0 : index
    %18 = vector.load %arg5[%c0_8, %c0_9] : memref<128x1xf32, #tpu.memory_space<vmem>>, vector<128x1xf32>
    %19 = arith.mulf %17, %18 : vector<128x1xf32>
    %20 = vector.broadcast %19 : vector<128x1xf32> to vector<128x196xf32>
    %21 = arith.mulf %9, %20 : vector<128x196xf32>
    %c0_10 = arith.constant 0 : index
    %c0_11 = arith.constant 0 : index
    %22 = vector.load %arg6[%c0_10, %c0_11] : memref<128x1xf32, #tpu.memory_space<vmem>>, vector<128x1xf32>
    %23 = vector.broadcast %22 : vector<128x1xf32> to vector<128x196xf32>
    %24 = arith.addf %21, %23 : vector<128x196xf32>
    %cst_12 = arith.constant 0.000000e+00 : f32
    %25 = vector.broadcast %cst_12 : f32 to vector<128x196xf32>
    %26 = arith.maximumf %24, %25 : vector<128x196xf32>
    %27 = arith.truncf %26 : vector<128x196xf32> to vector<128x196xbf16>
    %c0_13 = arith.constant 0 : index
    %c0_14 = arith.constant 0 : index
    %28 = vector.load %arg4[%c0_13, %c0_14] : memref<196x256xbf16, #tpu.memory_space<vmem>>, vector<196x256xbf16>
    %cst_15 = arith.constant dense<0.000000e+00> : vector<128x256xf32>
    %29 = tpu.matmul %27, %28, %cst_15 {dimension_numbers = #tpu.dot_dimension_numbers<[1], [0], [0], [1], [0, 0, 1, 1], [], []>} : vector<128x196xbf16>, vector<196x256xbf16>, vector<128x256xf32> -> vector<128x256xf32>
    %c17_i32 = arith.constant 17 : i32
    %30 = tpu.dynamic_rotate %29 by %c17_i32 dim 1 : vector<128x256xf32>, i32 -> vector<128x256xf32>
    %c0_16 = arith.constant 0 : index
    %c0_17 = arith.constant 0 : index
    %31 = vector.load %arg3[%c0_16, %c0_17] : memref<288x128xbf16, #tpu.memory_space<vmem>>, vector<32x128xbf16>
    %32 = arith.truncf %30 : vector<128x256xf32> to vector<128x256xbf16>
    %cst_18 = arith.constant dense<0.000000e+00> : vector<32x256xf32>
    %33 = tpu.matmul %31, %32, %cst_18 {dimension_numbers = #tpu.dot_dimension_numbers<[1], [0], [0], [1], [0, 0, 1, 1], [], []>} : vector<32x128xbf16>, vector<128x256xbf16>, vector<32x256xf32> -> vector<32x256xf32>
    %c16_i32 = arith.constant 16 : i32
    %34 = tpu.dynamic_rotate %29 by %c16_i32 dim 1 : vector<128x256xf32>, i32 -> vector<128x256xf32>
    %c32 = arith.constant 32 : index
    %c0_19 = arith.constant 0 : index
    %35 = vector.load %arg3[%c32, %c0_19] : memref<288x128xbf16, #tpu.memory_space<vmem>>, vector<32x128xbf16>
    %36 = arith.truncf %34 : vector<128x256xf32> to vector<128x256xbf16>
    %cst_20 = arith.constant dense<0.000000e+00> : vector<32x256xf32>
    %37 = tpu.matmul %35, %36, %cst_20 {dimension_numbers = #tpu.dot_dimension_numbers<[1], [0], [0], [1], [0, 0, 1, 1], [], []>} : vector<32x128xbf16>, vector<128x256xbf16>, vector<32x256xf32> -> vector<32x256xf32>
    %38 = arith.addf %33, %37 : vector<32x256xf32>
    %c15_i32 = arith.constant 15 : i32
    %39 = tpu.dynamic_rotate %29 by %c15_i32 dim 1 : vector<128x256xf32>, i32 -> vector<128x256xf32>
    %c64 = arith.constant 64 : index
    %c0_21 = arith.constant 0 : index
    %40 = vector.load %arg3[%c64, %c0_21] : memref<288x128xbf16, #tpu.memory_space<vmem>>, vector<32x128xbf16>
    %41 = arith.truncf %39 : vector<128x256xf32> to vector<128x256xbf16>
    %cst_22 = arith.constant dense<0.000000e+00> : vector<32x256xf32>
    %42 = tpu.matmul %40, %41, %cst_22 {dimension_numbers = #tpu.dot_dimension_numbers<[1], [0], [0], [1], [0, 0, 1, 1], [], []>} : vector<32x128xbf16>, vector<128x256xbf16>, vector<32x256xf32> -> vector<32x256xf32>
    %43 = arith.addf %38, %42 : vector<32x256xf32>
    %c1_i32 = arith.constant 1 : i32
    %44 = tpu.dynamic_rotate %29 by %c1_i32 dim 1 : vector<128x256xf32>, i32 -> vector<128x256xf32>
    %c96 = arith.constant 96 : index
    %c0_23 = arith.constant 0 : index
    %45 = vector.load %arg3[%c96, %c0_23] : memref<288x128xbf16, #tpu.memory_space<vmem>>, vector<32x128xbf16>
    %46 = arith.truncf %44 : vector<128x256xf32> to vector<128x256xbf16>
    %cst_24 = arith.constant dense<0.000000e+00> : vector<32x256xf32>
    %47 = tpu.matmul %45, %46, %cst_24 {dimension_numbers = #tpu.dot_dimension_numbers<[1], [0], [0], [1], [0, 0, 1, 1], [], []>} : vector<32x128xbf16>, vector<128x256xbf16>, vector<32x256xf32> -> vector<32x256xf32>
    %48 = arith.addf %43, %47 : vector<32x256xf32>
    %c128 = arith.constant 128 : index
    %c0_25 = arith.constant 0 : index
    %49 = vector.load %arg3[%c128, %c0_25] : memref<288x128xbf16, #tpu.memory_space<vmem>>, vector<32x128xbf16>
    %50 = arith.truncf %29 : vector<128x256xf32> to vector<128x256xbf16>
    %cst_26 = arith.constant dense<0.000000e+00> : vector<32x256xf32>
    %51 = tpu.matmul %49, %50, %cst_26 {dimension_numbers = #tpu.dot_dimension_numbers<[1], [0], [0], [1], [0, 0, 1, 1], [], []>} : vector<32x128xbf16>, vector<128x256xbf16>, vector<32x256xf32> -> vector<32x256xf32>
    %52 = arith.addf %48, %51 : vector<32x256xf32>
    %c255_i32 = arith.constant 255 : i32
    %53 = tpu.dynamic_rotate %29 by %c255_i32 dim 1 : vector<128x256xf32>, i32 -> vector<128x256xf32>
    %c160 = arith.constant 160 : index
    %c0_27 = arith.constant 0 : index
    %54 = vector.load %arg3[%c160, %c0_27] : memref<288x128xbf16, #tpu.memory_space<vmem>>, vector<32x128xbf16>
    %55 = arith.truncf %53 : vector<128x256xf32> to vector<128x256xbf16>
    %cst_28 = arith.constant dense<0.000000e+00> : vector<32x256xf32>
    %56 = tpu.matmul %54, %55, %cst_28 {dimension_numbers = #tpu.dot_dimension_numbers<[1], [0], [0], [1], [0, 0, 1, 1], [], []>} : vector<32x128xbf16>, vector<128x256xbf16>, vector<32x256xf32> -> vector<32x256xf32>
    %57 = arith.addf %52, %56 : vector<32x256xf32>
    %c241_i32 = arith.constant 241 : i32
    %58 = tpu.dynamic_rotate %29 by %c241_i32 dim 1 : vector<128x256xf32>, i32 -> vector<128x256xf32>
    %c192 = arith.constant 192 : index
    %c0_29 = arith.constant 0 : index
    %59 = vector.load %arg3[%c192, %c0_29] : memref<288x128xbf16, #tpu.memory_space<vmem>>, vector<32x128xbf16>
    %60 = arith.truncf %58 : vector<128x256xf32> to vector<128x256xbf16>
    %cst_30 = arith.constant dense<0.000000e+00> : vector<32x256xf32>
    %61 = tpu.matmul %59, %60, %cst_30 {dimension_numbers = #tpu.dot_dimension_numbers<[1], [0], [0], [1], [0, 0, 1, 1], [], []>} : vector<32x128xbf16>, vector<128x256xbf16>, vector<32x256xf32> -> vector<32x256xf32>
    %62 = arith.addf %57, %61 : vector<32x256xf32>
    %c240_i32 = arith.constant 240 : i32
    %63 = tpu.dynamic_rotate %29 by %c240_i32 dim 1 : vector<128x256xf32>, i32 -> vector<128x256xf32>
    %c224 = arith.constant 224 : index
    %c0_31 = arith.constant 0 : index
    %64 = vector.load %arg3[%c224, %c0_31] : memref<288x128xbf16, #tpu.memory_space<vmem>>, vector<32x128xbf16>
    %65 = arith.truncf %63 : vector<128x256xf32> to vector<128x256xbf16>
    %cst_32 = arith.constant dense<0.000000e+00> : vector<32x256xf32>
    %66 = tpu.matmul %64, %65, %cst_32 {dimension_numbers = #tpu.dot_dimension_numbers<[1], [0], [0], [1], [0, 0, 1, 1], [], []>} : vector<32x128xbf16>, vector<128x256xbf16>, vector<32x256xf32> -> vector<32x256xf32>
    %67 = arith.addf %62, %66 : vector<32x256xf32>
    %c239_i32 = arith.constant 239 : i32
    %68 = tpu.dynamic_rotate %29 by %c239_i32 dim 1 : vector<128x256xf32>, i32 -> vector<128x256xf32>
    %c256 = arith.constant 256 : index
    %c0_33 = arith.constant 0 : index
    %69 = vector.load %arg3[%c256, %c0_33] : memref<288x128xbf16, #tpu.memory_space<vmem>>, vector<32x128xbf16>
    %70 = arith.truncf %68 : vector<128x256xf32> to vector<128x256xbf16>
    %cst_34 = arith.constant dense<0.000000e+00> : vector<32x256xf32>
    %71 = tpu.matmul %69, %70, %cst_34 {dimension_numbers = #tpu.dot_dimension_numbers<[1], [0], [0], [1], [0, 0, 1, 1], [], []>} : vector<32x128xbf16>, vector<128x256xbf16>, vector<32x256xf32> -> vector<32x256xf32>
    %72 = arith.addf %67, %71 : vector<32x256xf32>
    %c0_35 = arith.constant 0 : index
    %c0_36 = arith.constant 0 : index
    %73 = vector.load %arg7[%c0_35, %c0_36] : memref<32x256xf32, #tpu.memory_space<vmem>>, vector<32x256xf32>
    tpu.vector_store %arg7[%c0_35, %c0_36], %72 {strides = array<i32>} : memref<32x256xf32, #tpu.memory_space<vmem>>, vector<32x256xf32>,
    return
  }
  func.func @transform_0(%arg0: i32) -> (i32, i32) {
    %c0_i32 = arith.constant 0 : i32
    %c0_i32_0 = arith.constant 0 : i32
    %c0_i32_1 = arith.constant 0 : i32
    return %c0_i32, %c0_i32_0 : i32, i32
  }
  func.func @transform_1(%arg0: i32) -> (i32, i32) {
    %c0_i32 = arith.constant 0 : i32
    %c0_i32_0 = arith.constant 0 : i32
    %c0_i32_1 = arith.constant 0 : i32
    return %c0_i32, %c0_i32_0 : i32, i32
  }
  func.func @transform_2(%arg0: i32) -> (i32, i32) {
    %c0_i32 = arith.constant 0 : i32
    %c0_i32_0 = arith.constant 0 : i32
    %c0_i32_1 = arith.constant 0 : i32
    return %c0_i32, %c0_i32_0 : i32, i32
  }
  func.func @transform_3(%arg0: i32) -> (i32, i32) {
    %c0_i32 = arith.constant 0 : i32
    %c0_i32_0 = arith.constant 0 : i32
    %c0_i32_1 = arith.constant 0 : i32
    return %c0_i32, %c0_i32_0 : i32, i32
  }
  func.func @transform_4(%arg0: i32) -> (i32, i32) {
    %c0_i32 = arith.constant 0 : i32
    %c0_i32_0 = arith.constant 0 : i32
    %c0_i32_1 = arith.constant 0 : i32
    return %c0_i32, %c0_i32_0 : i32, i32
  }
  func.func @transform_5(%arg0: i32) -> (i32, i32) {
    %c0_i32 = arith.constant 0 : i32
    %c0_i32_0 = arith.constant 0 : i32
    %c0_i32_1 = arith.constant 0 : i32
    return %c0_i32, %c0_i32_0 : i32, i32
  }
  func.func @transform_6(%arg0: i32) -> (i32, i32) {
    %c0_i32 = arith.constant 0 : i32
    %c0_i32_0 = arith.constant 0 : i32
    %c0_i32_1 = arith.constant 0 : i32
    return %c0_i32, %c0_i32_0 : i32, i32
  }
}

</mosaic_0001>

<bundles_post_ra>
// kernel: forward.1
= control target key start
LH: loop header
LB: loop body
LE: loop exit
PB: predicated region body
PF: predicated region fallthrough
CT: control target
= control target key end

     0   :  { %vm1774_vm0 = vcmask 556032   ;;  %vm2525_vm1 = vcmask 1041408   ;;  %s5507_s18 = smov 15   ;;  %s5508_s19 = smov 1   ;;  %s8737_s0 = inlined_call_operand.vmem [shape: f32[1408,196], index: 0, kind: input, shape index: {}]   ;;  %s8738_s1 = inlined_call_operand.vmem [shape: bf16[128,1408], index: 1, kind: input, shape index: {}]   ;;  %s8739_s5 = inlined_call_operand.vmem [shape: f32[128,1], index: 5, kind: input, shape index: {}]   ;;  %s8740_s3 = inlined_call_operand.vmem [shape: bf16[196,256], index: 3, kind: input, shape index: {}]   ;;  %s8741_s4 = inlined_call_operand.vmem [shape: f32[128,1], index: 4, kind: input, shape index: {}]   ;;  %s8742_s2 = inlined_call_operand.vmem [shape: bf16[288,128], index: 2, kind: input, shape index: {}]   ;;  %s8743_s6 = inlined_call_operand.vmem [shape: f32[32,256], index: 6, kind: output, shape index: {}]  }
   0x1   :  { %v25_v0 = vld [vmem:[%s8737_s0 + $0x8] sm:$0xff]  ;;  %v27_v1 = vld [vmem:[%s8737_s0 + $0x18] sm:$0xff]  ;;  %v24_v2 = vld [vmem:[%s8737_s0] sm:$0xff]  ;;  %s5509_s20 = smov 127   ;;  %s5510_s25 = smov 113  }
   0x2   :  { %v377_v3 = vpack.c.bf16 %v27_v1, %v25_v0  ;;  %v26_v4 = vld [vmem:[%s8737_s0 + $0x10] sm:$0xff]  ;;  %v29_v5 = vld [vmem:[%s8737_s0 + $0x28] sm:$0xff]  ;;  %v31_v6 = vld [vmem:[%s8737_s0 + $0x38] sm:$0xff]  ;;  %s5511_s29 = smov 112   ;;  %s5512_s9 = smov 111  }
   0x3   :  { %v376_v7 = vpack.c.bf16 %v26_v4, %v24_v2  ;;  %v379_v8 = vpack.c.bf16 %v31_v6, %v29_v5  ;;  %v28_v9 = vld [vmem:[%s8737_s0 + $0x20] sm:$0xff]  ;;  %v30_v10 = vld [vmem:[%s8737_s0 + $0x30] sm:$0xff]  ;;  %v33_v11 = vld [vmem:[%s8737_s0 + $0x48] sm:$0xff] }
   0x4   :  { %1096 = vmatprep.subr.bf16.mxu0 %v377_v3  ;;  %v35_v12 = vld [vmem:[%s8737_s0 + $0x58] sm:$0xff]  ;;  %v378_v13 = vpack.c.bf16 %v30_v10, %v28_v9  ;;  %v32_v15 = vld [vmem:[%s8737_s0 + $0x40] sm:$0xff]  ;;  %v34_v16 = vld [vmem:[%s8737_s0 + $0x50] sm:$0xff] }
   0x5   :  { %1097 = vmatpush1.bf16.msra.mxu0 %v376_v7  ;;  %v381_v14 = vpack.c.bf16 %v35_v12, %v33_v11  ;;  %v37_v17 = vld [vmem:[%s8737_s0 + $0x68] sm:$0xff]  ;;  %v39_v18 = vld [vmem:[%s8737_s0 + $0x78] sm:$0xff]  ;;  %v380_v19 = vpack.c.bf16 %v34_v16, %v32_v15  ;;  %v36_v21 = vld [vmem:[%s8737_s0 + $0x60] sm:$0xff] }
   0x6   :  { %1098 = vmatprep.subr.bf16.mxu0 %v379_v8  ;;  %v383_v20 = vpack.c.bf16 %v39_v18, %v37_v17  ;;  %v38_v22 = vld [vmem:[%s8737_s0 + $0x70] sm:$0xff]  ;;  %v41_v23 = vld [vmem:[%s8737_s0 + $0x88] sm:$0xff]  ;;  %v43_v24 = vld [vmem:[%s8737_s0 + $0x98] sm:$0xff] }
   0x7   :  { %v382_v25 = vpack.c.bf16 %v38_v22, %v36_v21  ;;  %v385_v26 = vpack.c.bf16 %v43_v24, %v41_v23  ;;  %v40_v27 = vld [vmem:[%s8737_s0 + $0x80] sm:$0xff]  ;;  %v42_v28 = vld [vmem:[%s8737_s0 + $0x90] sm:$0xff]  ;;  %v45_v29 = vld [vmem:[%s8737_s0 + $0xa8] sm:$0xff] }
   0x8   :  { %v47_v30 = vld [vmem:[%s8737_s0 + $0xb8] sm:$0xff]  ;;  %v384_v31 = vpack.c.bf16 %v42_v28, %v40_v27  ;;  %v44_v33 = vld [vmem:[%s8737_s0 + $0xa0] sm:$0xff]  ;;  %v46_v34 = vld [vmem:[%s8737_s0 + $0xb0] sm:$0xff] }
   0x9   :  { %1099 = vmatpush1.bf16.msra.mxu0 %v378_v13  ;;  %v387_v32 = vpack.c.bf16 %v47_v30, %v45_v29  ;;  %v49_v35 = vld [vmem:[%s8737_s0 + $0xc8] sm:$0xff]  ;;  %v51_v36 = vld [vmem:[%s8737_s0 + $0xd8] sm:$0xff]  ;;  %v386_v37 = vpack.c.bf16 %v46_v34, %v44_v33  ;;  %v48_v38 = vld [vmem:[%s8737_s0 + $0xc0] sm:$0xff] }
   0xa   :  { %1100 = vmatprep.subr.bf16.mxu0 %v381_v14  ;;  %v389_v39 = vpack.c.bf16 %v51_v36, %v49_v35  ;;  %v50_v40 = vld [vmem:[%s8737_s0 + $0xd0] sm:$0xff]  ;;  %v53_v41 = vld [vmem:[%s8737_s0 + $0xe8] sm:$0xff]  ;;  %v55_v42 = vld [vmem:[%s8737_s0 + $0xf8] sm:$0xff] }
   0xb   :  { %v5290_v43 = vld [vmem:[%s8738_s1 + $0x4] ss:$44 sps:$4 sm:$0xff]   ;;  %v388_v44 = vpack.c.bf16 %v50_v40, %v48_v38  ;;  %v391_v46 = vpack.c.bf16 %v55_v42, %v53_v41  ;;  %v57_v48 = vld [vmem:[%s8737_s0 + $0x108] sm:$0xff]  ;;  %v59_v49 = vld [vmem:[%s8737_s0 + $0x118] sm:$0xff] }
   0xc   :  { %v52_v45 = vld [vmem:[%s8737_s0 + $0xe0] sm:$0xff]  ;;  %1128 = vmatprep.mubr.bf16.mxu0 %v5290_v43  ;;  %v54_v47 = vld [vmem:[%s8737_s0 + $0xf0] sm:$0xff]  ;;  %v393_v52 = vpack.c.bf16 %v59_v49, %v57_v48  ;;  %v61_v54 = vld [vmem:[%s8737_s0 + $0x128] sm:$0xff] }
   0xd   :  { %1101 = vmatpush1.bf16.msra.mxu0 %v380_v19  ;;  %v390_v50 = vpack.c.bf16 %v54_v47, %v52_v45  ;;  %v56_v51 = vld [vmem:[%s8737_s0 + $0x100] sm:$0xff]  ;;  %v58_v53 = vld [vmem:[%s8737_s0 + $0x110] sm:$0xff]  ;;  %v63_v55 = vld [vmem:[%s8737_s0 + $0x138] sm:$0xff] }
   0xe   :  { %1102 = vmatprep.subr.bf16.mxu0 %v383_v20  ;;  %v392_v56 = vpack.c.bf16 %v58_v53, %v56_v51  ;;  %v60_v57 = vld [vmem:[%s8737_s0 + $0x120] sm:$0xff]  ;;  %v395_v58 = vpack.c.bf16 %v63_v55, %v61_v54  ;;  %v62_v59 = vld [vmem:[%s8737_s0 + $0x130] sm:$0xff]  ;;  %v65_v60 = vld [vmem:[%s8737_s0 + $0x148] sm:$0xff] }
   0xf   :  { %v67_v61 = vld [vmem:[%s8737_s0 + $0x158] sm:$0xff]  ;;  %v394_v62 = vpack.c.bf16 %v62_v59, %v60_v57  ;;  %v64_v63 = vld [vmem:[%s8737_s0 + $0x140] sm:$0xff]  ;;  %v66_v1 = vld [vmem:[%s8737_s0 + $0x150] sm:$0xff] }
  0x10   :  { %v397_v0 = vpack.c.bf16 %v67_v61, %v65_v60  ;;  %v69_v2 = vld [vmem:[%s8737_s0 + $0x168] sm:$0xff]  ;;  %v71_v3 = vld [vmem:[%s8737_s0 + $0x178] sm:$0xff]  ;;  %v396_v4 = vpack.c.bf16 %v66_v1, %v64_v63  ;;  %v68_v5 = vld [vmem:[%s8737_s0 + $0x160] sm:$0xff] }
  0x11   :  { %1103 = vmatpush1.bf16.msra.mxu0 %v382_v25  ;;  %v399_v6 = vpack.c.bf16 %v71_v3, %v69_v2  ;;  %v70_v7 = vld [vmem:[%s8737_s0 + $0x170] sm:$0xff]  ;;  %v73_v8 = vld [vmem:[%s8737_s0 + $0x188] sm:$0xff]  ;;  %v75_v9 = vld [vmem:[%s8737_s0 + $0x198] sm:$0xff] }
  0x12   :  { %1104 = vmatprep.subr.bf16.mxu0 %v385_v26  ;;  %v398_v10 = vpack.c.bf16 %v70_v7, %v68_v5  ;;  %v72_v11 = vld [vmem:[%s8737_s0 + $0x180] sm:$0xff]  ;;  %v401_v12 = vpack.c.bf16 %v75_v9, %v73_v8  ;;  %v74_v13 = vld [vmem:[%s8737_s0 + $0x190] sm:$0xff]  ;;  %v77_v14 = vld [vmem:[%s8737_s0 + $0x1a8] sm:$0xff] }
  0x13   :  { %v79_v15 = vld [vmem:[%s8737_s0 + $0x1b8] sm:$0xff]  ;;  %v400_v16 = vpack.c.bf16 %v74_v13, %v72_v11  ;;  %v76_v17 = vld [vmem:[%s8737_s0 + $0x1a0] sm:$0xff]  ;;  %v78_v19 = vld [vmem:[%s8737_s0 + $0x1b0] sm:$0xff] }
  0x14   :  { %v403_v18 = vpack.c.bf16 %v79_v15, %v77_v14  ;;  %v81_v20 = vld [vmem:[%s8737_s0 + $0x1c8] sm:$0xff]  ;;  %v83_v21 = vld [vmem:[%s8737_s0 + $0x1d8] sm:$0xff]  ;;  %v402_v22 = vpack.c.bf16 %v78_v19, %v76_v17  ;;  %v80_v23 = vld [vmem:[%s8737_s0 + $0x1c0] sm:$0xff] }
  0x15   :  { %1105 = vmatpush1.bf16.msra.mxu0 %v384_v31  ;;  %v405_v24 = vpack.c.bf16 %v83_v21, %v81_v20  ;;  %v82_v25 = vld [vmem:[%s8737_s0 + $0x1d0] sm:$0xff]  ;;  %v85_v26 = vld [vmem:[%s8737_s0 + $0x1e8] sm:$0xff]  ;;  %v87_v27 = vld [vmem:[%s8737_s0 + $0x1f8] sm:$0xff] }
  0x16   :  { %1106 = vmatprep.subr.bf16.mxu0 %v387_v32  ;;  %v404_v28 = vpack.c.bf16 %v82_v25, %v80_v23  ;;  %v84_v29 = vld [vmem:[%s8737_s0 + $0x1e0] sm:$0xff]  ;;  %v407_v30 = vpack.c.bf16 %v87_v27, %v85_v26  ;;  %v86_v31 = vld [vmem:[%s8737_s0 + $0x1f0] sm:$0xff]  ;;  %v89_v32 = vld [vmem:[%s8737_s0 + $0x208] sm:$0xff] }
  0x17   :  { %v91_v33 = vld [vmem:[%s8737_s0 + $0x218] sm:$0xff]  ;;  %v406_v34 = vpack.c.bf16 %v86_v31, %v84_v29  ;;  %v88_v35 = vld [vmem:[%s8737_s0 + $0x200] sm:$0xff]  ;;  %v93_v38 = vld [vmem:[%s8737_s0 + $0x228] sm:$0xff] }
  0x18   :  { %v409_v36 = vpack.c.bf16 %v91_v33, %v89_v32  ;;  %v5288_v40 = vld [vmem:[%s8738_s1] ss:$44 sps:$4 sm:$0xff]   ;;  %v5291_v43 = vld [vmem:[%s8738_s1 + $0x5c] ss:$44 sps:$4 sm:$0xff]   ;;  %v94_v45 = vld [vmem:[%s8737_s0 + $0x230] sm:$0xff] }
  0x19   :  { %1107 = vmatpush1.bf16.msra.mxu0 %v386_v37  ;;  %v90_v37 = vld [vmem:[%s8737_s0 + $0x210] sm:$0xff]  ;;  %v92_v42 = vld [vmem:[%s8737_s0 + $0x220] sm:$0xff]  ;;  %v99_v47 = vld [vmem:[%s8737_s0 + $0x258] sm:$0xff] }
  0x1a   :  { %1108 = vmatprep.subr.bf16.mxu0 %v389_v39  ;;  %v95_v39 = vld [vmem:[%s8737_s0 + $0x238] sm:$0xff]  ;;  %v408_v41 = vpack.c.bf16 %v90_v37, %v88_v35  ;;  %v410_v48 = vpack.c.bf16 %v94_v45, %v92_v42  ;;  %v96_v49 = vld [vmem:[%s8737_s0 + $0x240] sm:$0xff]  ;;  %v98_v51 = vld [vmem:[%s8737_s0 + $0x250] sm:$0xff] }
  0x1b   :  { %v103_v53 = vld [vmem:[%s8737_s0 + $0x278] sm:$0xff]  ;;  %v412_v55 = vpack.c.bf16 %v98_v51, %v96_v49  ;;  %v5294_v57 = vld [vmem:[%s8738_s1 + $0xb4] ss:$44 sps:$4 sm:$0xff]   ;;  %v105_v60 = vld [vmem:[%s8737_s0 + $0x288] sm:$0xff] }
  0x1c   :  { %v5293_v54 = vld [vmem:[%s8738_s1 + $0x58] ss:$44 sps:$4 sm:$0xff]   ;;  %v102_v59 = vld [vmem:[%s8737_s0 + $0x270] sm:$0xff]  ;;  %v109_v2 = vld [vmem:[%s8737_s0 + $0x2a8] sm:$0xff] }
  0x1d   :  { %1109 = vmatpush1.bf16.msra.mxu0 %v388_v44  ;;  %v411_v44 = vpack.c.bf16 %v95_v39, %v93_v38  ;;  %v107_v61 = vld [vmem:[%s8737_s0 + $0x298] sm:$0xff]  ;;  %v104_v63 = vld [vmem:[%s8737_s0 + $0x280] sm:$0xff]  ;;  %v106_v1 = vld [vmem:[%s8737_s0 + $0x290] sm:$0xff] }
  0x1e   :  { %1110 = vmatprep.subr.bf16.mxu0 %v391_v46  ;;  %v97_v46 = vld [vmem:[%s8737_s0 + $0x248] sm:$0xff]  ;;  %v111_v3 = vld [vmem:[%s8737_s0 + $0x2b8] sm:$0xff]  ;;  %v416_v5 = vpack.c.bf16 %v106_v1, %v104_v63  ;;  %v110_v9 = vld [vmem:[%s8737_s0 + $0x2b0] sm:$0xff] }
  0x1f   :  { %v5297_v7 = vld [vmem:[%s8738_s1 + $0x10c] ss:$44 sps:$4 sm:$0xff]   ;;  %v419_v8 = vpack.c.bf16 %v111_v3, %v109_v2  ;;  %v112_v13 = vld [vmem:[%s8737_s0 + $0x2c0] sm:$0xff]  ;;  %v114_v15 = vld [vmem:[%s8737_s0 + $0x2d0] sm:$0xff] }
  0x20   :  { %v115_v11 = vld [vmem:[%s8737_s0 + $0x2d8] sm:$0xff]  ;;  %v420_v19 = vpack.c.bf16 %v114_v15, %v112_v13  ;;  %v116_v20 = vld [vmem:[%s8737_s0 + $0x2e0] sm:$0xff]  ;;  %v118_v23 = vld [vmem:[%s8737_s0 + $0x2f0] sm:$0xff] }
  0x21   :  { %1111 = vmatpush1.bf16.msra.mxu0 %v390_v50  ;;  %v413_v50 = vpack.c.bf16 %v99_v47, %v97_v46  ;;  %v119_v17 = vld [vmem:[%s8737_s0 + $0x2f8] sm:$0xff]  ;;  %v5300_v21 = vld [vmem:[%s8738_s1 + $0x164] ss:$44 sps:$4 sm:$0xff]   ;;  %v422_v26 = vpack.c.bf16 %v118_v23, %v116_v20  ;;  %v5302_v32 = vld [vmem:[%s8738_s1 + $0x160] ss:$44 sps:$4 sm:$0xff]  }
  0x22   :  { %1112 = vmatprep.subr.bf16.mxu0 %v393_v52  ;;  %v101_v52 = vld [vmem:[%s8737_s0 + $0x268] sm:$0xff]  ;;  %v123_v25 = vld [vmem:[%s8737_s0 + $0x318] sm:$0xff]  ;;  %v120_v27 = vld [vmem:[%s8737_s0 + $0x300] sm:$0xff] }
  0x23   :  { %v122_v29 = vld [vmem:[%s8737_s0 + $0x310] sm:$0xff]  ;;  %v127_v31 = vld [vmem:[%s8737_s0 + $0x338] sm:$0xff]  ;;  %v129_v38 = vld [vmem:[%s8737_s0 + $0x348] sm:$0xff] }
  0x24   :  { %v424_v33 = vpack.c.bf16 %v122_v29, %v120_v27  ;;  %v5303_v35 = vld [vmem:[%s8738_s1 + $0x1bc] ss:$44 sps:$4 sm:$0xff]   ;;  %v126_v37 = vld [vmem:[%s8737_s0 + $0x330] sm:$0xff]  ;;  %v5305_v46 = vld [vmem:[%s8738_s1 + $0x1b8] ss:$44 sps:$4 sm:$0xff]  }
  0x25   :  { %1113 = vmatpush1.bf16.msra.mxu0 %v392_v56  ;;  %v100_v56 = vld [vmem:[%s8737_s0 + $0x260] sm:$0xff]  ;;  %v131_v39 = vld [vmem:[%s8737_s0 + $0x358] sm:$0xff]  ;;  %v134_v51 = vld [vmem:[%s8737_s0 + $0x370] sm:$0xff] }
  0x26   :  { %1114 = vmatprep.subr.bf16.mxu0 %v395_v58  ;;  %v415_v58 = vpack.c.bf16 %v103_v53, %v101_v52  ;;  %v429_v42 = vpack.c.bf16 %v131_v39, %v129_v38  ;;  %v135_v45 = vld [vmem:[%s8737_s0 + $0x378] sm:$0xff]  ;;  %v5306_v49 = vld [vmem:[%s8738_s1 + $0x214] ss:$44 sps:$4 sm:$0xff]   ;;  %v137_v52 = vld [vmem:[%s8737_s0 + $0x388] sm:$0xff] }
  0x27   :  { %v139_v53 = vld [vmem:[%s8737_s0 + $0x398] sm:$0xff]  ;;  %v142_v1 = vld [vmem:[%s8737_s0 + $0x3b0] sm:$0xff]  ;;  %v145_v2 = vld [vmem:[%s8737_s0 + $0x3c8] sm:$0xff] }
  0x28   :  { %v5309_v63 = vld [vmem:[%s8738_s1 + $0x26c] ss:$44 sps:$4 sm:$0xff]   ;;  %v150_v15 = vld [vmem:[%s8737_s0 + $0x3f0] sm:$0xff] }
  0x29   :  { %1115 = vmatpush1.bf16.msra.mxu0 %v394_v62  ;;  %v414_v62 = vpack.c.bf16 %v102_v59, %v100_v56  ;;  %v138_v56 = vld [vmem:[%s8737_s0 + $0x390] sm:$0xff]  ;;  %v141_v59 = vld [vmem:[%s8737_s0 + $0x3a8] sm:$0xff]  ;;  %v147_v3 = vld [vmem:[%s8737_s0 + $0x3d8] sm:$0xff] }
  0x2a   :  { %1116 = vmatprep.subr.bf16.mxu0 %v397_v0  ;;  %v417_v0 = vpack.c.bf16 %v107_v61, %v105_v60  ;;  %v143_v60 = vld [vmem:[%s8737_s0 + $0x3b8] sm:$0xff]  ;;  %v154_v20 = vld [vmem:[%s8737_s0 + $0x410] sm:$0xff]  ;;  %v157_v23 = vld [vmem:[%s8737_s0 + $0x428] sm:$0xff] }
  0x2b   :  { %v5314_v13 = vld [vmem:[%s8738_s1 + $0xc] ss:$44 sps:$4 sm:$0xff]   ;;  %v5315_v27 = vld [vmem:[%s8738_s1 + $0x64] ss:$44 sps:$4 sm:$0xff]  }
  0x2c   :  { %v158_v29 = vld [vmem:[%s8737_s0 + $0x430] sm:$0xff]  ;;  %v167_v38 = vld [vmem:[%s8737_s0 + $0x478] sm:$0xff] }
  0x2d   :  { %1117 = vmatpush1.bf16.msra.mxu0 %v396_v4  ;;  %v5296_v4 = vld [vmem:[%s8738_s1 + $0xb0] ss:$44 sps:$4 sm:$0xff]  }
  0x2e   :  { %1118 = vmatprep.subr.bf16.mxu0 %v399_v6  ;;  %v108_v6 = vld [vmem:[%s8737_s0 + $0x2a0] sm:$0xff] }
  0x31   :  { %1119 = vmatpush1.bf16.msra.mxu0 %v398_v10  ;;  %v113_v10 = vld [vmem:[%s8737_s0 + $0x2c8] sm:$0xff] }
  0x32   :  { %1120 = vmatprep.subr.bf16.mxu0 %v401_v12  ;;  %v418_v12 = vpack.c.bf16 %v110_v9, %v108_v6  ;;  %v421_v14 = vpack.c.bf16 %v115_v11, %v113_v10  ;;  %v146_v6 = vld [vmem:[%s8737_s0 + $0x3d0] sm:$0xff]  ;;  %v149_v9 = vld [vmem:[%s8737_s0 + $0x3e8] sm:$0xff]  ;;  %v151_v10 = vld [vmem:[%s8737_s0 + $0x3f8] sm:$0xff] }
  0x35   :  { %1121 = vmatpush1.bf16.msra.mxu0 %v400_v16  ;;  %v117_v16 = vld [vmem:[%s8737_s0 + $0x2e8] sm:$0xff] }
  0x36   :  { %1122 = vmatprep.subr.bf16.mxu0 %v403_v18  ;;  %v5299_v18 = vld [vmem:[%s8738_s1 + $0x108] ss:$44 sps:$4 sm:$0xff]  }
  0x39   :  { %1123 = vmatpush1.bf16.msra.mxu0 %v402_v22  ;;  %v423_v22 = vpack.c.bf16 %v119_v17, %v117_v16  ;;  %v153_v16 = vld [vmem:[%s8737_s0 + $0x408] sm:$0xff]  ;;  %v155_v17 = vld [vmem:[%s8737_s0 + $0x418] sm:$0xff] }
  0x3a   :  { %1124 = vmatprep.subr.bf16.mxu0 %v405_v24  ;;  %v121_v24 = vld [vmem:[%s8737_s0 + $0x308] sm:$0xff] }
  0x3d   :  { %1125 = vmatpush1.bf16.msra.mxu0 %v404_v28  ;;  %v425_v28 = vpack.c.bf16 %v123_v25, %v121_v24  ;;  %v159_v24 = vld [vmem:[%s8737_s0 + $0x438] sm:$0xff] }
  0x3e   :  { %1126 = vmatprep.subr.bf16.mxu0 %v407_v30  ;;  %v125_v30 = vld [vmem:[%s8737_s0 + $0x328] sm:$0xff] }
  0x41   :  { %1127 = vmatpush1.bf16.msra.mxu0 %v406_v34  ;;  %v124_v34 = vld [vmem:[%s8737_s0 + $0x320] sm:$0xff] }
  0x42   :  { %1209 = vmatprep.subr.bf16.mxu0 %v409_v36  ;;  %v427_v36 = vpack.c.bf16 %v127_v31, %v125_v30  ;;  %v161_v30 = vld [vmem:[%s8737_s0 + $0x448] sm:$0xff]  ;;  %v163_v31 = vld [vmem:[%s8737_s0 + $0x458] sm:$0xff] }
  0x44   :  { %1129 = vmatmul.mubr.bf16.vlgmr.msra.gmra.mrb[0].mxu0 %v5288_v40  ;;  %v426_v40 = vpack.c.bf16 %v126_v37, %v124_v34  ;;  %v162_v34 = vld [vmem:[%s8737_s0 + $0x450] sm:$0xff]  ;;  %v165_v37 = vld [vmem:[%s8737_s0 + $0x468] sm:$0xff] }
  0x45   :  { %1210 = vmatpush1.bf16.msra.mxu0 %v408_v41  ;;  %1138 = vmatprep.mubr.bf16.mxu0 %v5291_v43  ;;  %v128_v41 = vld [vmem:[%s8737_s0 + $0x340] sm:$0xff]  ;;  %v130_v43 = vld [vmem:[%s8737_s0 + $0x350] sm:$0xff] }
  0x46   :  { %1211 = vmatprep.subr.bf16.mxu0 %v411_v44  ;;  %v133_v44 = vld [vmem:[%s8737_s0 + $0x368] sm:$0xff]  ;;  %v428_v47 = vpack.c.bf16 %v130_v43, %v128_v41  ;;  %v447_v41 = vpack.c.bf16 %v167_v38, %v165_v37  ;;  %v166_v43 = vld [vmem:[%s8737_s0 + $0x470] sm:$0xff]  ;;  %v347_v37 = vld [vmem:[%s8737_s0 + $0xa18] sm:$0xff] }
  0x47   :  { %v201_v38 = vld [vmem:[%s8737_s0 + $0x588] sm:$0xff] }
  0x49   :  { %1212 = vmatpush1.bf16.msra.mxu0 %v410_v48  ;;  %v132_v48 = vld [vmem:[%s8737_s0 + $0x360] sm:$0xff] }
  0x4a   :  { %1213 = vmatprep.subr.bf16.mxu0 %v413_v50  ;;  %v431_v50 = vpack.c.bf16 %v135_v45, %v133_v44  ;;  %v169_v44 = vld [vmem:[%s8737_s0 + $0x488] sm:$0xff]  ;;  %v171_v45 = vld [vmem:[%s8737_s0 + $0x498] sm:$0xff] }
  0x4c   :  { %1139 = vmatmul.mubr.bf16.gmra.mrb[4].mxu0 %v5293_v54  ;;  %v430_v54 = vpack.c.bf16 %v134_v51, %v132_v48  ;;  %v168_v48 = vld [vmem:[%s8737_s0 + $0x480] sm:$0xff]  ;;  %v175_v51 = vld [vmem:[%s8737_s0 + $0x4b8] sm:$0xff] }
  0x4d   :  { %1214 = vmatpush1.bf16.msra.mxu0 %v412_v55  ;;  %1148 = vmatprep.mubr.bf16.mxu0 %v5294_v57  ;;  %v136_v55 = vld [vmem:[%s8737_s0 + $0x380] sm:$0xff]  ;;  %v5308_v57 = vld [vmem:[%s8738_s1 + $0x210] ss:$44 sps:$4 sm:$0xff]  }
  0x4e   :  { %1215 = vmatprep.subr.bf16.mxu0 %v415_v58  ;;  %v433_v58 = vpack.c.bf16 %v139_v53, %v137_v52  ;;  %v432_v61 = vpack.c.bf16 %v138_v56, %v136_v55  ;;  %v5320_v52 = vld [vmem:[%s8738_s1 + $0xb8] ss:$44 sps:$4 sm:$0xff]  }
  0x4f   :  { %v172_v56 = vld [vmem:[%s8737_s0 + $0x4a0] sm:$0xff] }
  0x51   :  { %1216 = vmatpush1.bf16.msra.mxu0 %v414_v62  ;;  %v140_v62 = vld [vmem:[%s8737_s0 + $0x3a0] sm:$0xff] }
  0x52   :  { %1217 = vmatprep.subr.bf16.mxu0 %v417_v0  ;;  %v435_v0 = vpack.c.bf16 %v143_v60, %v141_v59  ;;  %v179_v59 = vld [vmem:[%s8737_s0 + $0x4d8] sm:$0xff] }
  0x54   :  { %1149 = vmatmul.mubr.bf16.gmra.mrb[8].mxu0 %v5296_v4  ;;  %v434_v4 = vpack.c.bf16 %v142_v1, %v140_v62  ;;  %v176_v62 = vld [vmem:[%s8737_s0 + $0x4c0] sm:$0xff]  ;;  %v183_v1 = vld [vmem:[%s8737_s0 + $0x4f8] sm:$0xff] }
  0x55   :  { %1218 = vmatpush1.bf16.msra.mxu0 %v416_v5  ;;  %1158 = vmatprep.mubr.bf16.mxu0 %v5297_v7  ;;  %v144_v5 = vld [vmem:[%s8737_s0 + $0x3c0] sm:$0xff]  ;;  %v5311_v7 = vld [vmem:[%s8738_s1 + $0x268] ss:$44 sps:$4 sm:$0xff]  }
  0x56   :  { %1219 = vmatprep.subr.bf16.mxu0 %v419_v8  ;;  %v437_v8 = vpack.c.bf16 %v147_v3, %v145_v2  ;;  %v436_v11 = vpack.c.bf16 %v146_v6, %v144_v5  ;;  %v5323_v2 = vld [vmem:[%s8738_s1 + $0x110] ss:$44 sps:$4 sm:$0xff]   ;;  %v180_v6 = vld [vmem:[%s8737_s0 + $0x4e0] sm:$0xff] }
  0x59   :  { %1220 = vmatpush1.bf16.msra.mxu0 %v418_v12  ;;  %v148_v12 = vld [vmem:[%s8737_s0 + $0x3e0] sm:$0xff] }
  0x5a   :  { %1221 = vmatprep.subr.bf16.mxu0 %v421_v14  ;;  %v439_v14 = vpack.c.bf16 %v151_v10, %v149_v9  ;;  %v187_v9 = vld [vmem:[%s8737_s0 + $0x518] sm:$0xff] }
  0x5c   :  { %1159 = vmatmul.mubr.bf16.gmra.mrb[12].mxu0 %v5299_v18  ;;  %v438_v18 = vpack.c.bf16 %v150_v15, %v148_v12  ;;  %v184_v12 = vld [vmem:[%s8737_s0 + $0x500] sm:$0xff]  ;;  %v191_v15 = vld [vmem:[%s8737_s0 + $0x538] sm:$0xff] }
  0x5d   :  { %1222 = vmatpush1.bf16.msra.mxu0 %v420_v19  ;;  %1168 = vmatprep.mubr.bf16.mxu0 %v5300_v21  ;;  %v152_v19 = vld [vmem:[%s8737_s0 + $0x400] sm:$0xff]  ;;  %v5312_v21 = vld [vmem:[%s8738_s1 + $0x8] ss:$44 sps:$4 sm:$0xff]  }
  0x5e   :  { %1223 = vmatprep.subr.bf16.mxu0 %v423_v22  ;;  %v441_v22 = vpack.c.bf16 %v155_v17, %v153_v16  ;;  %v440_v25 = vpack.c.bf16 %v154_v20, %v152_v19  ;;  %v5326_v16 = vld [vmem:[%s8738_s1 + $0x168] ss:$44 sps:$4 sm:$0xff]   ;;  %v188_v20 = vld [vmem:[%s8737_s0 + $0x520] sm:$0xff] }
  0x61   :  { %1224 = vmatpush1.bf16.msra.mxu0 %v422_v26  ;;  %v156_v26 = vld [vmem:[%s8737_s0 + $0x420] sm:$0xff] }
  0x62   :  { %1225 = vmatprep.subr.bf16.mxu0 %v425_v28  ;;  %v443_v28 = vpack.c.bf16 %v159_v24, %v157_v23  ;;  %v195_v23 = vld [vmem:[%s8737_s0 + $0x558] sm:$0xff] }
  0x64   :  { %1169 = vmatmul.mubr.bf16.gmra.mrb[16].mxu0 %v5302_v32  ;;  %v442_v32 = vpack.c.bf16 %v158_v29, %v156_v26  ;;  %v192_v26 = vld [vmem:[%s8737_s0 + $0x540] sm:$0xff]  ;;  %v199_v29 = vld [vmem:[%s8737_s0 + $0x578] sm:$0xff] }
  0x65   :  { %1226 = vmatpush1.bf16.msra.mxu0 %v424_v33  ;;  %1178 = vmatprep.mubr.bf16.mxu0 %v5303_v35  ;;  %v160_v33 = vld [vmem:[%s8737_s0 + $0x440] sm:$0xff] }
  0x66   :  { %1227 = vmatprep.subr.bf16.mxu0 %v427_v36  ;;  %v5317_v35 = vld [vmem:[%s8738_s1 + $0x60] ss:$44 sps:$4 sm:$0xff]   ;;  %v445_v36 = vpack.c.bf16 %v163_v31, %v161_v30  ;;  %v444_v39 = vpack.c.bf16 %v162_v34, %v160_v33  ;;  %v5330_v33 = vld [vmem:[%s8738_s1 + $0x21c] ss:$44 sps:$4 sm:$0xff]  }
  0x67   :  { %v5329_v30 = vld [vmem:[%s8738_s1 + $0x1c0] ss:$44 sps:$4 sm:$0xff]  }
  0x69   :  { %1228 = vmatpush1.bf16.msra.mxu0 %v426_v40  ;;  %v5318_v40 = vld [vmem:[%s8738_s1 + $0xbc] ss:$44 sps:$4 sm:$0xff]  }
  0x6a   :  { %1229 = vmatprep.subr.bf16.mxu0 %v429_v42  ;;  %v164_v42 = vld [vmem:[%s8737_s0 + $0x460] sm:$0xff] }
  0x6c   :  { %1179 = vmatmul.mubr.bf16.gmra.mrb[20].mxu0 %v5305_v46  ;;  %v446_v46 = vpack.c.bf16 %v166_v43, %v164_v42  ;;  %v346_v42 = vld [vmem:[%s8737_s0 + $0xa10] sm:$0xff] }
  0x6d   :  { %1230 = vmatpush1.bf16.msra.mxu0 %v428_v47  ;;  %1188 = vmatprep.mubr.bf16.mxu0 %v5306_v49  ;;  %v449_v47 = vpack.c.bf16 %v171_v45, %v169_v44  ;;  %v170_v49 = vld [vmem:[%s8737_s0 + $0x490] sm:$0xff]  ;;  %v200_v44 = vld [vmem:[%s8737_s0 + $0x580] sm:$0xff] }
  0x6e   :  { %1231 = vmatprep.subr.bf16.mxu0 %v431_v50  ;;  %v173_v50 = vld [vmem:[%s8737_s0 + $0x4a8] sm:$0xff]  ;;  %v448_v53 = vpack.c.bf16 %v170_v49, %v168_v48  ;;  %v202_v48 = vld [vmem:[%s8737_s0 + $0x590] sm:$0xff] }
  0x6f   :  { %v451_v55 = vpack.c.bf16 %v175_v51, %v173_v50  ;;  %v205_v49 = vld [vmem:[%s8737_s0 + $0x5a8] sm:$0xff]  ;;  %v351_v50 = vld [vmem:[%s8737_s0 + $0xa38] sm:$0xff] }
  0x70   :  { %v207_v51 = vld [vmem:[%s8737_s0 + $0x5b8] sm:$0xff] }
  0x71   :  { %1232 = vmatpush1.bf16.msra.mxu0 %v430_v54  ;;  %v5321_v54 = vld [vmem:[%s8738_s1 + $0x114] ss:$44 sps:$4 sm:$0xff]  }
  0x72   :  { %1233 = vmatprep.subr.bf16.mxu0 %v433_v58  ;;  %v177_v58 = vld [vmem:[%s8737_s0 + $0x4c8] sm:$0xff] }
  0x74   :  { %1189 = vmatmul.mubr.bf16.gmra.mrb[24].mxu0 %v5308_v57  ;;  %v174_v57 = vld [vmem:[%s8737_s0 + $0x4b0] sm:$0xff] }
  0x75   :  { %1234 = vmatpush1.bf16.msra.mxu0 %v432_v61  ;;  %1198 = vmatprep.mubr.bf16.mxu0 %v5309_v63  ;;  %v450_v60 = vpack.c.bf16 %v174_v57, %v172_v56  ;;  %v453_v61 = vpack.c.bf16 %v179_v59, %v177_v58  ;;  %v178_v63 = vld [vmem:[%s8737_s0 + $0x4d0] sm:$0xff]  ;;  %v464_v57 = vpack.c.bf16 %v202_v48, %v200_v44  ;;  %v204_v58 = vld [vmem:[%s8737_s0 + $0x5a0] sm:$0xff] }
  0x76   :  { %1235 = vmatprep.subr.bf16.mxu0 %v435_v0  ;;  %v181_v0 = vld [vmem:[%s8737_s0 + $0x4e8] sm:$0xff]  ;;  %v452_v3 = vpack.c.bf16 %v178_v63, %v176_v62  ;;  %v5333_v59 = vld [vmem:[%s8738_s1 + $0x274] ss:$44 sps:$4 sm:$0xff]   ;;  %v355_v63 = vld [vmem:[%s8737_s0 + $0xa58] sm:$0xff] }
  0x77   :  { %v455_v5 = vpack.c.bf16 %v183_v1, %v181_v0  ;;  %v353_v62 = vld [vmem:[%s8737_s0 + $0xa48] sm:$0xff]  ;;  %v211_v1 = vld [vmem:[%s8737_s0 + $0x5d8] sm:$0xff] }
  0x78   :  { %v209_v0 = vld [vmem:[%s8737_s0 + $0x5c8] sm:$0xff]  ;;  %v5336_v44 = vld [vmem:[%s8738_s1 + $0x10] ss:$44 sps:$4 sm:$0xff]  }
  0x79   :  { %1236 = vmatpush1.bf16.msra.mxu0 %v434_v4  ;;  %v5324_v4 = vld [vmem:[%s8738_s1 + $0x16c] ss:$44 sps:$4 sm:$0xff]  }
  0x7a   :  { %1237 = vmatprep.subr.bf16.mxu0 %v437_v8  ;;  %v185_v8 = vld [vmem:[%s8737_s0 + $0x508] sm:$0xff] }
  0x7c   :  { %1199 = vmatmul.mubr.bf16.gmra.mrb[28].mxu0 %v5311_v7  ;;  %v182_v7 = vld [vmem:[%s8737_s0 + $0x4f0] sm:$0xff] }
  0x7d   :  { %1238 = vmatpush1.bf16.msra.mxu0 %v436_v11  ;;  %1241 = vmatprep.mubr.bf16.mxu0 %v5314_v13  ;;  %v454_v10 = vpack.c.bf16 %v182_v7, %v180_v6  ;;  %v457_v11 = vpack.c.bf16 %v187_v9, %v185_v8  ;;  %v186_v13 = vld [vmem:[%s8737_s0 + $0x510] sm:$0xff]  ;;  %v208_v6 = vld [vmem:[%s8737_s0 + $0x5c0] sm:$0xff]  ;;  %v357_v8 = vld [vmem:[%s8737_s0 + $0xa68] sm:$0xff]  ;;  %v469_v9 = vpack.c.bf16 %v211_v1, %v209_v0 }
  0x7e   :  { %1239 = vmatprep.subr.bf16.mxu0 %v439_v14  ;;  %v189_v14 = vld [vmem:[%s8737_s0 + $0x528] sm:$0xff]  ;;  %v456_v17 = vpack.c.bf16 %v186_v13, %v184_v12  ;;  %v359_v12 = vld [vmem:[%s8737_s0 + $0xa78] sm:$0xff]  ;;  %v372_v1 = vld [vmem:[%s8737_s0 + $0xae0] sm:$0xff] }
  0x7f   :  { %v459_v19 = vpack.c.bf16 %v191_v15, %v189_v14  ;;  %v215_v13 = vld [vmem:[%s8737_s0 + $0x5f8] sm:$0xff]  ;;  %v6271_v14 = vpack.c.bf16 %v359_v12, %v357_v8  ;;  %v356_v15 = vld [vmem:[%s8737_s0 + $0xa60] sm:$0xff]  ;;  %v374_v8 = vld [vmem:[%s8737_s0 + $0xaf0] sm:$0xff]  ;;  %v8744_v12 = vmov 0  }
  0x80   :  { %v375_v0 = vld [vmem:[%s8737_s0 + $0xaf8] sm:$0xff]  ;;  %1703 = vmatprep.mubr.bf16.mxu1 %v8744_v12  ;;  %4647 = vset.pattern.permute.xlu1 %v8744_v12 }
  0x81   :  { %1240 = vmatpush1.bf16.msra.mxu0 %v438_v18  ;;  %v5327_v18 = vld [vmem:[%s8738_s1 + $0x1c4] ss:$44 sps:$4 sm:$0xff]   ;;  %4646 = vset.pattern.permute.xlu0 %v8744_v12 }
  0x82   :  { %1322 = vmatprep.subr.bf16.mxu0 %v441_v22  ;;  %v193_v22 = vld [vmem:[%s8737_s0 + $0x548] sm:$0xff] }
  0x84   :  { %1242 = vmatmul.mubr.bf16.vlgmr.msra.gmra.mrb[0].mxu0 %v5312_v21  ;;  %v190_v21 = vld [vmem:[%s8737_s0 + $0x530] sm:$0xff] }
  0x85   :  { %1323 = vmatpush1.bf16.msra.mxu0 %v440_v25  ;;  %1251 = vmatprep.mubr.bf16.mxu0 %v5315_v27  ;;  %v458_v24 = vpack.c.bf16 %v190_v21, %v188_v20  ;;  %v461_v25 = vpack.c.bf16 %v195_v23, %v193_v22  ;;  %v194_v27 = vld [vmem:[%s8737_s0 + $0x550] sm:$0xff]  ;;  %v212_v20 = vld [vmem:[%s8737_s0 + $0x5e0] sm:$0xff] }
  0x86   :  { %1324 = vmatprep.subr.bf16.mxu0 %v443_v28  ;;  %v197_v28 = vld [vmem:[%s8737_s0 + $0x568] sm:$0xff]  ;;  %v460_v31 = vpack.c.bf16 %v194_v27, %v192_v26  ;;  %v5338_v21 = vld [vmem:[%s8738_s1 + $0x14] ss:$44 sps:$4 sm:$0xff]   ;;  %v219_v27 = vld [vmem:[%s8737_s0 + $0x618] sm:$0xff] }
  0x87   :  { %v463_v34 = vpack.c.bf16 %v199_v29, %v197_v28  ;;  %v214_v23 = vld [vmem:[%s8737_s0 + $0x5f0] sm:$0xff]  ;;  %v217_v26 = vld [vmem:[%s8737_s0 + $0x608] sm:$0xff]  ;;  %v360_v29 = vld [vmem:[%s8737_s0 + $0xa80] sm:$0xff] }
  0x89   :  { %1325 = vmatpush1.bf16.msra.mxu0 %v442_v32  ;;  %v196_v32 = vld [vmem:[%s8737_s0 + $0x560] sm:$0xff] }
  0x8a   :  { %1326 = vmatprep.subr.bf16.mxu0 %v445_v36  ;;  %v345_v36 = vld [vmem:[%s8737_s0 + $0xa08] sm:$0xff] }
  0x8c   :  { %1252 = vmatmul.mubr.bf16.gmra.mrb[4].mxu0 %v5317_v35  ;;  %v198_v35 = vld [vmem:[%s8737_s0 + $0x570] sm:$0xff] }
  0x8d   :  { %1327 = vmatpush1.bf16.msra.mxu0 %v444_v39  ;;  %1261 = vmatprep.mubr.bf16.mxu0 %v5318_v40  ;;  %v203_v39 = vld [vmem:[%s8737_s0 + $0x598] sm:$0xff]  ;;  %v6175_v40 = vpack.c.bf16 %v347_v37, %v345_v36  ;;  %v462_v43 = vpack.c.bf16 %v198_v35, %v196_v32  ;;  %v216_v32 = vld [vmem:[%s8737_s0 + $0x600] sm:$0xff]  ;;  %v473_v35 = vpack.c.bf16 %v219_v27, %v217_v26  ;;  %v218_v36 = vld [vmem:[%s8737_s0 + $0x610] sm:$0xff] }
  0x8e   :  { %1328 = vmatprep.subr.bf16.mxu0 %v447_v41  ;;  %v344_v41 = vld [vmem:[%s8737_s0 + $0xa00] sm:$0xff]  ;;  %v221_v37 = vld [vmem:[%s8737_s0 + $0x628] sm:$0xff]  ;;  %v472_v48 = vpack.c.bf16 %v218_v36, %v216_v32  ;;  %v234_v27 = vld [vmem:[%s8737_s0 + $0x690] sm:$0xff] }
  0x8f   :  { %v6186_v45 = vpack.c.bf16 %v346_v42, %v344_v41  ;;  %4397 = vmatprep.subr.bf16.mxu1 %v6175_v40  ;;  %v364_v42 = vld [vmem:[%s8737_s0 + $0xaa0] sm:$0xff] }
  0x90   :  { %v232_v26 = vld [vmem:[%s8737_s0 + $0x680] sm:$0xff] }
  0x91   :  { %1329 = vmatpush1.bf16.msra.mxu0 %v446_v46  ;;  %v349_v46 = vld [vmem:[%s8737_s0 + $0xa28] sm:$0xff]  ;;  %4405 = vmatpush1.bf16.msra.mxu1 %v6186_v45  ;;  %v480_v32 = vpack.c.bf16 %v234_v27, %v232_v26  ;;  %v236_v36 = vld [vmem:[%s8737_s0 + $0x6a0] sm:$0xff]  ;;  %v263_v27 = vld [vmem:[%s8737_s0 + $0x778] sm:$0xff] }
  0x92   :  { %1330 = vmatprep.subr.bf16.mxu0 %v449_v47  ;;  %v465_v47 = vpack.c.bf16 %v203_v39, %v201_v38  ;;  %v367_v38 = vld [vmem:[%s8737_s0 + $0xab8] sm:$0xff]  ;;  %v261_v26 = vld [vmem:[%s8737_s0 + $0x768] sm:$0xff] }
  0x93   :  { %v223_v39 = vld [vmem:[%s8737_s0 + $0x638] sm:$0xff] }
  0x94   :  { %1262 = vmatmul.mubr.bf16.gmra.mrb[8].mxu0 %v5320_v52  ;;  %v6205_v52 = vpack.c.bf16 %v351_v50, %v349_v46  ;;  %v220_v46 = vld [vmem:[%s8737_s0 + $0x620] sm:$0xff]  ;;  %v5339_v50 = vld [vmem:[%s8738_s1 + $0x6c] ss:$44 sps:$4 sm:$0xff]  }
  0x95   :  { %1331 = vmatpush1.bf16.msra.mxu0 %v448_v53  ;;  %1271 = vmatprep.mubr.bf16.mxu0 %v5321_v54  ;;  %v348_v53 = vld [vmem:[%s8737_s0 + $0xa20] sm:$0xff]  ;;  %v350_v54 = vld [vmem:[%s8737_s0 + $0xa30] sm:$0xff] }
  0x96   :  { %1332 = vmatprep.subr.bf16.mxu0 %v451_v55  ;;  %v5332_v55 = vld [vmem:[%s8738_s1 + $0x218] ss:$44 sps:$4 sm:$0xff]   ;;  %v6216_v56 = vpack.c.bf16 %v350_v54, %v348_v53  ;;  %4398 = vmatprep.subr.bf16.mxu1 %v6205_v52  ;;  %v475_v53 = vpack.c.bf16 %v223_v39, %v221_v37  ;;  %v238_v37 = vld [vmem:[%s8737_s0 + $0x6b0] sm:$0xff]  ;;  %v241_v39 = vld [vmem:[%s8737_s0 + $0x6c8] sm:$0xff] }
  0x97   :  { %v371_v54 = vld [vmem:[%s8737_s0 + $0xad8] sm:$0xff] }
  0x98   :  { %4406 = vmatpush1.bf16.msra.mxu1 %v6216_v56 }
  0x99   :  { %1333 = vmatpush1.bf16.msra.mxu0 %v450_v60  ;;  %v467_v60 = vpack.c.bf16 %v207_v51, %v205_v49  ;;  %v222_v49 = vld [vmem:[%s8737_s0 + $0x630] sm:$0xff]  ;;  %v369_v51 = vld [vmem:[%s8737_s0 + $0xac8] sm:$0xff] }
  0x9a   :  { %1334 = vmatprep.subr.bf16.mxu0 %v453_v61  ;;  %v206_v61 = vld [vmem:[%s8737_s0 + $0x5b0] sm:$0xff] }
  0x9c   :  { %1272 = vmatmul.mubr.bf16.gmra.mrb[12].mxu0 %v5323_v2  ;;  %v6241_v2 = vpack.c.bf16 %v355_v63, %v353_v62  ;;  %v474_v62 = vpack.c.bf16 %v222_v49, %v220_v46  ;;  %v373_v63 = vld [vmem:[%s8737_s0 + $0xae8] sm:$0xff]  ;;  %v240_v46 = vld [vmem:[%s8737_s0 + $0x6c0] sm:$0xff] }
  0x9d   :  { %1335 = vmatpush1.bf16.msra.mxu0 %v452_v3  ;;  %1281 = vmatprep.mubr.bf16.mxu0 %v5324_v4  ;;  %v352_v3 = vld [vmem:[%s8737_s0 + $0xa40] sm:$0xff]  ;;  %v354_v4 = vld [vmem:[%s8737_s0 + $0xa50] sm:$0xff]  ;;  %v245_v49 = vld [vmem:[%s8737_s0 + $0x6e8] sm:$0xff] }
  0x9e   :  { %1336 = vmatprep.subr.bf16.mxu0 %v455_v5  ;;  %v466_v5 = vpack.c.bf16 %v206_v61, %v204_v58  ;;  %v6252_v7 = vpack.c.bf16 %v354_v4, %v352_v3  ;;  %4399 = vmatprep.subr.bf16.mxu1 %v6241_v2  ;;  %v225_v58 = vld [vmem:[%s8737_s0 + $0x648] sm:$0xff]  ;;  %v224_v4 = vld [vmem:[%s8737_s0 + $0x640] sm:$0xff] }
  0xa0   :  { %4407 = vmatpush1.bf16.msra.mxu1 %v6252_v7 }
  0xa1   :  { %1337 = vmatpush1.bf16.msra.mxu0 %v454_v10  ;;  %v210_v10 = vld [vmem:[%s8737_s0 + $0x5d0] sm:$0xff]  ;;  %4400 = vmatprep.subr.bf16.mxu1 %v6271_v14 }
  0xa2   :  { %1338 = vmatprep.subr.bf16.mxu0 %v457_v11  ;;  %v213_v11 = vld [vmem:[%s8737_s0 + $0x5e8] sm:$0xff] }
  0xa3   :  { %v471_v22 = vpack.c.bf16 %v215_v13, %v213_v11  ;;  %v6411_v11 = vpack.c.bf16 %v374_v8, %v372_v1  ;;  %v5341_v13 = vld [vmem:[%s8738_s1 + $0x68] ss:$44 sps:$4 sm:$0xff]   ;;  %v255_v8 = vld [vmem:[%s8737_s0 + $0x738] sm:$0xff] }
  0xa4   :  { %1282 = vmatmul.mubr.bf16.gmra.mrb[16].mxu0 %v5326_v16  ;;  %v358_v16 = vld [vmem:[%s8737_s0 + $0xa70] sm:$0xff] }
  0xa5   :  { %1339 = vmatpush1.bf16.msra.mxu0 %v456_v17  ;;  %1291 = vmatprep.mubr.bf16.mxu0 %v5327_v18  ;;  %v5335_v17 = vld [vmem:[%s8738_s1 + $0x270] ss:$44 sps:$4 sm:$0xff]   ;;  %v6282_v18 = vpack.c.bf16 %v358_v16, %v356_v15 }
  0xa6   :  { %1340 = vmatprep.subr.bf16.mxu0 %v459_v19  ;;  %v468_v19 = vpack.c.bf16 %v210_v10, %v208_v6  ;;  %v6399_v6 = vpack.c.bf16 %v375_v0, %v373_v63  ;;  %v231_v10 = vld [vmem:[%s8737_s0 + $0x678] sm:$0xff]  ;;  %v5342_v16 = vld [vmem:[%s8738_s1 + $0xc4] ss:$44 sps:$4 sm:$0xff]  }
  0xa7   :  { %4408 = vmatpush1.bf16.msra.mxu1 %v6282_v18  ;;  %v251_v63 = vld [vmem:[%s8737_s0 + $0x718] sm:$0xff] }
  0xa9   :  { %1341 = vmatpush1.bf16.msra.mxu0 %v458_v24  ;;  %v361_v24 = vld [vmem:[%s8737_s0 + $0xa88] sm:$0xff] }
  0xaa   :  { %1342 = vmatprep.subr.bf16.mxu0 %v461_v25  ;;  %v363_v25 = vld [vmem:[%s8737_s0 + $0xa98] sm:$0xff] }
  0xab   :  { %v6307_v28 = vpack.c.bf16 %v363_v25, %v361_v24 }
  0xac   :  { %1292 = vmatmul.mubr.bf16.gmra.mrb[20].mxu0 %v5329_v30  ;;  %v362_v30 = vld [vmem:[%s8737_s0 + $0xa90] sm:$0xff] }
  0xad   :  { %1343 = vmatpush1.bf16.msra.mxu0 %v460_v31  ;;  %1301 = vmatprep.mubr.bf16.mxu0 %v5330_v33  ;;  %v470_v31 = vpack.c.bf16 %v214_v23, %v212_v20  ;;  %v6318_v33 = vpack.c.bf16 %v362_v30, %v360_v29  ;;  %v230_v20 = vld [vmem:[%s8737_s0 + $0x670] sm:$0xff]  ;;  %v235_v23 = vld [vmem:[%s8737_s0 + $0x698] sm:$0xff]  ;;  %v237_v29 = vld [vmem:[%s8737_s0 + $0x6a8] sm:$0xff] }
  0xae   :  { %1344 = vmatprep.subr.bf16.mxu0 %v463_v34  ;;  %v365_v34 = vld [vmem:[%s8737_s0 + $0xaa8] sm:$0xff]  ;;  %4401 = vmatprep.subr.bf16.mxu1 %v6307_v28  ;;  %v239_v30 = vld [vmem:[%s8737_s0 + $0x6b8] sm:$0xff] }
  0xaf   :  { %4409 = vmatpush1.bf16.msra.mxu1 %v6318_v33  ;;  %v6337_v41 = vpack.c.bf16 %v367_v38, %v365_v34  ;;  %v5345_v34 = vld [vmem:[%s8738_s1 + $0x11c] ss:$44 sps:$4 sm:$0xff]   ;;  %v5394_v38 = vld [vmem:[%s8738_s1 + $0xd8] ss:$44 sps:$4 sm:$0xff]  }
  0xb1   :  { %1345 = vmatpush1.bf16.msra.mxu0 %v462_v43  ;;  %v366_v43 = vld [vmem:[%s8737_s0 + $0xab0] sm:$0xff]  ;;  %4402 = vmatprep.subr.bf16.mxu1 %v6337_v41 }
  0xb2   :  { %1346 = vmatprep.subr.bf16.mxu0 %v465_v47  ;;  %v6351_v47 = vpack.c.bf16 %v366_v43, %v364_v42  ;;  %v243_v42 = vld [vmem:[%s8737_s0 + $0x6d8] sm:$0xff]  ;;  %v482_v43 = vpack.c.bf16 %v238_v37, %v236_v36  ;;  %v5406_v36 = vld [vmem:[%s8738_s1 + $0x1e0] ss:$44 sps:$4 sm:$0xff]  }
  0xb3   :  { %v265_v37 = vld [vmem:[%s8737_s0 + $0x788] sm:$0xff] }
  0xb4   :  { %1302 = vmatmul.mubr.bf16.gmra.mrb[24].mxu0 %v5332_v55  ;;  %v368_v55 = vld [vmem:[%s8737_s0 + $0xac0] sm:$0xff]  ;;  %4410 = vmatpush1.bf16.msra.mxu1 %v6351_v47 }
  0xb5   :  { %1347 = vmatpush1.bf16.msra.mxu0 %v464_v57  ;;  %1311 = vmatprep.mubr.bf16.mxu0 %v5333_v59  ;;  %v370_v57 = vld [vmem:[%s8737_s0 + $0xad0] sm:$0xff]  ;;  %v227_v59 = vld [vmem:[%s8737_s0 + $0x658] sm:$0xff] }
  0xb6   :  { %1348 = vmatprep.subr.bf16.mxu0 %v467_v60  ;;  %v6379_v60 = vpack.c.bf16 %v371_v54, %v369_v51  ;;  %v6381_v61 = vpack.c.bf16 %v370_v57, %v368_v55  ;;  %v477_v3 = vpack.c.bf16 %v227_v59, %v225_v58  ;;  %v5347_v51 = vld [vmem:[%s8738_s1 + $0x118] ss:$44 sps:$4 sm:$0xff]   ;;  %v5348_v54 = vld [vmem:[%s8738_s1 + $0x174] ss:$44 sps:$4 sm:$0xff]   ;;  %v5398_v59 = vld [vmem:[%s8738_s1 + $0x130] ss:$44 sps:$4 sm:$0xff]  }
  0xb7   :  { %v244_v57 = vld [vmem:[%s8737_s0 + $0x6e0] sm:$0xff]  ;;  %v246_v58 = vld [vmem:[%s8737_s0 + $0x6f0] sm:$0xff] }
  0xb8   :  { %4403 = vmatprep.subr.bf16.mxu1 %v6379_v60  ;;  %v486_v0 = vpack.c.bf16 %v246_v58, %v244_v57  ;;  %v5410_v57 = vld [vmem:[%s8738_s1 + $0x238] ss:$44 sps:$4 sm:$0xff]   ;;  %v273_v58 = vld [vmem:[%s8737_s0 + $0x7c8] sm:$0xff] }
  0xb9   :  { %1349 = vmatpush1.bf16.msra.mxu0 %v466_v5  ;;  %v226_v5 = vld [vmem:[%s8737_s0 + $0x650] sm:$0xff]  ;;  %4411 = vmatpush1.bf16.msra.mxu1 %v6381_v61 }
  0xba   :  { %1350 = vmatprep.subr.bf16.mxu0 %v469_v9  ;;  %v229_v9 = vld [vmem:[%s8737_s0 + $0x668] sm:$0xff]  ;;  %4404 = vmatprep.subr.bf16.mxu1 %v6399_v6  ;;  %v476_v15 = vpack.c.bf16 %v226_v5, %v224_v4  ;;  %v250_v4 = vld [vmem:[%s8737_s0 + $0x710] sm:$0xff] }
  0xbb   :  { %v253_v5 = vld [vmem:[%s8737_s0 + $0x728] sm:$0xff] }
  0xbc   :  { %1312 = vmatmul.mubr.bf16.gmra.mrb[28].mxu0 %v5335_v17  ;;  %v479_v17 = vpack.c.bf16 %v231_v10, %v229_v9  ;;  %v5350_v9 = vld [vmem:[%s8738_s1 + $0x170] ss:$44 sps:$4 sm:$0xff]  }
  0xbd   :  { %1351 = vmatpush1.bf16.msra.mxu0 %v468_v19  ;;  %1354 = vmatprep.mubr.bf16.mxu0 %v5338_v21  ;;  %v228_v19 = vld [vmem:[%s8737_s0 + $0x660] sm:$0xff] }
  0xbe   :  { %1352 = vmatprep.subr.bf16.mxu0 %v471_v22  ;;  %v5390_v21 = vld [vmem:[%s8738_s1 + $0x80] ss:$44 sps:$4 sm:$0xff]   ;;  %4412 = vmatpush1.bf16.msra.mxu1 %v6411_v11  ;;  %v478_v24 = vpack.c.bf16 %v230_v20, %v228_v19  ;;  %v5402_v19 = vld [vmem:[%s8738_s1 + $0x188] ss:$44 sps:$4 sm:$0xff]  }
  0xbf   :  { %v233_v22 = vld [vmem:[%s8737_s0 + $0x688] sm:$0xff] }
  0xc0   :  { %v481_v25 = vpack.c.bf16 %v235_v23, %v233_v22  ;;  %v257_v20 = vld [vmem:[%s8737_s0 + $0x748] sm:$0xff] }
  0xc1   :  { %1353 = vmatpush1.bf16.msra.mxu0 %v470_v31  ;;  %1704 = vmatmul.mubr.bf16.vlgmr.msra.gmra.mrb[0].mxu1 %v5390_v21  ;;  %v5344_v31 = vld [vmem:[%s8738_s1 + $0xc0] ss:$44 sps:$4 sm:$0xff]   ;;  %v259_v21 = vld [vmem:[%s8737_s0 + $0x758] sm:$0xff] }
  0xc2   :  { %1435 = vmatprep.subr.bf16.mxu0 %v473_v35  ;;  %1713 = vmatprep.mubr.bf16.mxu1 %v8744_v12  ;;  %v483_v35 = vpack.c.bf16 %v239_v30, %v237_v29  ;;  %v493_v23 = vpack.c.bf16 %v259_v21, %v257_v20  ;;  %v5353_v29 = vld [vmem:[%s8738_s1 + $0x1c8] ss:$44 sps:$4 sm:$0xff]  }
  0xc4   :  { %1355 = vmatmul.mubr.bf16.vlgmr.msra.gmra.mrb[0].mxu0 %v5336_v44  ;;  %v485_v44 = vpack.c.bf16 %v243_v42, %v241_v39 }
  0xc5   :  { %1436 = vmatpush1.bf16.msra.mxu0 %v472_v48  ;;  %1364 = vmatprep.mubr.bf16.mxu0 %v5339_v50  ;;  %v242_v48 = vld [vmem:[%s8737_s0 + $0x6d0] sm:$0xff]  ;;  %v247_v50 = vld [vmem:[%s8737_s0 + $0x6f8] sm:$0xff] }
  0xc6   :  { %1437 = vmatprep.subr.bf16.mxu0 %v475_v53  ;;  %v484_v53 = vpack.c.bf16 %v242_v48, %v240_v46  ;;  %v487_v55 = vpack.c.bf16 %v247_v50, %v245_v49  ;;  %v269_v46 = vld [vmem:[%s8737_s0 + $0x7a8] sm:$0xff]  ;;  %v271_v48 = vld [vmem:[%s8737_s0 + $0x7b8] sm:$0xff] }
  0xc7   :  { %v5356_v49 = vld [vmem:[%s8738_s1 + $0x220] ss:$44 sps:$4 sm:$0xff]  }
  0xc9   :  { %1438 = vmatpush1.bf16.msra.mxu0 %v474_v62  ;;  %1714 = vmatmul.mubr.bf16.gmra.mrb[4].mxu1 %v5394_v38  ;;  %v249_v62 = vld [vmem:[%s8737_s0 + $0x708] sm:$0xff]  ;;  %v267_v38 = vld [vmem:[%s8737_s0 + $0x798] sm:$0xff] }
  0xca   :  { %1439 = vmatprep.subr.bf16.mxu0 %v477_v3  ;;  %1723 = vmatprep.mubr.bf16.mxu1 %v8744_v12  ;;  %v489_v1 = vpack.c.bf16 %v251_v63, %v249_v62  ;;  %v248_v3 = vld [vmem:[%s8737_s0 + $0x700] sm:$0xff]  ;;  %v497_v42 = vpack.c.bf16 %v267_v38, %v265_v37 }
  0xcb   :  { %v488_v10 = vpack.c.bf16 %v250_v4, %v248_v3  ;;  %v277_v3 = vld [vmem:[%s8737_s0 + $0x7e8] sm:$0xff]  ;;  %v279_v4 = vld [vmem:[%s8737_s0 + $0x7f8] sm:$0xff]  ;;  %v288_v38 = vld [vmem:[%s8737_s0 + $0x840] sm:$0xff] }
  0xcc   :  { %1365 = vmatmul.mubr.bf16.gmra.mrb[4].mxu0 %v5341_v13  ;;  %v5351_v13 = vld [vmem:[%s8738_s1 + $0x1cc] ss:$44 sps:$4 sm:$0xff]  }
  0xcd   :  { %1440 = vmatpush1.bf16.msra.mxu0 %v476_v15  ;;  %1374 = vmatprep.mubr.bf16.mxu0 %v5342_v16  ;;  %v491_v15 = vpack.c.bf16 %v255_v8, %v253_v5  ;;  %v252_v16 = vld [vmem:[%s8737_s0 + $0x720] sm:$0xff] }
  0xce   :  { %1441 = vmatprep.subr.bf16.mxu0 %v479_v17  ;;  %v254_v17 = vld [vmem:[%s8737_s0 + $0x730] sm:$0xff]  ;;  %v5359_v5 = vld [vmem:[%s8738_s1 + $0x278] ss:$44 sps:$4 sm:$0xff]  }
  0xcf   :  { %v490_v22 = vpack.c.bf16 %v254_v17, %v252_v16  ;;  %v5414_v16 = vld [vmem:[%s8738_s1 + $0x290] ss:$44 sps:$4 sm:$0xff]   ;;  %v281_v17 = vld [vmem:[%s8737_s0 + $0x808] sm:$0xff] }
  0xd1   :  { %1442 = vmatpush1.bf16.msra.mxu0 %v478_v24  ;;  %1724 = vmatmul.mubr.bf16.gmra.mrb[8].mxu1 %v5398_v59  ;;  %v256_v24 = vld [vmem:[%s8737_s0 + $0x740] sm:$0xff]  ;;  %v275_v59 = vld [vmem:[%s8737_s0 + $0x7d8] sm:$0xff] }
  0xd2   :  { %1443 = vmatprep.subr.bf16.mxu0 %v481_v25  ;;  %1733 = vmatprep.mubr.bf16.mxu1 %v8744_v12  ;;  %v258_v25 = vld [vmem:[%s8737_s0 + $0x750] sm:$0xff]  ;;  %v501_v63 = vpack.c.bf16 %v275_v59, %v273_v58  ;;  %v296_v58 = vld [vmem:[%s8737_s0 + $0x880] sm:$0xff] }
  0xd3   :  { %v492_v30 = vpack.c.bf16 %v258_v25, %v256_v24  ;;  %v285_v24 = vld [vmem:[%s8737_s0 + $0x828] sm:$0xff]  ;;  %v287_v25 = vld [vmem:[%s8737_s0 + $0x838] sm:$0xff]  ;;  %v298_v59 = vld [vmem:[%s8737_s0 + $0x890] sm:$0xff] }
  0xd4   :  { %1375 = vmatmul.mubr.bf16.gmra.mrb[8].mxu0 %v5344_v31  ;;  %v5354_v31 = vld [vmem:[%s8738_s1 + $0x224] ss:$44 sps:$4 sm:$0xff]  }
  0xd5   :  { %1444 = vmatpush1.bf16.msra.mxu0 %v480_v32  ;;  %1384 = vmatprep.mubr.bf16.mxu0 %v5345_v34  ;;  %v495_v32 = vpack.c.bf16 %v263_v27, %v261_v26  ;;  %v260_v34 = vld [vmem:[%s8737_s0 + $0x760] sm:$0xff] }
  0xd6   :  { %1445 = vmatprep.subr.bf16.mxu0 %v483_v35  ;;  %v262_v35 = vld [vmem:[%s8737_s0 + $0x770] sm:$0xff]  ;;  %v5360_v26 = vld [vmem:[%s8738_s1 + $0x18] ss:$44 sps:$4 sm:$0xff]  }
  0xd7   :  { %v494_v39 = vpack.c.bf16 %v262_v35, %v260_v34  ;;  %v289_v34 = vld [vmem:[%s8737_s0 + $0x848] sm:$0xff]  ;;  %v291_v35 = vld [vmem:[%s8737_s0 + $0x858] sm:$0xff] }
  0xd8   :  { %v509_v37 = vpack.c.bf16 %v291_v35, %v289_v34  ;;  %v314_v34 = vld [vmem:[%s8737_s0 + $0x910] sm:$0xff]  ;;  %v317_v35 = vld [vmem:[%s8737_s0 + $0x928] sm:$0xff] }
  0xd9   :  { %1446 = vmatpush1.bf16.msra.mxu0 %v482_v43  ;;  %1734 = vmatmul.mubr.bf16.gmra.mrb[12].mxu1 %v5402_v19  ;;  %v264_v43 = vld [vmem:[%s8737_s0 + $0x780] sm:$0xff]  ;;  %v283_v19 = vld [vmem:[%s8737_s0 + $0x818] sm:$0xff] }
  0xda   :  { %1447 = vmatprep.subr.bf16.mxu0 %v485_v44  ;;  %1743 = vmatprep.mubr.bf16.mxu1 %v8744_v12  ;;  %v266_v44 = vld [vmem:[%s8737_s0 + $0x790] sm:$0xff]  ;;  %v505_v21 = vpack.c.bf16 %v283_v19, %v281_v17  ;;  %v309_v19 = vld [vmem:[%s8737_s0 + $0x8e8] sm:$0xff] }
  0xdb   :  { %v496_v50 = vpack.c.bf16 %v266_v44, %v264_v43  ;;  %v295_v43 = vld [vmem:[%s8737_s0 + $0x878] sm:$0xff]  ;;  %v306_v17 = vld [vmem:[%s8737_s0 + $0x8d0] sm:$0xff] }
  0xdc   :  { %1385 = vmatmul.mubr.bf16.gmra.mrb[12].mxu0 %v5347_v51  ;;  %v5357_v51 = vld [vmem:[%s8738_s1 + $0x27c] ss:$44 sps:$4 sm:$0xff]  }
  0xdd   :  { %1448 = vmatpush1.bf16.msra.mxu0 %v484_v53  ;;  %1394 = vmatprep.mubr.bf16.mxu0 %v5348_v54  ;;  %v499_v53 = vpack.c.bf16 %v271_v48, %v269_v46  ;;  %v268_v54 = vld [vmem:[%s8737_s0 + $0x7a0] sm:$0xff]  ;;  %v5365_v44 = vld [vmem:[%s8738_s1 + $0x70] ss:$44 sps:$4 sm:$0xff]   ;;  %v5366_v48 = vld [vmem:[%s8738_s1 + $0xcc] ss:$44 sps:$4 sm:$0xff]  }
  0xde   :  { %1449 = vmatprep.subr.bf16.mxu0 %v487_v55  ;;  %v270_v55 = vld [vmem:[%s8737_s0 + $0x7b0] sm:$0xff] }
  0xdf   :  { %v498_v62 = vpack.c.bf16 %v270_v55, %v268_v54  ;;  %v299_v54 = vld [vmem:[%s8737_s0 + $0x898] sm:$0xff] }
  0xe1   :  { %1450 = vmatpush1.bf16.msra.mxu0 %v486_v0  ;;  %1744 = vmatmul.mubr.bf16.gmra.mrb[16].mxu1 %v5406_v36  ;;  %v272_v0 = vld [vmem:[%s8737_s0 + $0x7c0] sm:$0xff] }
  0xe2   :  { %1451 = vmatprep.subr.bf16.mxu0 %v489_v1  ;;  %1753 = vmatprep.mubr.bf16.mxu1 %v8744_v12  ;;  %v274_v1 = vld [vmem:[%s8737_s0 + $0x7d0] sm:$0xff] }
  0xe3   :  { %v500_v8 = vpack.c.bf16 %v274_v1, %v272_v0  ;;  %v5368_v0 = vld [vmem:[%s8738_s1 + $0xc8] ss:$44 sps:$4 sm:$0xff]   ;;  %v512_v1 = vpack.c.bf16 %v298_v59, %v296_v58  ;;  %v5378_v59 = vld [vmem:[%s8738_s1 + $0x22c] ss:$44 sps:$4 sm:$0xff]  }
  0xe4   :  { %1395 = vmatmul.mubr.bf16.gmra.mrb[16].mxu0 %v5350_v9  ;;  %v5362_v9 = vld [vmem:[%s8738_s1 + $0x1c] ss:$44 sps:$4 sm:$0xff]  }
  0xe5   :  { %1452 = vmatpush1.bf16.msra.mxu0 %v488_v10  ;;  %1404 = vmatprep.mubr.bf16.mxu0 %v5351_v13  ;;  %v503_v10 = vpack.c.bf16 %v279_v4, %v277_v3  ;;  %v276_v13 = vld [vmem:[%s8737_s0 + $0x7e0] sm:$0xff] }
  0xe6   :  { %1453 = vmatprep.subr.bf16.mxu0 %v491_v15  ;;  %v278_v15 = vld [vmem:[%s8737_s0 + $0x7f0] sm:$0xff] }
  0xe7   :  { %v502_v20 = vpack.c.bf16 %v278_v15, %v276_v13  ;;  %v5369_v3 = vld [vmem:[%s8738_s1 + $0x124] ss:$44 sps:$4 sm:$0xff]  }
  0xe9   :  { %1454 = vmatpush1.bf16.msra.mxu0 %v490_v22  ;;  %1754 = vmatmul.mubr.bf16.gmra.mrb[20].mxu1 %v5410_v57  ;;  %v280_v22 = vld [vmem:[%s8737_s0 + $0x800] sm:$0xff] }
  0xea   :  { %1455 = vmatprep.subr.bf16.mxu0 %v493_v23  ;;  %1763 = vmatprep.mubr.bf16.mxu1 %v8744_v12  ;;  %v282_v23 = vld [vmem:[%s8737_s0 + $0x810] sm:$0xff] }
  0xeb   :  { %v504_v27 = vpack.c.bf16 %v282_v23, %v280_v22  ;;  %v5372_v23 = vld [vmem:[%s8738_s1 + $0x17c] ss:$44 sps:$4 sm:$0xff]  }
  0xec   :  { %1405 = vmatmul.mubr.bf16.gmra.mrb[20].mxu0 %v5353_v29  ;;  %v5363_v29 = vld [vmem:[%s8738_s1 + $0x74] ss:$44 sps:$4 sm:$0xff]  }
  0xed   :  { %1456 = vmatpush1.bf16.msra.mxu0 %v492_v30  ;;  %1414 = vmatprep.mubr.bf16.mxu0 %v5354_v31  ;;  %v507_v30 = vpack.c.bf16 %v287_v25, %v285_v24  ;;  %v284_v31 = vld [vmem:[%s8737_s0 + $0x820] sm:$0xff] }
  0xee   :  { %1457 = vmatprep.subr.bf16.mxu0 %v495_v32  ;;  %v286_v32 = vld [vmem:[%s8737_s0 + $0x830] sm:$0xff]  ;;  %v308_v25 = vld [vmem:[%s8737_s0 + $0x8e0] sm:$0xff] }
  0xef   :  { %v506_v36 = vpack.c.bf16 %v286_v32, %v284_v31  ;;  %v312_v32 = vld [vmem:[%s8737_s0 + $0x900] sm:$0xff] }
  0xf1   :  { %1458 = vmatpush1.bf16.msra.mxu0 %v494_v39  ;;  %1764 = vmatmul.mubr.bf16.gmra.mrb[24].mxu1 %v5414_v16  ;;  %v290_v39 = vld [vmem:[%s8737_s0 + $0x850] sm:$0xff]  ;;  %v304_v16 = vld [vmem:[%s8737_s0 + $0x8c0] sm:$0xff] }
  0xf2   :  { %1459 = vmatprep.subr.bf16.mxu0 %v497_v42  ;;  %v293_v42 = vld [vmem:[%s8737_s0 + $0x868] sm:$0xff]  ;;  %v508_v46 = vpack.c.bf16 %v290_v39, %v288_v38  ;;  %v516_v22 = vpack.c.bf16 %v306_v17, %v304_v16  ;;  %v520_v38 = vpack.c.bf16 %v314_v34, %v312_v32  ;;  %v5375_v39 = vld [vmem:[%s8738_s1 + $0x1d4] ss:$44 sps:$4 sm:$0xff]   ;;  %v5381_v17 = vld [vmem:[%s8738_s1 + $0x284] ss:$44 sps:$4 sm:$0xff]  }
  0xf3   :  { %v5386_v34 = vld [vmem:[%s8738_s1 + $0x24] ss:$44 sps:$4 sm:$0xff]  }
  0xf4   :  { %1415 = vmatmul.mubr.bf16.gmra.mrb[24].mxu0 %v5356_v49  ;;  %v511_v49 = vpack.c.bf16 %v295_v43, %v293_v42  ;;  %v316_v43 = vld [vmem:[%s8737_s0 + $0x920] sm:$0xff] }
  0xf5   :  { %1460 = vmatpush1.bf16.msra.mxu0 %v496_v50  ;;  %1424 = vmatprep.mubr.bf16.mxu0 %v5357_v51  ;;  %v292_v50 = vld [vmem:[%s8737_s0 + $0x860] sm:$0xff]  ;;  %v294_v51 = vld [vmem:[%s8737_s0 + $0x870] sm:$0xff] }
  0xf6   :  { %1461 = vmatprep.subr.bf16.mxu0 %v499_v53  ;;  %v297_v53 = vld [vmem:[%s8737_s0 + $0x888] sm:$0xff]  ;;  %v510_v55 = vpack.c.bf16 %v294_v51, %v292_v50  ;;  %v320_v51 = vld [vmem:[%s8737_s0 + $0x940] sm:$0xff] }
  0xf7   :  { %v513_v57 = vpack.c.bf16 %v299_v54, %v297_v53  ;;  %v322_v53 = vld [vmem:[%s8737_s0 + $0x950] sm:$0xff]  ;;  %v325_v54 = vld [vmem:[%s8737_s0 + $0x968] sm:$0xff] }
  0xf8   :  { %v524_v58 = vpack.c.bf16 %v322_v53, %v320_v51 }
  0xf9   :  { %1462 = vmatpush1.bf16.msra.mxu0 %v498_v62  ;;  %v301_v62 = vld [vmem:[%s8737_s0 + $0x8a8] sm:$0xff] }
  0xfa   :  { %1463 = vmatprep.subr.bf16.mxu0 %v501_v63  ;;  %v303_v63 = vld [vmem:[%s8737_s0 + $0x8b8] sm:$0xff] }
  0xfb   :  { %v515_v4 = vpack.c.bf16 %v303_v63, %v301_v62  ;;  %v324_v63 = vld [vmem:[%s8737_s0 + $0x960] sm:$0xff] }
  0xfc   :  { %1425 = vmatmul.mubr.bf16.gmra.mrb[28].mxu0 %v5359_v5  ;;  %v300_v5 = vld [vmem:[%s8737_s0 + $0x8a0] sm:$0xff] }
  0xfd   :  { %1464 = vmatpush1.bf16.msra.mxu0 %v500_v8  ;;  %1467 = vmatprep.mubr.bf16.mxu0 %v5362_v9  ;;  %v302_v8 = vld [vmem:[%s8737_s0 + $0x8b0] sm:$0xff]  ;;  %v305_v9 = vld [vmem:[%s8737_s0 + $0x8c8] sm:$0xff] }
  0xfe   :  { %1465 = vmatprep.subr.bf16.mxu0 %v503_v10  ;;  %v307_v10 = vld [vmem:[%s8737_s0 + $0x8d8] sm:$0xff]  ;;  %v514_v13 = vpack.c.bf16 %v302_v8, %v300_v5  ;;  %v328_v8 = vld [vmem:[%s8737_s0 + $0x980] sm:$0xff] }
  0xff   :  { %v517_v15 = vpack.c.bf16 %v307_v10, %v305_v9  ;;  %v330_v9 = vld [vmem:[%s8737_s0 + $0x990] sm:$0xff]  ;;  %v333_v10 = vld [vmem:[%s8737_s0 + $0x9a8] sm:$0xff] }
 0x100   :  { %v528_v16 = vpack.c.bf16 %v330_v9, %v328_v8 }
 0x101   :  { %1466 = vmatpush1.bf16.msra.mxu0 %v502_v20  ;;  %v311_v20 = vld [vmem:[%s8737_s0 + $0x8f8] sm:$0xff] }
 0x102   :  { %1548 = vmatprep.subr.bf16.mxu0 %v505_v21  ;;  %v5371_v21 = vld [vmem:[%s8738_s1 + $0x120] ss:$44 sps:$4 sm:$0xff]   ;;  %v519_v24 = vpack.c.bf16 %v311_v20, %v309_v19 }
 0x103   :  { %v332_v20 = vld [vmem:[%s8737_s0 + $0x9a0] sm:$0xff] }
 0x104   :  { %1468 = vmatmul.mubr.bf16.vlgmr.msra.gmra.mrb[0].mxu0 %v5360_v26  ;;  %v310_v26 = vld [vmem:[%s8737_s0 + $0x8f0] sm:$0xff] }
 0x105   :  { %1549 = vmatpush1.bf16.msra.mxu0 %v504_v27  ;;  %1477 = vmatprep.mubr.bf16.mxu0 %v5363_v29  ;;  %v313_v27 = vld [vmem:[%s8737_s0 + $0x908] sm:$0xff]  ;;  %v315_v29 = vld [vmem:[%s8737_s0 + $0x918] sm:$0xff] }
 0x106   :  { %1550 = vmatprep.subr.bf16.mxu0 %v507_v30  ;;  %v518_v30 = vpack.c.bf16 %v310_v26, %v308_v25  ;;  %v521_v31 = vpack.c.bf16 %v315_v29, %v313_v27  ;;  %v336_v26 = vld [vmem:[%s8737_s0 + $0x9c0] sm:$0xff]  ;;  %v338_v27 = vld [vmem:[%s8737_s0 + $0x9d0] sm:$0xff]  ;;  %v341_v29 = vld [vmem:[%s8737_s0 + $0x9e8] sm:$0xff] }
 0x107   :  { %v532_v32 = vpack.c.bf16 %v338_v27, %v336_v26 }
 0x109   :  { %1551 = vmatpush1.bf16.msra.mxu0 %v506_v36  ;;  %v319_v36 = vld [vmem:[%s8737_s0 + $0x938] sm:$0xff] }
 0x10a   :  { %1552 = vmatprep.subr.bf16.mxu0 %v509_v37  ;;  %v5374_v37 = vld [vmem:[%s8738_s1 + $0x178] ss:$44 sps:$4 sm:$0xff]   ;;  %v523_v42 = vpack.c.bf16 %v319_v36, %v317_v35 }
 0x10b   :  { %v340_v36 = vld [vmem:[%s8737_s0 + $0x9e0] sm:$0xff] }
 0x10c   :  { %1478 = vmatmul.mubr.bf16.gmra.mrb[4].mxu0 %v5365_v44  ;;  %v318_v44 = vld [vmem:[%s8737_s0 + $0x930] sm:$0xff] }
 0x10d   :  { %1553 = vmatpush1.bf16.msra.mxu0 %v508_v46  ;;  %1487 = vmatprep.mubr.bf16.mxu0 %v5366_v48  ;;  %v321_v46 = vld [vmem:[%s8737_s0 + $0x948] sm:$0xff]  ;;  %v323_v48 = vld [vmem:[%s8737_s0 + $0x958] sm:$0xff] }
 0x10e   :  { %1554 = vmatprep.subr.bf16.mxu0 %v511_v49  ;;  %v522_v49 = vpack.c.bf16 %v318_v44, %v316_v43  ;;  %v525_v50 = vpack.c.bf16 %v323_v48, %v321_v46  ;;  %v5389_v43 = vld [vmem:[%s8738_s1 + $0x78] ss:$44 sps:$4 sm:$0xff]   ;;  %v5391_v44 = vld [vmem:[%s8738_s1 + $0xd4] ss:$44 sps:$4 sm:$0xff]  }
 0x111   :  { %1555 = vmatpush1.bf16.msra.mxu0 %v510_v55  ;;  %v327_v55 = vld [vmem:[%s8737_s0 + $0x978] sm:$0xff] }
 0x112   :  { %1556 = vmatprep.subr.bf16.mxu0 %v513_v57  ;;  %v5377_v57 = vld [vmem:[%s8738_s1 + $0x1d0] ss:$44 sps:$4 sm:$0xff]   ;;  %v527_v62 = vpack.c.bf16 %v327_v55, %v325_v54 }
 0x114   :  { %1488 = vmatmul.mubr.bf16.gmra.mrb[8].mxu0 %v5368_v0  ;;  %v326_v0 = vld [vmem:[%s8737_s0 + $0x970] sm:$0xff] }
 0x115   :  { %1557 = vmatpush1.bf16.msra.mxu0 %v512_v1  ;;  %1497 = vmatprep.mubr.bf16.mxu0 %v5369_v3  ;;  %v329_v1 = vld [vmem:[%s8737_s0 + $0x988] sm:$0xff]  ;;  %v331_v3 = vld [vmem:[%s8737_s0 + $0x998] sm:$0xff] }
 0x116   :  { %1558 = vmatprep.subr.bf16.mxu0 %v515_v4  ;;  %v526_v4 = vpack.c.bf16 %v326_v0, %v324_v63  ;;  %v529_v5 = vpack.c.bf16 %v331_v3, %v329_v1 }
 0x119   :  { %1559 = vmatpush1.bf16.msra.mxu0 %v514_v13  ;;  %v335_v13 = vld [vmem:[%s8737_s0 + $0x9b8] sm:$0xff] }
 0x11a   :  { %1560 = vmatprep.subr.bf16.mxu0 %v517_v15  ;;  %v5380_v15 = vld [vmem:[%s8738_s1 + $0x228] ss:$44 sps:$4 sm:$0xff]   ;;  %v531_v19 = vpack.c.bf16 %v335_v13, %v333_v10 }
 0x11c   :  { %1498 = vmatmul.mubr.bf16.gmra.mrb[12].mxu0 %v5371_v21  ;;  %v334_v21 = vld [vmem:[%s8737_s0 + $0x9b0] sm:$0xff] }
 0x11d   :  { %1561 = vmatpush1.bf16.msra.mxu0 %v516_v22  ;;  %1507 = vmatprep.mubr.bf16.mxu0 %v5372_v23  ;;  %v337_v22 = vld [vmem:[%s8737_s0 + $0x9c8] sm:$0xff]  ;;  %v339_v23 = vld [vmem:[%s8737_s0 + $0x9d8] sm:$0xff] }
 0x11e   :  { %1562 = vmatprep.subr.bf16.mxu0 %v519_v24  ;;  %v530_v24 = vpack.c.bf16 %v334_v21, %v332_v20  ;;  %v533_v25 = vpack.c.bf16 %v339_v23, %v337_v22 }
 0x121   :  { %1563 = vmatpush1.bf16.msra.mxu0 %v518_v30  ;;  %v343_v30 = vld [vmem:[%s8737_s0 + $0x9f8] sm:$0xff] }
 0x122   :  { %1564 = vmatprep.subr.bf16.mxu0 %v521_v31  ;;  %v5383_v31 = vld [vmem:[%s8738_s1 + $0x280] ss:$44 sps:$4 sm:$0xff]   ;;  %v535_v35 = vpack.c.bf16 %v343_v30, %v341_v29 }
 0x124   :  { %1508 = vmatmul.mubr.bf16.gmra.mrb[16].mxu0 %v5374_v37  ;;  %v342_v37 = vld [vmem:[%s8737_s0 + $0x9f0] sm:$0xff] }
 0x125   :  { %1565 = vmatpush1.bf16.msra.mxu0 %v520_v38  ;;  %1517 = vmatprep.mubr.bf16.mxu0 %v5375_v39  ;;  %v534_v38 = vpack.c.bf16 %v342_v37, %v340_v36  ;;  %v5384_v39 = vld [vmem:[%s8738_s1 + $0x20] ss:$44 sps:$4 sm:$0xff]  }
 0x126   :  { %1566 = vmatprep.subr.bf16.mxu0 %v523_v42  ;;  %v5387_v42 = vld [vmem:[%s8738_s1 + $0x7c] ss:$44 sps:$4 sm:$0xff]  }
 0x129   :  { %1567 = vmatpush1.bf16.msra.mxu0 %v522_v49 }
 0x12a   :  { %1568 = vmatprep.subr.bf16.mxu0 %v525_v50 }
 0x12c   :  { %1518 = vmatmul.mubr.bf16.gmra.mrb[20].mxu0 %v5377_v57 }
 0x12d   :  { %1569 = vmatpush1.bf16.msra.mxu0 %v524_v58  ;;  %1527 = vmatprep.mubr.bf16.mxu0 %v5378_v59 }
 0x12e   :  { %1570 = vmatprep.subr.bf16.mxu0 %v527_v62 }
 0x131   :  { %1571 = vmatpush1.bf16.msra.mxu0 %v526_v4 }
 0x132   :  { %1572 = vmatprep.subr.bf16.mxu0 %v529_v5 }
 0x134   :  { %1528 = vmatmul.mubr.bf16.gmra.mrb[24].mxu0 %v5380_v15 }
 0x135   :  { %1573 = vmatpush1.bf16.msra.mxu0 %v528_v16  ;;  %1537 = vmatprep.mubr.bf16.mxu0 %v5381_v17 }
 0x136   :  { %1574 = vmatprep.subr.bf16.mxu0 %v531_v19 }
 0x139   :  { %1575 = vmatpush1.bf16.msra.mxu0 %v530_v24 }
 0x13a   :  { %1576 = vmatprep.subr.bf16.mxu0 %v533_v25 }
 0x13c   :  { %1538 = vmatmul.mubr.bf16.gmra.mrb[28].mxu0 %v5383_v31 }
 0x13d   :  { %1577 = vmatpush1.bf16.msra.mxu0 %v532_v32  ;;  %1580 = vmatprep.mubr.bf16.mxu0 %v5386_v34 }
 0x13e   :  { %1578 = vmatprep.subr.bf16.mxu0 %v535_v35 }
 0x141   :  { %1579 = vmatpush1.bf16.msra.mxu0 %v534_v38 }
 0x142   :  { %1661 = vmatprep.subr.bf16.mxu0 %v6175_v40  ;;  %v5393_v40 = vld [vmem:[%s8738_s1 + $0xd0] ss:$44 sps:$4 sm:$0xff]  }
 0x144   :  { %1581 = vmatmul.mubr.bf16.vlgmr.msra.gmra.mrb[0].mxu0 %v5384_v39 }
 0x145   :  { %1662 = vmatpush1.bf16.msra.mxu0 %v6186_v45  ;;  %1590 = vmatprep.mubr.bf16.mxu0 %v5387_v42  ;;  %v5395_v45 = vld [vmem:[%s8738_s1 + $0x12c] ss:$44 sps:$4 sm:$0xff]  }
 0x146   :  { %1663 = vmatprep.subr.bf16.mxu0 %v6205_v52  ;;  %v5397_v52 = vld [vmem:[%s8738_s1 + $0x128] ss:$44 sps:$4 sm:$0xff]  }
 0x149   :  { %1664 = vmatpush1.bf16.msra.mxu0 %v6216_v56  ;;  %v5399_v56 = vld [vmem:[%s8738_s1 + $0x184] ss:$44 sps:$4 sm:$0xff]  }
 0x14a   :  { %1665 = vmatprep.subr.bf16.mxu0 %v6241_v2  ;;  %v5401_v2 = vld [vmem:[%s8738_s1 + $0x180] ss:$44 sps:$4 sm:$0xff]  }
 0x14c   :  { %1591 = vmatmul.mubr.bf16.gmra.mrb[4].mxu0 %v5389_v43 }
 0x14d   :  { %1600 = vmatprep.mubr.bf16.mxu0 %v5391_v44  ;;  %1666 = vmatpush1.bf16.msra.mxu0 %v6252_v7  ;;  %v5403_v7 = vld [vmem:[%s8738_s1 + $0x1dc] ss:$44 sps:$4 sm:$0xff]  }
 0x14e   :  { %1667 = vmatprep.subr.bf16.mxu0 %v6271_v14  ;;  %v5405_v14 = vld [vmem:[%s8738_s1 + $0x1d8] ss:$44 sps:$4 sm:$0xff]  }
 0x151   :  { %1668 = vmatpush1.bf16.msra.mxu0 %v6282_v18  ;;  %v5407_v18 = vld [vmem:[%s8738_s1 + $0x234] ss:$44 sps:$4 sm:$0xff]  }
 0x152   :  { %1669 = vmatprep.subr.bf16.mxu0 %v6307_v28  ;;  %v5409_v28 = vld [vmem:[%s8738_s1 + $0x230] ss:$44 sps:$4 sm:$0xff]  }
 0x154   :  { %1601 = vmatmul.mubr.bf16.gmra.mrb[8].mxu0 %v5393_v40 }
 0x155   :  { %1610 = vmatprep.mubr.bf16.mxu0 %v5395_v45  ;;  %1670 = vmatpush1.bf16.msra.mxu0 %v6318_v33  ;;  %v5411_v33 = vld [vmem:[%s8738_s1 + $0x28c] ss:$44 sps:$4 sm:$0xff]  }
 0x156   :  { %1671 = vmatprep.subr.bf16.mxu0 %v6337_v41  ;;  %v5413_v41 = vld [vmem:[%s8738_s1 + $0x288] ss:$44 sps:$4 sm:$0xff]  }
 0x159   :  { %1672 = vmatpush1.bf16.msra.mxu0 %v6351_v47  ;;  %v5415_v47 = vld [vmem:[%s8738_s1 + $0x28] ss:$44 sps:$4 sm:$0xff]  }
 0x15a   :  { %1673 = vmatprep.subr.bf16.mxu0 %v6379_v60 }
 0x15c   :  { %1611 = vmatmul.mubr.bf16.gmra.mrb[12].mxu0 %v5397_v52 }
 0x15d   :  { %1620 = vmatprep.mubr.bf16.mxu0 %v5399_v56  ;;  %1674 = vmatpush1.bf16.msra.mxu0 %v6381_v61 }
 0x15e   :  { %1675 = vmatprep.subr.bf16.mxu0 %v6399_v6 }
 0x161   :  { %1676 = vmatpush1.bf16.msra.mxu0 %v6411_v11 }
 0x164   :  { %1621 = vmatmul.mubr.bf16.gmra.mrb[16].mxu0 %v5401_v2 }
 0x165   :  { %1630 = vmatprep.mubr.bf16.mxu0 %v5403_v7 }
 0x16c   :  { %1631 = vmatmul.mubr.bf16.gmra.mrb[20].mxu0 %v5405_v14 }
 0x16d   :  { %1640 = vmatprep.mubr.bf16.mxu0 %v5407_v18 }
 0x174   :  { %1641 = vmatmul.mubr.bf16.gmra.mrb[24].mxu0 %v5409_v28 }
 0x175   :  { %1650 = vmatprep.mubr.bf16.mxu0 %v5411_v33 }
 0x17c   :  { %1651 = vmatmul.mubr.bf16.gmra.mrb[28].mxu0 %v5413_v41 }
 0x17d   :  { %1693 = vmatprep.mubr.bf16.mxu0 %v8744_v12 }
 0x184   :  { %1694 = vmatmul.mubr.bf16.vlgmr.msra.gmra.mrb[0].mxu0 %v5415_v47 }
 0x194   :  { %v1705_v60 = vpop.f32.mrb[0].mxu1 }
 0x195   :  { %v1707_v61 = vpop.f32.mrb[1].mxu1 }
 0x196   :  { %v1709_v6 = vpop.f32.mrb[2].mxu1 }
 0x197   :  { %v1711_v11 = vpop.f32.mrb[3].mxu1 }
 0x19c   :  { %v1715_v46 = vpop.f32.mrb[4].mxu1 }
 0x19d   :  { %v1717_v48 = vpop.f32.mrb[5].mxu1 }
 0x19e   :  { %v1719_v49 = vpop.f32.mrb[6].mxu1 }
 0x19f   :  { %v1721_v50 = vpop.f32.mrb[7].mxu1 }
 0x1a4   :  { %v1725_v51 = vpop.f32.mrb[8].mxu1 }
 0x1a5   :  { %v1727_v53 = vpop.f32.mrb[9].mxu1 }
 0x1a6   :  { %v1729_v54 = vpop.f32.mrb[10].mxu1 }
 0x1a7   :  { %v1731_v55 = vpop.f32.mrb[11].mxu1 }
 0x1ac   :  { %v1735_v57 = vpop.f32.mrb[12].mxu1 }
 0x1ad   :  { %v1737_v58 = vpop.f32.mrb[13].mxu1 }
 0x1ae   :  { %v1739_v59 = vpop.f32.mrb[14].mxu1 }
 0x1af   :  { %v1741_v62 = vpop.f32.mrb[15].mxu1 }
 0x1b4   :  { %v1745_v63 = vpop.f32.mrb[16].mxu1 }
 0x1b5   :  { %v1747_v0 = vpop.f32.mrb[17].mxu1 }
 0x1b6   :  { %v6942_v1 = vpop.f32.mrb[18].mxu1 }
 0x1b7   :  { %v6944_v3 = vpop.f32.mrb[19].mxu1 }
 0x1bc   :  { %v6946_v4 = vpop.f32.mrb[20].mxu1 }
 0x1bd   :  { %v6948_v5 = vpop.f32.mrb[21].mxu1 }
 0x1be   :  { %v6950_v8 = vpop.f32.mrb[22].mxu1 }
 0x1bf   :  { %v6952_v9 = vpop.f32.mrb[23].mxu1 }
 0x1c4   :  { %v6954_v10 = vpop.f32.mrb[24].mxu1 }
 0x1c5   :  { %v6956_v13 = vpop.f32.mrb[25].mxu1 }
 0x1c6   :  { %v6958_v15 = vpop.f32.mrb[26].mxu1 }
 0x1c7   :  { %v6960_v16 = vpop.f32.mrb[27].mxu1 }
 0x21f   :  { %v1592_v17 = vpop.f32.mrb[4].mxu0 }
 0x220   :  { %v6962_v19 = vadd.f32 %v1705_v60, %v1592_v17  ;;  %v1594_v20 = vpop.f32.mrb[5].mxu0 }
 0x221   :  { %v6964_v21 = vadd.f32 %v1707_v61, %v1594_v20  ;;  %v1596_v22 = vpop.f32.mrb[6].mxu0 }
 0x222   :  { %v6966_v23 = vadd.f32 %v1709_v6, %v1596_v22  ;;  %v1598_v24 = vpop.f32.mrb[7].mxu0 }
 0x223   :  { %v6968_v25 = vadd.f32 %v1711_v11, %v1598_v24  ;;  %v1783_v26 = vsel %vm1774_vm0, %v6964_v21, 0.0 }
 0x224   :  { %v1784_v27 = vadd.f32 %v6962_v19, %v1783_v26 }
 0x225   :  { %v1787_v29 = vsel %vm1774_vm0, %v6968_v25, 0.0 }
 0x226   :  { %1785 = vadd.xlane.f32.xlu1 %v1784_v27  ;;  %v1788_v34 = vadd.f32 %v6966_v23, %v1787_v29 }
 0x227   :  { %v1602_v30 = vpop.f32.mrb[8].mxu0 }
 0x228   :  { %v6975_v31 = vadd.f32 %v1715_v46, %v1602_v30  ;;  %v1604_v32 = vpop.f32.mrb[9].mxu0 }
 0x229   :  { %v6978_v35 = vadd.f32 %v1717_v48, %v1604_v32  ;;  %v1606_v36 = vpop.f32.mrb[10].mxu0 }
 0x22a   :  { %v6980_v37 = vadd.f32 %v1719_v49, %v1606_v36  ;;  %1789 = vadd.xlane.f32.xlu1 %v1788_v34  ;;  %v1608_v38 = vpop.f32.mrb[11].mxu0 }
 0x22b   :  { %v6982_v39 = vadd.f32 %v1721_v50, %v1608_v38 }
 0x22d   :  { %v1795_v42 = vsel %vm1774_vm0, %v6982_v39, 0.0 }
 0x22e   :  { %v1796_v43 = vadd.f32 %v6980_v37, %v1795_v42 }
 0x22f   :  { %v1612_v44 = vpop.f32.mrb[12].mxu0 }
 0x230   :  { %v6987_v40 = vadd.f32 %v1725_v51, %v1612_v44  ;;  %1797 = vadd.xlane.f32.xlu1 %v1796_v43  ;;  %v1614_v45 = vpop.f32.mrb[13].mxu0 }
 0x231   :  { %v6989_v52 = vadd.f32 %v1727_v53, %v1614_v45  ;;  %v1616_v56 = vpop.f32.mrb[14].mxu0 }
 0x232   :  { %v6991_v2 = vadd.f32 %v1729_v54, %v1616_v56  ;;  %v1618_v7 = vpop.f32.mrb[15].mxu0 }
 0x233   :  { %v6993_v14 = vadd.f32 %v1731_v55, %v1618_v7 }
 0x235   :  { %v1803_v18 = vsel %vm1774_vm0, %v6993_v14, 0.0 }
 0x236   :  { %v1804_v28 = vadd.f32 %v6991_v2, %v1803_v18 }
 0x237   :  { %v1622_v33 = vpop.f32.mrb[16].mxu0 }
 0x238   :  { %v6998_v41 = vadd.f32 %v1735_v57, %v1622_v33  ;;  %1805 = vadd.xlane.f32.xlu1 %v1804_v28  ;;  %v1624_v47 = vpop.f32.mrb[17].mxu0  ;;  %v1799_v28 = vsel %vm1774_vm0, %v6989_v52, 0.0 }
 0x239   :  { %v7000_v60 = vadd.f32 %v1737_v58, %v1624_v47  ;;  %v1626_v61 = vpop.f32.mrb[18].mxu0  ;;  %v1800_v33 = vadd.f32 %v6987_v40, %v1799_v28 }
 0x23a   :  { %v7002_v6 = vadd.f32 %v1739_v59, %v1626_v61  ;;  %v1628_v11 = vpop.f32.mrb[19].mxu0 }
 0x23b   :  { %v7004_v46 = vadd.f32 %v1741_v62, %v1628_v11  ;;  %v1807_v47 = vsel %vm1774_vm0, %v7000_v60, 0.0 }
 0x23c   :  { %v1808_v61 = vadd.f32 %v6998_v41, %v1807_v47 }
 0x23d   :  { %v1811_v48 = vsel %vm1774_vm0, %v7004_v46, 0.0 }
 0x23e   :  { %v1812_v49 = vadd.f32 %v7002_v6, %v1811_v48 }
 0x23f   :  { %v1632_v50 = vpop.f32.mrb[20].mxu0 }
 0x240   :  { %v7009_v51 = vadd.f32 %v1745_v63, %v1632_v50  ;;  %1813 = vadd.xlane.f32.xlu1 %v1812_v49  ;;  %v1634_v53 = vpop.f32.mrb[21].mxu0 }
 0x241   :  { %v7011_v54 = vadd.f32 %v1747_v0, %v1634_v53  ;;  %v1636_v55 = vpop.f32.mrb[22].mxu0 }
 0x242   :  { %v7014_v57 = vadd.f32 %v6942_v1, %v1636_v55  ;;  %v1638_v58 = vpop.f32.mrb[23].mxu0 }
 0x243   :  { %v7017_v59 = vadd.f32 %v6944_v3, %v1638_v58  ;;  %v1815_v11 = vsel %vm1774_vm0, %v7011_v54, 0.0 }
 0x244   :  { %v1816_v48 = vadd.f32 %v7009_v51, %v1815_v11 }
 0x245   :  { %v1819_v62 = vsel %vm1774_vm0, %v7017_v59, 0.0 }
 0x246   :  { %v1820_v17 = vadd.f32 %v7014_v57, %v1819_v62 }
 0x247   :  { %v1642_v20 = vpop.f32.mrb[24].mxu0 }
 0x248   :  { %v7023_v63 = vadd.f32 %v6946_v4, %v1642_v20  ;;  %1821 = vadd.xlane.f32.xlu1 %v1820_v17  ;;  %v1644_v0 = vpop.f32.mrb[25].mxu0 }
 0x249   :  { %v7026_v22 = vadd.f32 %v6948_v5, %v1644_v0  ;;  %v1646_v1 = vpop.f32.mrb[26].mxu0 }
 0x24a   :  { %v7029_v24 = vadd.f32 %v6950_v8, %v1646_v1  ;;  %v1648_v3 = vpop.f32.mrb[27].mxu0 }
 0x24b   :  { %v7032_v26 = vadd.f32 %v6952_v9, %v1648_v3  ;;  %v1823_v49 = vsel %vm1774_vm0, %v7026_v22, 0.0 }
 0x24c   :  { %v1824_v50 = vadd.f32 %v7023_v63, %v1823_v49 }
 0x24d   :  { %v1827_v27 = vsel %vm1774_vm0, %v7032_v26, 0.0 }
 0x24e   :  { %v1828_v29 = vadd.f32 %v7029_v24, %v1827_v27 }
 0x24f   :  { %v1652_v4 = vpop.f32.mrb[28].mxu0 }
 0x250   :  { %v7038_v30 = vadd.f32 %v6954_v10, %v1652_v4  ;;  %1829 = vadd.xlane.f32.xlu1 %v1828_v29  ;;  %v1654_v5 = vpop.f32.mrb[29].mxu0 }
 0x251   :  { %v7041_v32 = vadd.f32 %v6956_v13, %v1654_v5  ;;  %v1656_v8 = vpop.f32.mrb[30].mxu0 }
 0x252   :  { %v7044_v34 = vadd.f32 %v6958_v15, %v1656_v8  ;;  %v1658_v9 = vpop.f32.mrb[31].mxu0 }
 0x253   :  { %v7047_v36 = vadd.f32 %v6960_v16, %v1658_v9  ;;  %v1791_v16 = vsel %vm1774_vm0, %v6978_v35, 0.0  ;;  %v1831_v53 = vsel %vm1774_vm0, %v7041_v32, 0.0 }
 0x254   :  { %v1792_v18 = vadd.f32 %v6975_v31, %v1791_v16  ;;  %v1832_v55 = vadd.f32 %v7038_v30, %v1831_v53 }
 0x255   :  { %v1835_v38 = vsel %vm1774_vm0, %v7047_v36, 0.0 }
 0x256   :  { %v1836_v42 = vadd.f32 %v7044_v34, %v1835_v38 }
 0x257   :  { %v1695_v10 = vpop.f32.mrb[0].mxu0 }
 0x258   :  { %1837 = vadd.xlane.f32.xlu1 %v1836_v42  ;;  %v1697_v43 = vpop.f32.mrb[1].mxu0 }
 0x259   :  { %v1699_v44 = vpop.f32.mrb[2].mxu0  ;;  %v1775_v13 = vsel %vm1774_vm0, %v1697_v43, 0.0 }
 0x25a   :  { %v1701_v45 = vpop.f32.mrb[3].mxu0  ;;  %v1776_v56 = vadd.f32 %v1775_v13, %v1695_v10 }
 0x25b   :  { %v1779_v15 = vsel %vm1774_vm0, %v1701_v45, 0.0 }
 0x25c   :  { %1777 = vadd.xlane.f32.xlu0 %v1776_v56  ;;  %v1780_v7 = vadd.f32 %v1779_v15, %v1699_v44 }
 0x260   :  { %1781 = vadd.xlane.f32.xlu0 %v1780_v7 }
 0x264   :  { %1793 = vadd.xlane.f32.xlu0 %v1792_v18 }
 0x268   :  { %1801 = vadd.xlane.f32.xlu0 %v1800_v33 }
 0x26c   :  { %1809 = vadd.xlane.f32.xlu0 %v1808_v61 }
 0x270   :  { %1817 = vadd.xlane.f32.xlu0 %v1816_v48 }
 0x274   :  { %1825 = vadd.xlane.f32.xlu0 %v1824_v50 }
 0x278   :  { %1833 = vadd.xlane.f32.xlu0 %v1832_v55 }
 0x2b3   :  { %v1786_v58 = vpop.xlane.xlu1 %1785 }
 0x2b4   :  { %v1841_v17 = vmul.f32 0.0051020407, %v1786_v58 }
 0x2b6   :  { %v7073_v1 = vsub.f32 %v6964_v21, %v1841_v17  ;;  %v7083_v9 = vsub.f32 %v6962_v19, %v1841_v17 }
 0x2b7   :  { %v1790_v62 = vpop.xlane.xlu1 %1789 }
 0x2b8   :  { %v1842_v20 = vmul.f32 0.0051020407, %v1790_v62  ;;  %v1892_v13 = vmul.f32 %v7073_v1, %v7073_v1  ;;  %v1891_v47 = vmul.f32 %v7083_v9, %v7083_v9 }
 0x2ba   :  { %v7076_v29 = vsub.f32 %v6968_v25, %v1842_v20 }
 0x2bd   :  { %v1798_v0 = vpop.xlane.xlu1 %1797 }
 0x2be   :  { %v1844_v38 = vmul.f32 0.0051020407, %v1798_v0 }
 0x2c0   :  { %v7102_v18 = vsub.f32 %v6982_v39, %v1844_v38  ;;  %v7115_v50 = vsub.f32 %v6980_v37, %v1844_v38 }
 0x2c2   :  { %v1898_v0 = vmul.f32 %v7102_v18, %v7102_v18 }
 0x2c5   :  { %v1806_v4 = vpop.xlane.xlu1 %1805 }
 0x2c6   :  { %v1846_v61 = vmul.f32 0.0051020407, %v1806_v4 }
 0x2cd   :  { %v1814_v19 = vpop.xlane.xlu1 %1813 }
 0x2ce   :  { %v1848_v48 = vmul.f32 0.0051020407, %v1814_v19  ;;  %v1939_v19 = vsel %vm1774_vm0, %v1898_v0, 0.0 }
 0x2d0   :  { %v7134_v4 = vsub.f32 %v7004_v46, %v1848_v48 }
 0x2e9   :  { %v1778_v3 = vpop.xlane.xlu0 %1777 }
 0x2ea   :  { %v1839_v27 = vmul.f32 0.0051020407, %v1778_v3  ;;  %v7127_v3 = vsub.f32 %v6993_v14, %v1846_v61 }
 0x2ec   :  { %v7078_v5 = vsub.f32 %v1695_v10, %v1839_v27  ;;  %v7080_v8 = vsub.f32 %v1697_v43, %v1839_v27  ;;  %v7092_v10 = vsub.f32 %v6966_v23, %v1842_v20  ;;  %v1894_v43 = vmul.f32 %v7076_v29, %v7076_v29  ;;  %v1822_v27 = vpop.xlane.xlu1 %1821 }
 0x2ed   :  { %v1782_v42 = vpop.xlane.xlu0 %1781  ;;  %v1927_v23 = vsel %vm1774_vm0, %v1892_v13, 0.0 }
 0x2ee   :  { %v1840_v21 = vmul.f32 0.0051020407, %v1782_v42  ;;  %v1887_v56 = vmul.f32 %v7078_v5, %v7078_v5  ;;  %v1888_v25 = vmul.f32 %v7080_v8, %v7080_v8  ;;  %v1893_v39 = vmul.f32 %v7092_v10, %v7092_v10 }
 0x2ef   :  { %v1931_v49 = vsel %vm1774_vm0, %v1894_v43, 0.0  ;;  %v1928_v17 = vadd.f32 %v1927_v23, %v1891_v47  ;;  %v7156_v47 = vsub.f32 %v7002_v6, %v1848_v48 }
 0x2f0   :  { %v7096_v15 = vsub.f32 %v1699_v44, %v1840_v21  ;;  %v7098_v7 = vsub.f32 %v1701_v45, %v1840_v21  ;;  %v1919_v16 = vsel %vm1774_vm0, %v1888_v25, 0.0  ;;  %v1932_v38 = vadd.f32 %v1931_v49, %v1893_v39 }
 0x2f1   :  { %v1794_v28 = vpop.xlane.xlu0 %1793  ;;  %v1920_v33 = vadd.f32 %v1919_v16, %v1887_v56  ;;  %v1897_v21 = vmul.f32 %v7115_v50, %v7115_v50  ;;  %v7146_v56 = vsub.f32 %v6991_v2, %v1846_v61  ;;  %v1850_v25 = vmul.f32 0.0051020407, %v1822_v27  ;;  %v1830_v16 = vpop.xlane.xlu1 %1829 }
 0x2f2   :  { %v1843_v11 = vmul.f32 0.0051020407, %v1794_v28  ;;  %v1889_v44 = vmul.f32 %v7096_v15, %v7096_v15  ;;  %v1890_v45 = vmul.f32 %v7098_v7, %v7098_v7  ;;  %v1906_v2 = vmul.f32 %v7134_v4, %v7134_v4 }
 0x2f3   :  { %1921 = vadd.xlane.f32.xlu0 %v1920_v33  ;;  %v1902_v33 = vmul.f32 %v7127_v3, %v7127_v3  ;;  %v1852_v39 = vmul.f32 0.0051020407, %v1830_v16  ;;  %v1901_v49 = vmul.f32 %v7146_v56, %v7146_v56  ;;  %v7181_v0 = vsub.f32 %v7014_v57, %v1850_v25 }
 0x2f4   :  { %v7118_v53 = vsub.f32 %v6975_v31, %v1843_v11  ;;  %v7121_v55 = vsub.f32 %v6978_v35, %v1843_v11  ;;  %v1923_v58 = vsel %vm1774_vm0, %v1890_v45, 0.0  ;;  %v1940_v11 = vadd.f32 %v1939_v19, %v1897_v21 }
 0x2f5   :  { %v1802_v62 = vpop.xlane.xlu0 %1801  ;;  %v1924_v20 = vadd.f32 %v1923_v58, %v1889_v44  ;;  %v7168_v45 = vsub.f32 %v7017_v59, %v1850_v25  ;;  %v1905_v59 = vmul.f32 %v7156_v47, %v7156_v47 }
 0x2f6   :  { %v1845_v37 = vmul.f32 0.0051020407, %v1802_v62  ;;  %v1895_v31 = vmul.f32 %v7118_v53, %v7118_v53  ;;  %v1896_v35 = vmul.f32 %v7121_v55, %v7121_v55  ;;  %v1947_v62 = vsel %vm1774_vm0, %v1902_v33, 0.0 }
 0x2f7   :  { %1929 = vadd.xlane.f32.xlu0 %v1928_v17  ;;  %1925 = vadd.xlane.f32.xlu1 %v1924_v20  ;;  %v1838_v17 = vpop.xlane.xlu1 %1837  ;;  %v1955_v20 = vsel %vm1774_vm0, %v1906_v2, 0.0 }
 0x2f8   :  { %v7137_v42 = vsub.f32 %v6987_v40, %v1845_v37  ;;  %v7140_v14 = vsub.f32 %v6989_v52, %v1845_v37  ;;  %v1935_v13 = vsel %vm1774_vm0, %v1896_v35, 0.0  ;;  %v7191_v35 = vsub.f32 %v7032_v26, %v1852_v39 }
 0x2f9   :  { %v1810_v46 = vpop.xlane.xlu0 %1809  ;;  %v1936_v43 = vadd.f32 %v1935_v13, %v1895_v31  ;;  %v1948_v13 = vadd.f32 %v1947_v62, %v1901_v49  ;;  %v1956_v25 = vadd.f32 %v1955_v20, %v1905_v59 }
 0x2fa   :  { %v1847_v28 = vmul.f32 0.0051020407, %v1810_v46  ;;  %v1899_v40 = vmul.f32 %v7137_v42, %v7137_v42  ;;  %v1900_v52 = vmul.f32 %v7140_v14, %v7140_v14  ;;  %v1910_v46 = vmul.f32 %v7168_v45, %v7168_v45 }
 0x2fb   :  { %1933 = vadd.xlane.f32.xlu1 %v1932_v38  ;;  %1937 = vadd.xlane.f32.xlu0 %v1936_v43  ;;  %v1854_v43 = vmul.f32 0.0051020407, %v1838_v17 }
 0x2fc   :  { %v7161_v23 = vsub.f32 %v6998_v41, %v1847_v28  ;;  %v7164_v61 = vsub.f32 %v7000_v60, %v1847_v28  ;;  %v1943_v44 = vsel %vm1774_vm0, %v1900_v52, 0.0  ;;  %v1909_v28 = vmul.f32 %v7181_v0, %v7181_v0 }
 0x2fd   :  { %v1818_v6 = vpop.xlane.xlu0 %1817  ;;  %v1944_v48 = vadd.f32 %v1943_v44, %v1899_v40  ;;  %v7209_v40 = vsub.f32 %v7029_v24, %v1852_v39  ;;  %v1963_v2 = vsel %vm1774_vm0, %v1910_v46, 0.0  ;;  %v5416_v46 = vld [vmem:[%s8740_s3] ss:$8 sps:$4 sm:$0xff]  }
 0x2fe   :  { %v1849_v58 = vmul.f32 0.0051020407, %v1818_v6  ;;  %v1903_v41 = vmul.f32 %v7161_v23, %v7161_v23  ;;  %v1904_v60 = vmul.f32 %v7164_v61, %v7164_v61  ;;  %v1964_v49 = vadd.f32 %v1963_v2, %v1909_v28  ;;  %v5425_v28 = vld [vmem:[%s8740_s3 + $0x30] ss:$8 sps:$4 sm:$0xff]   ;;  %v5433_v2 = vld [vmem:[%s8740_s3 + $0x54] ss:$8 sps:$4 sm:$0xff]  }
 0x2ff   :  { %1941 = vadd.xlane.f32.xlu1 %v1940_v11  ;;  %1945 = vadd.xlane.f32.xlu0 %v1944_v48  ;;  %v1914_v11 = vmul.f32 %v7191_v35, %v7191_v35  ;;  %v1913_v62 = vmul.f32 %v7209_v40, %v7209_v40 }
 0x300   :  { %v7184_v27 = vsub.f32 %v7009_v51, %v1849_v58  ;;  %v7187_v37 = vsub.f32 %v7011_v54, %v1849_v58  ;;  %v1951_v31 = vsel %vm1774_vm0, %v1904_v60, 0.0 }
 0x301   :  { %v1826_v38 = vpop.xlane.xlu0 %1825  ;;  %v1952_v21 = vadd.f32 %v1951_v31, %v1903_v41  ;;  %v1971_v41 = vsel %vm1774_vm0, %v1914_v11, 0.0  ;;  %v5431_v11 = vld [vmem:[%s8740_s3 + $0x50] ss:$8 sps:$4 sm:$0xff]  }
 0x302   :  { %v1851_v57 = vmul.f32 0.0051020407, %v1826_v38  ;;  %v1907_v51 = vmul.f32 %v7184_v27, %v7184_v27  ;;  %v1908_v54 = vmul.f32 %v7187_v37, %v7187_v37  ;;  %v1972_v17 = vadd.f32 %v1971_v41, %v1913_v62 }
 0x303   :  { %1949 = vadd.xlane.f32.xlu1 %v1948_v13  ;;  %1953 = vadd.xlane.f32.xlu0 %v1952_v21  ;;  %v2175_v13 = vld [vmem:[%s8739_s5] sm:$0xff]  ;;  %v2176_v21 = vld [vmem:[%s8739_s5 + $0x8] sm:$0xff] }
 0x304   :  { %v7200_v26 = vsub.f32 %v7023_v63, %v1851_v57  ;;  %v7203_v19 = vsub.f32 %v7026_v22, %v1851_v57  ;;  %v1959_v16 = vsel %vm1774_vm0, %v1908_v54, 0.0  ;;  %v7215_v63 = vsub.f32 %v7047_v36, %v1854_v43  ;;  %v5421_v57 = vld [vmem:[%s8740_s3 + $0x14] ss:$8 sps:$4 sm:$0xff]   ;;  %v5424_v54 = vld [vmem:[%s8740_s3 + $0x24] ss:$8 sps:$4 sm:$0xff]  }
 0x305   :  { %v1834_v52 = vpop.xlane.xlu0 %1833  ;;  %v1960_v33 = vadd.f32 %v1959_v16, %v1907_v51  ;;  %v7229_v36 = vsub.f32 %v7044_v34, %v1854_v43  ;;  %v5418_v43 = vld [vmem:[%s8740_s3 + $0x4] ss:$8 sps:$4 sm:$0xff]   ;;  %v5419_v51 = vld [vmem:[%s8740_s3 + $0x10] ss:$8 sps:$4 sm:$0xff]   ;;  %v5427_v16 = vld [vmem:[%s8740_s3 + $0x34] ss:$8 sps:$4 sm:$0xff]  }
 0x306   :  { %v1853_v22 = vmul.f32 0.0051020407, %v1834_v52  ;;  %v1911_v44 = vmul.f32 %v7200_v26, %v7200_v26  ;;  %v1912_v6 = vmul.f32 %v7203_v19, %v7203_v19  ;;  %2532 = vmatprep.subr.bf16.mxu1 %v5418_v43  ;;  %v5430_v52 = vld [vmem:[%s8740_s3 + $0x44] ss:$8 sps:$4 sm:$0xff]  }
 0x307   :  { %1957 = vadd.xlane.f32.xlu1 %v1956_v25  ;;  %1961 = vadd.xlane.f32.xlu0 %v1960_v33  ;;  %v1917_v20 = vmul.f32 %v7229_v36, %v7229_v36  ;;  %v5422_v25 = vld [vmem:[%s8740_s3 + $0x20] ss:$8 sps:$4 sm:$0xff]  }
 0x308   :  { %v7222_v24 = vsub.f32 %v7038_v30, %v1853_v22  ;;  %v7225_v39 = vsub.f32 %v7041_v32, %v1853_v22  ;;  %v1967_v48 = vsel %vm1774_vm0, %v1912_v6, 0.0  ;;  %v1918_v32 = vmul.f32 %v7215_v63, %v7215_v63  ;;  %2533 = vmatpush1.bf16.msra.mxu1 %v5416_v46  ;;  %v5428_v33 = vld [vmem:[%s8740_s3 + $0x40] ss:$8 sps:$4 sm:$0xff]   ;;  %v5436_v22 = vld [vmem:[%s8740_s3 + $0x64] ss:$8 sps:$4 sm:$0xff]  }
 0x309   :  { %v1968_v58 = vadd.f32 %v1967_v48, %v1911_v44  ;;  %2534 = vmatprep.subr.bf16.mxu1 %v5421_v57  ;;  %v5434_v44 = vld [vmem:[%s8740_s3 + $0x60] ss:$8 sps:$4 sm:$0xff]   ;;  %v5439_v6 = vld [vmem:[%s8740_s3 + $0x74] ss:$8 sps:$4 sm:$0xff]   ;;  %v5437_v48 = vld [vmem:[%s8740_s3 + $0x70] ss:$8 sps:$4 sm:$0xff]  }
 0x30a   :  { %v1915_v60 = vmul.f32 %v7222_v24, %v7222_v24  ;;  %v1916_v30 = vmul.f32 %v7225_v39, %v7225_v39  ;;  %v1979_v31 = vsel %vm1774_vm0, %v1918_v32, 0.0  ;;  %v2031_v43 = vld [vmem:[%s8741_s4] sm:$0xff] }
 0x30b   :  { %1965 = vadd.xlane.f32.xlu1 %v1964_v49  ;;  %1969 = vadd.xlane.f32.xlu0 %v1968_v58  ;;  %v1980_v38 = vadd.f32 %v1979_v31, %v1917_v20  ;;  %v5442_v49 = vld [vmem:[%s8740_s3 + $0x84] ss:$8 sps:$4 sm:$0xff]   ;;  %v5440_v58 = vld [vmem:[%s8740_s3 + $0x80] ss:$8 sps:$4 sm:$0xff]  }
 0x30c   :  { %v1975_v34 = vsel %vm1774_vm0, %v1916_v30, 0.0  ;;  %2535 = vmatpush1.bf16.msra.mxu1 %v5419_v51 }
 0x30d   :  { %v1976_v59 = vadd.f32 %v1975_v34, %v1915_v60  ;;  %2536 = vmatprep.subr.bf16.mxu1 %v5424_v54 }
 0x30f   :  { %1973 = vadd.xlane.f32.xlu1 %v1972_v17  ;;  %1977 = vadd.xlane.f32.xlu0 %v1976_v59 }
 0x310   :  { %2537 = vmatpush1.bf16.msra.mxu1 %v5422_v25 }
 0x311   :  { %2538 = vmatprep.subr.bf16.mxu1 %v5427_v16 }
 0x313   :  { %1981 = vadd.xlane.f32.xlu1 %v1980_v38 }
 0x314   :  { %2539 = vmatpush1.bf16.msra.mxu1 %v5425_v28 }
 0x315   :  { %2540 = vmatprep.subr.bf16.mxu1 %v5430_v52  ;;  %v2033_v52 = vld [vmem:[%s8741_s4 + $0x10] sm:$0xff] }
 0x318   :  { %2541 = vmatpush1.bf16.msra.mxu1 %v5428_v33  ;;  %v5445_v33 = vld [vmem:[%s8740_s3 + $0x94] ss:$8 sps:$4 sm:$0xff]  }
 0x319   :  { %2542 = vmatprep.subr.bf16.mxu1 %v5433_v2 }
 0x31c   :  { %2543 = vmatpush1.bf16.msra.mxu1 %v5431_v11  ;;  %v5443_v11 = vld [vmem:[%s8740_s3 + $0x90] ss:$8 sps:$4 sm:$0xff]  }
 0x31d   :  { %2544 = vmatprep.subr.bf16.mxu1 %v5436_v22 }
 0x320   :  { %2545 = vmatpush1.bf16.msra.mxu1 %v5434_v44 }
 0x321   :  { %2546 = vmatprep.subr.bf16.mxu1 %v5439_v6 }
 0x324   :  { %2193 = vperm.xlu1 %4647, %v2175_v13   ;;  %2547 = vmatpush1.bf16.msra.mxu1 %v5437_v48 }
 0x325   :  { %2548 = vmatprep.subr.bf16.mxu1 %v5442_v49 }
 0x328   :  { %2198 = vperm.xlu1 %4647, %v2176_v21   ;;  %2549 = vmatpush1.bf16.msra.mxu1 %v5440_v58  ;;  %v2032_v58 = vld [vmem:[%s8741_s4 + $0x8] sm:$0xff] }
 0x329   :  { %2550 = vmatprep.subr.bf16.mxu1 %v5445_v33 }
 0x32c   :  { %2551 = vmatpush1.bf16.msra.mxu1 %v5443_v11 }
 0x380   :  { %v1922_v62 = vpop.xlane.xlu0 %1921 }
 0x381   :  { %v1983_v41 = vmul.f32 0.0051020407, %v1922_v62  ;;  %v5448_v62 = vld [vmem:[%s8740_s3 + $0xa4] ss:$8 sps:$4 sm:$0xff]  }
 0x382   :  { %2552 = vmatprep.subr.bf16.mxu1 %v5448_v62 }
 0x383   :  { %v1999_v60 = vadd.f32 1e-05, %v1983_v41 }
 0x384   :  { %v1926_v30 = vpop.xlane.xlu1 %1925  ;;  %v1930_v32 = vpop.xlane.xlu0 %1929 }
 0x385   :  { %5472 = vrsqrt.f32 %v1999_v60  ;;  %v1984_v34 = vmul.f32 0.0051020407, %v1926_v30  ;;  %v1985_v17 = vmul.f32 0.0051020407, %v1930_v32  ;;  %v5446_v60 = vld [vmem:[%s8740_s3 + $0xa0] ss:$8 sps:$4 sm:$0xff]  }
 0x386   :  { %2553 = vmatpush1.bf16.msra.mxu1 %v5446_v60 }
 0x387   :  { %v2001_v59 = vadd.f32 1e-05, %v1985_v17  ;;  %v2000_v20 = vadd.f32 1e-05, %v1984_v34  ;;  %v2036_v17 = vld [vmem:[%s8741_s4 + $0x28] sm:$0xff] }
 0x388   :  { %v1934_v31 = vpop.xlane.xlu1 %1933  ;;  %v1938_v16 = vpop.xlane.xlu0 %1937 }
 0x389   :  { %v1986_v38 = vmul.f32 0.0051020407, %v1934_v31  ;;  %5474 = vrsqrt.f32 %v2001_v59  ;;  %v1987_v44 = vmul.f32 0.0051020407, %v1938_v16  ;;  %v5451_v31 = vld [vmem:[%s8740_s3 + $0xb4] ss:$8 sps:$4 sm:$0xff]  }
 0x38a   :  { %5476 = vrsqrt.f32 %v2000_v20  ;;  %v2034_v20 = vld [vmem:[%s8741_s4 + $0x18] sm:$0xff]  ;;  %2554 = vmatprep.subr.bf16.mxu1 %v5451_v31 }
 0x38b   :  { %v2002_v13 = vadd.f32 1e-05, %v1986_v38  ;;  %v2003_v30 = vadd.f32 1e-05, %v1987_v44 }
 0x38c   :  { %v1942_v21 = vpop.xlane.xlu1 %1941  ;;  %v1946_v32 = vpop.xlane.xlu0 %1945 }
 0x38d   :  { %v1988_v46 = vmul.f32 0.0051020407, %v1942_v21  ;;  %5478 = vrsqrt.f32 %v2002_v13  ;;  %v5449_v21 = vld [vmem:[%s8740_s3 + $0xb0] ss:$8 sps:$4 sm:$0xff]  }
 0x38e   :  { %2555 = vmatpush1.bf16.msra.mxu1 %v5449_v21 }
 0x38f   :  { %v5473_v57 = vpop.eup %5472  ;;  %v2004_v51 = vadd.f32 1e-05, %v1988_v46  ;;  %v1989_v46 = vmul.f32 0.0051020407, %v1946_v32 }
 0x390   :  { %v1950_v54 = vpop.xlane.xlu1 %1949  ;;  %v2047_v25 = vmul.f32 %v5473_v57, %v2031_v43  ;;  %v1954_v44 = vpop.xlane.xlu0 %1953 }
 0x391   :  { %5480 = vrsqrt.f32 %v2004_v51  ;;  %v1990_v28 = vmul.f32 0.0051020407, %v1950_v54  ;;  %v2375_v54 = vld [vmem:[%s8740_s3 + $0xc0] sm:$0x33]  ;;  %v2005_v33 = vadd.f32 1e-05, %v1989_v46 }
 0x392   :  { %2065 = vperm.xlu0 %4646, %v2047_v25   ;;  %v4369_v25 = vcombine.high %v2375_v54, %v2375_v54  ;;  %v4368_v16 = vcombine.low %v2375_v54, %v2375_v54  ;;  %v2037_v54 = vld [vmem:[%s8741_s4 + $0x30] sm:$0xff] }
 0x393   :  { %v2006_v2 = vadd.f32 1e-05, %v1990_v28  ;;  %v5475_v22 = vpop.eup %5474 }
 0x394   :  { %v1958_v6 = vpop.xlane.xlu1 %1957  ;;  %v2049_v48 = vmul.f32 %v5475_v22, %v2033_v52  ;;  %v5477_v49 = vpop.eup %5476  ;;  %v2180_v52 = vld [vmem:[%s8739_s5 + $0x28] sm:$0xff]  ;;  %4370 = vmatprep.subr.msk.bf16.mxu1 %vm2525_vm1, %v4369_v25  ;;  %v2527_v11 = vsel %vm2525_vm1, %v4368_v16, 0 }
 0x395   :  { %5482 = vrsqrt.f32 %v2006_v2  ;;  %v1992_v41 = vmul.f32 0.0051020407, %v1958_v6  ;;  %v2048_v34 = vmul.f32 %v5477_v49, %v2032_v58  ;;  %v2177_v2 = vld [vmem:[%s8739_s5 + $0x10] sm:$0xff]  ;;  %v2038_v6 = vld [vmem:[%s8741_s4 + $0x38] sm:$0xff]  ;;  %2557 = vmatpush1.bf16.msra.mxu1 %v2527_v11  ;;  %v1991_v49 = vmul.f32 0.0051020407, %v1954_v44 }
 0x396   :  { %2075 = vperm.xlu1 %4647, %v2049_v48   ;;  %5484 = vrsqrt.f32 %v2003_v30  ;;  %v2035_v30 = vld [vmem:[%s8741_s4 + $0x20] sm:$0xff]  ;;  %v2184_v16 = vld [vmem:[%s8739_s5 + $0x48] sm:$0xff]  ;;  %v2042_v11 = vld [vmem:[%s8741_s4 + $0x58] sm:$0xff] }
 0x397   :  { %v5479_v59 = vpop.eup %5478  ;;  %v2008_v13 = vadd.f32 1e-05, %v1992_v41  ;;  %v2178_v41 = vld [vmem:[%s8739_s5 + $0x18] sm:$0xff] }
 0x398   :  { %v1966_v43 = vpop.xlane.xlu1 %1965  ;;  %v2050_v51 = vmul.f32 %v5479_v59, %v2034_v20  ;;  %v1962_v20 = vpop.xlane.xlu0 %1961 }
 0x399   :  { %5486 = vrsqrt.f32 %v2008_v13  ;;  %v1994_v28 = vmul.f32 0.0051020407, %v1966_v43  ;;  %v1993_v21 = vmul.f32 0.0051020407, %v1962_v20  ;;  %v2183_v20 = vld [vmem:[%s8739_s5 + $0x40] sm:$0xff] }
 0x39a   :  { %2070 = vperm.xlu1 %4647, %v2048_v34   ;;  %5488 = vrsqrt.f32 %v2005_v33  ;;  %v2182_v34 = vld [vmem:[%s8739_s5 + $0x38] sm:$0xff] }
 0x39b   :  { %v5481_v38 = vpop.eup %5480  ;;  %v2010_v48 = vadd.f32 1e-05, %v1994_v28  ;;  %v2009_v28 = vadd.f32 1e-05, %v1993_v21 }
 0x39c   :  { %v2052_v57 = vmul.f32 %v5481_v38, %v2036_v17  ;;  %v1974_v58 = vpop.xlane.xlu1 %1973  ;;  %v2007_v17 = vadd.f32 1e-05, %v1991_v49  ;;  %v2040_v38 = vld [vmem:[%s8741_s4 + $0x48] sm:$0xff]  ;;  %v1970_v33 = vpop.xlane.xlu0 %1969 }
 0x39d   :  { %5490 = vrsqrt.f32 %v2010_v48  ;;  %v1996_v32 = vmul.f32 0.0051020407, %v1974_v58  ;;  %v1995_v44 = vmul.f32 0.0051020407, %v1970_v33  ;;  %v2181_v48 = vld [vmem:[%s8739_s5 + $0x30] sm:$0xff]  ;;  %v2039_v58 = vld [vmem:[%s8741_s4 + $0x40] sm:$0xff] }
 0x39e   :  { %2090 = vperm.xlu0 %4646, %v2052_v57   ;;  %2080 = vperm.xlu1 %4647, %v2050_v51   ;;  %5492 = vrsqrt.f32 %v2007_v17  ;;  %v2179_v57 = vld [vmem:[%s8739_s5 + $0x20] sm:$0xff] }
 0x39f   :  { %v5483_v22 = vpop.eup %5482  ;;  %v2012_v13 = vadd.f32 1e-05, %v1996_v32  ;;  %v2187_v33 = vld [vmem:[%s8739_s5 + $0x60] sm:$0xff] }
 0x3a0   :  { %v2054_v62 = vmul.f32 %v5483_v22, %v2038_v6  ;;  %v5485_v60 = vpop.eup %5484  ;;  %v1982_v46 = vpop.xlane.xlu1 %1981 }
 0x3a1   :  { %v2051_v31 = vmul.f32 %v5485_v60, %v2035_v30  ;;  %5494 = vrsqrt.f32 %v2012_v13  ;;  %v1998_v25 = vmul.f32 0.0051020407, %v1982_v46  ;;  %v1978_v30 = vpop.xlane.xlu0 %1977  ;;  %v2188_v13 = vld [vmem:[%s8739_s5 + $0x68] sm:$0xff] }
 0x3a2   :  { %2218 = vperm.xlu0 %4646, %v2180_v52   ;;  %2203 = vperm.xlu1 %4647, %v2177_v2   ;;  %5496 = vrsqrt.f32 %v2009_v28  ;;  %v1997_v17 = vmul.f32 0.0051020407, %v1978_v30  ;;  %v2190_v28 = vld [vmem:[%s8739_s5 + $0x78] sm:$0xff] }
 0x3a3   :  { %v5487_v59 = vpop.eup %5486  ;;  %v2014_v22 = vadd.f32 1e-05, %v1998_v25 }
 0x3a4   :  { %v2056_v43 = vmul.f32 %v5487_v59, %v2040_v38  ;;  %v5489_v51 = vpop.eup %5488  ;;  %v2041_v38 = vld [vmem:[%s8741_s4 + $0x50] sm:$0xff]  ;;  %v2013_v21 = vadd.f32 1e-05, %v1997_v17 }
 0x3a5   :  { %v2053_v2 = vmul.f32 %v5489_v51, %v2037_v54  ;;  %5498 = vrsqrt.f32 %v2014_v22  ;;  %v2185_v54 = vld [vmem:[%s8739_s5 + $0x50] sm:$0xff] }
 0x3a6   :  { %2100 = vperm.xlu0 %4646, %v2054_v62   ;;  %2208 = vperm.xlu1 %4647, %v2178_v41   ;;  %v2186_v62 = vld [vmem:[%s8739_s5 + $0x58] sm:$0xff]  ;;  %v2011_v41 = vadd.f32 1e-05, %v1995_v44  ;;  %v2189_v44 = vld [vmem:[%s8739_s5 + $0x70] sm:$0xff]  ;;  %s5506_s5 = smov 17  }
 0x3a7   :  { %v5491_v52 = vpop.eup %5490 }
 0x3a8   :  { %v2058_v6 = vmul.f32 %v5491_v52, %v2042_v11  ;;  %v5493_v49 = vpop.eup %5492  ;;  %5500 = vrsqrt.f32 %v2011_v41  ;;  %v2045_v11 = vld [vmem:[%s8741_s4 + $0x70] sm:$0xff] }
 0x3a9   :  { %v2055_v32 = vmul.f32 %v5493_v49, %v2039_v58  ;;  %5502 = vrsqrt.f32 %v2013_v21 }
 0x3aa   :  { %2228 = vperm.xlu0 %4646, %v2182_v34   ;;  %2085 = vperm.xlu1 %4647, %v2051_v31   ;;  %v2044_v34 = vld [vmem:[%s8741_s4 + $0x68] sm:$0xff] }
 0x3ab   :  { %v5495_v60 = vpop.eup %5494 }
 0x3ac   :  { %v2060_v59 = vmul.f32 %v5495_v60, %v2044_v34  ;;  %v5497_v31 = vpop.eup %5496 }
 0x3ae   :  { %2110 = vperm.xlu0 %4646, %v2056_v43   ;;  %2213 = vperm.xlu1 %4647, %v2179_v57   ;;  %v2057_v43 = vmul.f32 %v5497_v31, %v2041_v38  ;;  %v2046_v57 = vld [vmem:[%s8741_s4 + $0x78] sm:$0xff] }
 0x3af   :  { %v5499_v46 = vpop.eup %5498 }
 0x3b0   :  { %v2062_v51 = vmul.f32 %v5499_v46, %v2046_v57 }
 0x3b2   :  { %2238 = vperm.xlu0 %4646, %v2184_v16   ;;  %2095 = vperm.xlu1 %4647, %v2053_v2   ;;  %v5501_v25 = vpop.eup %5500  ;;  %v2043_v16 = vld [vmem:[%s8741_s4 + $0x60] sm:$0xff]  ;;  %s5505_s4 = smov 16  }
 0x3b3   :  { %v2059_v52 = vmul.f32 %v5501_v25, %v2043_v16  ;;  %v5503_v2 = vpop.eup %5502 }
 0x3b4   :  { %v2061_v22 = vmul.f32 %v5503_v2, %v2045_v11 }
 0x3b6   :  { %2120 = vperm.xlu0 %4646, %v2058_v6   ;;  %2223 = vperm.xlu1 %4647, %v2181_v48   ;;  %v2194_v6 = vpop.permute.xlu1 %2193 }
 0x3ba   :  { %2248 = vperm.xlu0 %4646, %v2186_v62   ;;  %2105 = vperm.xlu1 %4647, %v2055_v32   ;;  %v2199_v48 = vpop.permute.xlu1 %2198 }
 0x3be   :  { %2130 = vperm.xlu0 %4646, %v2060_v59   ;;  %2233 = vperm.xlu1 %4647, %v2183_v20  }
 0x3c2   :  { %2258 = vperm.xlu0 %4646, %v2188_v13   ;;  %2115 = vperm.xlu1 %4647, %v2057_v43  }
 0x3c6   :  { %2140 = vperm.xlu0 %4646, %v2062_v51   ;;  %2243 = vperm.xlu1 %4647, %v2185_v54  }
 0x3ca   :  { %2268 = vperm.xlu0 %4646, %v2190_v28   ;;  %2125 = vperm.xlu1 %4647, %v2059_v52  }
 0x3ce   :  { %2253 = vperm.xlu1 %4647, %v2187_v33  }
 0x3d2   :  { %2135 = vperm.xlu1 %4647, %v2061_v22  }
 0x3d6   :  { %2263 = vperm.xlu1 %4647, %v2189_v44  }
 0x411   :  { %v2066_v49 = vpop.permute.xlu0 %2065 }
 0x412   :  { %v2143_v62 = vmul.f32 %v2066_v49, %v7078_v5  ;;  %v2144_v41 = vmul.f32 %v2066_v49, %v7080_v8 }
 0x414   :  { %v2271_v30 = vadd.f32 %v2194_v6, %v2143_v62  ;;  %v2272_v32 = vadd.f32 %v2194_v6, %v2144_v41 }
 0x415   :  { %v2076_v58 = vpop.permute.xlu1 %2075 }
 0x416   :  { %v2303_v13 = vmax.f32 %v2271_v30, 0.0  ;;  %v2304_v21 = vmax.f32 %v2272_v32, 0.0  ;;  %v2147_v8 = vmul.f32 %v2076_v58, %v7083_v9  ;;  %v2148_v25 = vmul.f32 %v2076_v58, %v7073_v1 }
 0x419   :  { %v2071_v60 = vpop.permute.xlu1 %2070 }
 0x41a   :  { %v2145_v34 = vmul.f32 %v2071_v60, %v7096_v15  ;;  %v2146_v17 = vmul.f32 %v2071_v60, %v7098_v7 }
 0x41c   :  { %v2273_v59 = vadd.f32 %v2199_v48, %v2145_v34  ;;  %v2274_v20 = vadd.f32 %v2199_v48, %v2146_v17 }
 0x41d   :  { %v2091_v31 = vpop.permute.xlu0 %2090  ;;  %v2081_v38 = vpop.permute.xlu1 %2080 }
 0x41e   :  { %v2305_v46 = vmax.f32 %v2273_v59, 0.0  ;;  %v2306_v43 = vmax.f32 %v2274_v20, 0.0  ;;  %v2149_v15 = vmul.f32 %v2081_v38, %v7092_v10  ;;  %v2150_v7 = vmul.f32 %v2081_v38, %v7076_v29 }
 0x41f   :  { %v2153_v1 = vmul.f32 %v2091_v31, %v7115_v50  ;;  %v2154_v58 = vmul.f32 %v2091_v31, %v7102_v18 }
 0x420   :  { %v2335_v57 = vpack.c.bf16 %v2305_v46, %v2303_v13  ;;  %v2336_v5 = vpack.c.bf16 %v2306_v43, %v2304_v21 }
 0x421   :  { %v2219_v51 = vpop.permute.xlu0 %2218  ;;  %v2204_v54 = vpop.permute.xlu1 %2203 }
 0x422   :  { %4371 = vmatprep.mubr.msk.bf16.mxu1 %vm1774_vm0, %v2336_v5  ;;  %v2275_v16 = vadd.f32 %v2204_v54, %v2147_v8  ;;  %v2276_v28 = vadd.f32 %v2204_v54, %v2148_v25  ;;  %v2281_v41 = vadd.f32 %v2219_v51, %v2153_v1  ;;  %v2282_v29 = vadd.f32 %v2219_v51, %v2154_v58 }
 0x423   :  { %2565 = vmatmul.mubr.bf16.vlgmr.msra.gmra.mrb[28].mxu1 %v2335_v57 }
 0x424   :  { %v2307_v22 = vmax.f32 %v2275_v16, 0.0  ;;  %v2308_v44 = vmax.f32 %v2276_v28, 0.0  ;;  %v2313_v20 = vmax.f32 %v2281_v41, 0.0  ;;  %v2314_v38 = vmax.f32 %v2282_v29, 0.0 }
 0x425   :  { %v2101_v52 = vpop.permute.xlu0 %2100  ;;  %v2209_v33 = vpop.permute.xlu1 %2208 }
 0x426   :  { %v2277_v2 = vadd.f32 %v2209_v33, %v2149_v15  ;;  %v2278_v11 = vadd.f32 %v2209_v33, %v2150_v7  ;;  %v2157_v21 = vmul.f32 %v2101_v52, %v7146_v56  ;;  %v2158_v46 = vmul.f32 %v2101_v52, %v7127_v3 }
 0x428   :  { %v2309_v6 = vmax.f32 %v2277_v2, 0.0  ;;  %v2310_v48 = vmax.f32 %v2278_v11, 0.0 }
 0x429   :  { %v2229_v9 = vpop.permute.xlu0 %2228  ;;  %v2086_v49 = vpop.permute.xlu1 %2085 }
 0x42a   :  { %v2338_v62 = vpack.c.bf16 %v2310_v48, %v2308_v44  ;;  %v2337_v10 = vpack.c.bf16 %v2309_v6, %v2307_v22  ;;  %v2151_v60 = vmul.f32 %v2086_v49, %v7118_v53  ;;  %v2152_v30 = vmul.f32 %v2086_v49, %v7121_v55 }
 0x42b   :  { %v2285_v55 = vadd.f32 %v2229_v9, %v2157_v21  ;;  %v2286_v57 = vadd.f32 %v2229_v9, %v2158_v46 }
 0x42c   :  { %4372 = vmatprep.mubr.msk.bf16.mxu1 %vm1774_vm0, %v2338_v62 }
 0x42d   :  { %v2111_v32 = vpop.permute.xlu0 %2110  ;;  %v2214_v34 = vpop.permute.xlu1 %2213  ;;  %2575 = vmatmul.mubr.bf16.gmra.mrb[32].mxu1 %v2337_v10  ;;  %v2317_v7 = vmax.f32 %v2285_v55, 0.0  ;;  %v2318_v16 = vmax.f32 %v2286_v57, 0.0 }
 0x42e   :  { %v2279_v17 = vadd.f32 %v2214_v34, %v2151_v60  ;;  %v2280_v59 = vadd.f32 %v2214_v34, %v2152_v30  ;;  %v2161_v33 = vmul.f32 %v2111_v32, %v7156_v47  ;;  %v2162_v2 = vmul.f32 %v2111_v32, %v7134_v4 }
 0x430   :  { %v2311_v50 = vmax.f32 %v2279_v17, 0.0  ;;  %v2312_v13 = vmax.f32 %v2280_v59, 0.0 }
 0x431   :  { %v2239_v18 = vpop.permute.xlu0 %2238  ;;  %v2096_v31 = vpop.permute.xlu1 %2095 }
 0x432   :  { %v2340_v53 = vpack.c.bf16 %v2314_v38, %v2312_v13  ;;  %v2339_v43 = vpack.c.bf16 %v2313_v20, %v2311_v50  ;;  %v2155_v51 = vmul.f32 %v2096_v31, %v7137_v42  ;;  %v2156_v5 = vmul.f32 %v2096_v31, %v7140_v14 }
 0x433   :  { %v2289_v14 = vadd.f32 %v2239_v18, %v2161_v33  ;;  %v2290_v22 = vadd.f32 %v2239_v18, %v2162_v2 }
 0x434   :  { %4373 = vmatprep.mubr.msk.bf16.mxu1 %vm1774_vm0, %v2340_v53 }
 0x435   :  { %v2121_v54 = vpop.permute.xlu0 %2120  ;;  %v2224_v8 = vpop.permute.xlu1 %2223  ;;  %2585 = vmatmul.mubr.bf16.gmra.mrb[36].mxu1 %v2339_v43  ;;  %v2321_v58 = vmax.f32 %v2289_v14, 0.0  ;;  %v2322_v62 = vmax.f32 %v2290_v22, 0.0 }
 0x436   :  { %v2283_v25 = vadd.f32 %v2224_v8, %v2155_v51  ;;  %v2284_v15 = vadd.f32 %v2224_v8, %v2156_v5  ;;  %v2165_v41 = vmul.f32 %v2121_v54, %v7181_v0  ;;  %v2166_v29 = vmul.f32 %v2121_v54, %v7168_v45 }
 0x438   :  { %v2315_v56 = vmax.f32 %v2283_v25, 0.0  ;;  %v2316_v28 = vmax.f32 %v2284_v15, 0.0 }
 0x439   :  { %v2106_v3 = vpop.permute.xlu1 %2105  ;;  %v2249_v52 = vpop.permute.xlu0 %2248 }
 0x43a   :  { %v2342_v42 = vpack.c.bf16 %v2318_v16, %v2316_v28  ;;  %v2341_v11 = vpack.c.bf16 %v2317_v7, %v2315_v56  ;;  %v2159_v44 = vmul.f32 %v2106_v3, %v7161_v23  ;;  %v2160_v6 = vmul.f32 %v2106_v3, %v7164_v61 }
 0x43b   :  { %v2293_v30 = vadd.f32 %v2249_v52, %v2165_v41  ;;  %v2294_v61 = vadd.f32 %v2249_v52, %v2166_v29 }
 0x43c   :  { %4374 = vmatprep.mubr.msk.bf16.mxu1 %vm1774_vm0, %v2342_v42 }
 0x43d   :  { %v2234_v48 = vpop.permute.xlu1 %2233  ;;  %2595 = vmatmul.mubr.bf16.gmra.mrb[40].mxu1 %v2341_v11  ;;  %v2131_v1 = vpop.permute.xlu0 %2130  ;;  %v2325_v50 = vmax.f32 %v2293_v30, 0.0  ;;  %v2326_v13 = vmax.f32 %v2294_v61, 0.0 }
 0x43e   :  { %v2287_v9 = vadd.f32 %v2234_v48, %v2159_v44  ;;  %v2288_v49 = vadd.f32 %v2234_v48, %v2160_v6  ;;  %v2169_v31 = vmul.f32 %v2131_v1, %v7209_v40  ;;  %v2170_v21 = vmul.f32 %v2131_v1, %v7191_v35 }
 0x440   :  { %v2319_v47 = vmax.f32 %v2287_v9, 0.0  ;;  %v2320_v10 = vmax.f32 %v2288_v49, 0.0 }
 0x441   :  { %v2116_v4 = vpop.permute.xlu1 %2115  ;;  %v2259_v17 = vpop.permute.xlu0 %2258 }
 0x442   :  { %v2344_v60 = vpack.c.bf16 %v2322_v62, %v2320_v10  ;;  %v2343_v23 = vpack.c.bf16 %v2321_v58, %v2319_v47  ;;  %v2163_v32 = vmul.f32 %v2116_v4, %v7184_v27  ;;  %v2164_v34 = vmul.f32 %v2116_v4, %v7187_v37 }
 0x443   :  { %v2297_v37 = vadd.f32 %v2259_v17, %v2169_v31  ;;  %v2298_v43 = vadd.f32 %v2259_v17, %v2170_v21 }
 0x444   :  { %4375 = vmatprep.mubr.msk.bf16.mxu1 %vm1774_vm0, %v2344_v60 }
 0x445   :  { %v2244_v59 = vpop.permute.xlu1 %2243  ;;  %2605 = vmatmul.mubr.bf16.gmra.mrb[44].mxu1 %v2343_v23  ;;  %v2141_v53 = vpop.permute.xlu0 %2140  ;;  %v2329_v8 = vmax.f32 %v2297_v37, 0.0  ;;  %v2330_v25 = vmax.f32 %v2298_v43, 0.0 }
 0x446   :  { %v2291_v20 = vadd.f32 %v2244_v59, %v2163_v32  ;;  %v2292_v38 = vadd.f32 %v2244_v59, %v2164_v34  ;;  %v2173_v16 = vmul.f32 %v2141_v53, %v7229_v36  ;;  %v2174_v56 = vmul.f32 %v2141_v53, %v7215_v63 }
 0x448   :  { %v2323_v0 = vmax.f32 %v2291_v20, 0.0  ;;  %v2324_v18 = vmax.f32 %v2292_v38, 0.0 }
 0x449   :  { %v2126_v45 = vpop.permute.xlu1 %2125  ;;  %v2269_v35 = vpop.permute.xlu0 %2268 }
 0x44a   :  { %v2346_v46 = vpack.c.bf16 %v2326_v13, %v2324_v18  ;;  %v2345_v27 = vpack.c.bf16 %v2325_v50, %v2323_v0  ;;  %v2167_v55 = vmul.f32 %v2126_v45, %v7200_v26  ;;  %v2168_v57 = vmul.f32 %v2126_v45, %v7203_v19 }
 0x44b   :  { %v2301_v3 = vadd.f32 %v2269_v35, %v2173_v16  ;;  %v2302_v19 = vadd.f32 %v2269_v35, %v2174_v56 }
 0x44c   :  { %4376 = vmatprep.mubr.msk.bf16.mxu1 %vm1774_vm0, %v2346_v46 }
 0x44d   :  { %v2254_v51 = vpop.permute.xlu1 %2253  ;;  %2615 = vmatmul.mubr.bf16.gmra.mrb[48].mxu1 %v2345_v27  ;;  %v2333_v14 = vmax.f32 %v2301_v3, 0.0  ;;  %v2334_v22 = vmax.f32 %v2302_v19, 0.0 }
 0x44e   :  { %v2295_v5 = vadd.f32 %v2254_v51, %v2167_v55  ;;  %v2296_v54 = vadd.f32 %v2254_v51, %v2168_v57 }
 0x450   :  { %v2327_v40 = vmax.f32 %v2295_v5, 0.0  ;;  %v2328_v15 = vmax.f32 %v2296_v54, 0.0 }
 0x451   :  { %v2136_v7 = vpop.permute.xlu1 %2135 }
 0x452   :  { %v2348_v28 = vpack.c.bf16 %v2330_v25, %v2328_v15  ;;  %v2347_v26 = vpack.c.bf16 %v2329_v8, %v2327_v40  ;;  %v2171_v52 = vmul.f32 %v2136_v7, %v7222_v24  ;;  %v2172_v33 = vmul.f32 %v2136_v7, %v7225_v39 }
 0x454   :  { %4377 = vmatprep.mubr.msk.bf16.mxu1 %vm1774_vm0, %v2348_v28 }
 0x455   :  { %v2264_v2 = vpop.permute.xlu1 %2263  ;;  %2625 = vmatmul.mubr.bf16.gmra.mrb[52].mxu1 %v2347_v26 }
 0x456   :  { %v2299_v42 = vadd.f32 %v2264_v2, %v2171_v52  ;;  %v2300_v11 = vadd.f32 %v2264_v2, %v2172_v33 }
 0x458   :  { %v2331_v44 = vmax.f32 %v2299_v42, 0.0  ;;  %v2332_v36 = vmax.f32 %v2300_v11, 0.0  ;;  %v2709_v42 = vlaneseq }
 0x45a   :  { %v2350_v6 = vpack.c.bf16 %v2334_v22, %v2332_v36  ;;  %v2349_v63 = vpack.c.bf16 %v2333_v14, %v2331_v44 }
 0x45c   :  { %4378 = vmatprep.mubr.msk.bf16.mxu1 %vm1774_vm0, %v2350_v6 }
 0x45d   :  { %2635 = vmatmul.mubr.bf16.gmra.mrb[56].mxu1 %v2349_v63  ;;  %v7684_v63 = vand.u32 127, %v2709_v42 }
 0x45e   :  { %2925 = vmatprep.mubr.bf16.mxu1 %v8744_v12 }
 0x45f   :  { %vm2828_vm2 = vcmp.lt.s32.totalorder %v7684_v63, 16  ;;  %vm2711_vm3 = vcmp.lt.s32.totalorder %v7684_v63, 17  ;;  %vm3075_vm4 = vcmp.lt.s32.totalorder %v7684_v63, 15  ;;  %vm3265_vm5 = vcmp.lt.s32.totalorder %v7684_v63, 1 }
 0x460   :  { %vm3548_vm6 = vcmp.lt.s32.totalorder %v7684_v63, 127  ;;  %vm3738_vm7 = vcmp.lt.s32.totalorder %v7684_v63, 113  ;;  %vm3928_vm8 = vcmp.lt.s32.totalorder %v7684_v63, 112  ;;  %vm4118_vm9 = vcmp.lt.s32.totalorder %v7684_v63, 111 }
 0x4f6   :  { %v7456_v24 = vpop.f32.mrb[28].mxu1 }
 0x4f7   :  { %v7458_v39 = vpop.f32.mrb[29].mxu1 }
 0x4f8   :  { %v7460_v48 = vpop.f32.mrb[30].mxu1 }
 0x4f9   :  { %v7462_v9 = vpop.f32.mrb[31].mxu1  ;;  %v7466_v49 = vpack.i.bf16 %v7460_v48, %v7456_v24 }
 0x4fa   :  { %v7470_v1 = vpack.i.bf16 %v7462_v9, %v7458_v39 }
 0x4fb   :  { %4649 = vrot.lane.b32.xlu1 %v7466_v49, %s5505_s4 }
 0x4fc   :  { %4654 = vrot.lane.b32.xlu0 %v7470_v1, %s5505_s4 }
 0x500   :  { %v7480_v47 = vpop.f32.mrb[32].mxu1 }
 0x501   :  { %v7482_v10 = vpop.f32.mrb[33].mxu1 }
 0x502   :  { %v7484_v4 = vpop.f32.mrb[34].mxu1 }
 0x503   :  { %v7486_v41 = vpop.f32.mrb[35].mxu1  ;;  %v7490_v29 = vpack.i.bf16 %v7484_v4, %v7480_v47 }
 0x504   :  { %v7494_v60 = vpack.i.bf16 %v7486_v41, %v7482_v10 }
 0x505   :  { %4659 = vrot.lane.b32.xlu1 %v7490_v29, %s5505_s4 }
 0x506   :  { %4664 = vrot.lane.b32.xlu0 %v7494_v60, %s5505_s4 }
 0x508   :  { %v7504_v61 = vpop.f32.mrb[36].mxu1 }
 0x509   :  { %v7506_v32 = vpop.f32.mrb[37].mxu1 }
 0x50a   :  { %v7508_v34 = vpop.f32.mrb[38].mxu1 }
 0x50b   :  { %v7510_v17 = vpop.f32.mrb[39].mxu1  ;;  %v7514_v59 = vpack.i.bf16 %v7508_v34, %v7504_v61 }
 0x50c   :  { %v7518_v20 = vpack.i.bf16 %v7510_v17, %v7506_v32 }
 0x50d   :  { %4669 = vrot.lane.b32.xlu1 %v7514_v59, %s5505_s4 }
 0x50e   :  { %4674 = vrot.lane.b32.xlu0 %v7518_v20, %s5505_s4 }
 0x510   :  { %v7528_v13 = vpop.f32.mrb[40].mxu1 }
 0x511   :  { %v7530_v0 = vpop.f32.mrb[41].mxu1 }
 0x512   :  { %v7532_v18 = vpop.f32.mrb[42].mxu1 }
 0x513   :  { %v7534_v45 = vpop.f32.mrb[43].mxu1  ;;  %v7538_v31 = vpack.i.bf16 %v7532_v18, %v7528_v13 }
 0x514   :  { %v7542_v21 = vpack.i.bf16 %v7534_v45, %v7530_v0 }
 0x515   :  { %4679 = vrot.lane.b32.xlu1 %v7538_v31, %s5505_s4 }
 0x516   :  { %4684 = vrot.lane.b32.xlu0 %v7542_v21, %s5505_s4 }
 0x518   :  { %v7552_v53 = vpop.f32.mrb[44].mxu1 }
 0x519   :  { %v7554_v37 = vpop.f32.mrb[45].mxu1 }
 0x51a   :  { %v7556_v43 = vpop.f32.mrb[46].mxu1 }
 0x51b   :  { %v7558_v55 = vpop.f32.mrb[47].mxu1  ;;  %v7562_v57 = vpack.i.bf16 %v7556_v43, %v7552_v53 }
 0x51c   :  { %v7566_v51 = vpack.i.bf16 %v7558_v55, %v7554_v37 }
 0x51d   :  { %4689 = vrot.lane.b32.xlu1 %v7562_v57, %s5505_s4 }
 0x51e   :  { %4694 = vrot.lane.b32.xlu0 %v7566_v51, %s5505_s4 }
 0x520   :  { %v7576_v8 = vpop.f32.mrb[48].mxu1 }
 0x521   :  { %v7578_v25 = vpop.f32.mrb[49].mxu1 }
 0x522   :  { %v7580_v40 = vpop.f32.mrb[50].mxu1 }
 0x523   :  { %v7582_v15 = vpop.f32.mrb[51].mxu1  ;;  %v7586_v35 = vpack.i.bf16 %v7580_v40, %v7576_v8 }
 0x524   :  { %v7590_v7 = vpack.i.bf16 %v7582_v15, %v7578_v25 }
 0x525   :  { %4699 = vrot.lane.b32.xlu1 %v7586_v35, %s5505_s4 }
 0x526   :  { %4704 = vrot.lane.b32.xlu0 %v7590_v7, %s5505_s4 }
 0x528   :  { %v7600_v28 = vpop.f32.mrb[52].mxu1 }
 0x529   :  { %v7602_v26 = vpop.f32.mrb[53].mxu1 }
 0x52a   :  { %v7604_v3 = vpop.f32.mrb[54].mxu1 }
 0x52b   :  { %v7606_v19 = vpop.f32.mrb[55].mxu1  ;;  %v7610_v52 = vpack.i.bf16 %v7604_v3, %v7600_v28 }
 0x52c   :  { %v7614_v33 = vpack.i.bf16 %v7606_v19, %v7602_v26 }
 0x52d   :  { %4709 = vrot.lane.b32.xlu1 %v7610_v52, %s5505_s4 }
 0x52e   :  { %4714 = vrot.lane.b32.xlu0 %v7614_v33, %s5505_s4 }
 0x530   :  { %v7624_v11 = vpop.f32.mrb[56].mxu1 }
 0x531   :  { %8750 = vst [vmem:[#allocation2_spill] sm:$0xff] %v7624_v11  ;;  %v7626_v14 = vpop.f32.mrb[57].mxu1 }
 0x532   :  { %8751 = vst [vmem:[#allocation3_spill] sm:$0xff] %v7626_v14  ;;  %v7628_v22 = vpop.f32.mrb[58].mxu1 }
 0x533   :  { %8752 = vst [vmem:[#allocation4_spill] sm:$0xff] %v7628_v22  ;;  %v7630_v44 = vpop.f32.mrb[59].mxu1  ;;  %v7634_v36 = vpack.i.bf16 %v7628_v22, %v7624_v11 }
 0x534   :  { %8753 = vst [vmem:[#allocation5_spill] sm:$0xff] %v7630_v44  ;;  %v7638_v6 = vpack.i.bf16 %v7630_v44, %v7626_v14 }
 0x535   :  { %4719 = vrot.lane.b32.xlu1 %v7634_v36, %s5505_s4 }
 0x536   :  { %4729 = vrot.lane.b32.xlu0 %v7638_v6, %s5505_s4 }
 0x539   :  { %4724 = vrot.lane.b32.xlu1 %v7466_v49, %s5506_s5 }
 0x53a   :  { %4734 = vrot.lane.b32.xlu0 %v7470_v1, %s5506_s5 }
 0x53d   :  { %4739 = vrot.lane.b32.xlu1 %v7490_v29, %s5506_s5 }
 0x53e   :  { %4744 = vrot.lane.b32.xlu0 %v7494_v60, %s5506_s5 }
 0x541   :  { %4749 = vrot.lane.b32.xlu1 %v7514_v59, %s5506_s5 }
 0x542   :  { %4754 = vrot.lane.b32.xlu0 %v7518_v20, %s5506_s5 }
 0x545   :  { %4759 = vrot.lane.b32.xlu1 %v7538_v31, %s5506_s5 }
 0x546   :  { %4764 = vrot.lane.b32.xlu0 %v7542_v21, %s5506_s5 }
 0x549   :  { %4769 = vrot.lane.b32.xlu1 %v7562_v57, %s5506_s5 }
 0x54a   :  { %4774 = vrot.lane.b32.xlu0 %v7566_v51, %s5506_s5 }
 0x54d   :  { %4779 = vrot.lane.b32.xlu1 %v7586_v35, %s5506_s5 }
 0x54e   :  { %4784 = vrot.lane.b32.xlu0 %v7590_v7, %s5506_s5 }
 0x551   :  { %4789 = vrot.lane.b32.xlu1 %v7610_v52, %s5506_s5 }
 0x552   :  { %4794 = vrot.lane.b32.xlu0 %v7614_v33, %s5506_s5 }
 0x555   :  { %4799 = vrot.lane.b32.xlu1 %v7634_v36, %s5506_s5 }
 0x556   :  { %4809 = vrot.lane.b32.xlu0 %v7638_v6, %s5506_s5 }
 0x559   :  { %4804 = vrot.lane.b32.xlu1 %v7466_v49, %s5507_s18 }
 0x55a   :  { %4814 = vrot.lane.b32.xlu0 %v7470_v1, %s5507_s18 }
 0x55d   :  { %4819 = vrot.lane.b32.xlu1 %v7490_v29, %s5507_s18 }
 0x55e   :  { %4824 = vrot.lane.b32.xlu0 %v7494_v60, %s5507_s18 }
 0x561   :  { %4829 = vrot.lane.b32.xlu1 %v7514_v59, %s5507_s18 }
 0x562   :  { %4834 = vrot.lane.b32.xlu0 %v7518_v20, %s5507_s18 }
 0x565   :  { %4839 = vrot.lane.b32.xlu1 %v7538_v31, %s5507_s18 }
 0x566   :  { %4844 = vrot.lane.b32.xlu0 %v7542_v21, %s5507_s18 }
 0x569   :  { %4849 = vrot.lane.b32.xlu1 %v7562_v57, %s5507_s18 }
 0x56a   :  { %4854 = vrot.lane.b32.xlu0 %v7566_v51, %s5507_s18 }
 0x56d   :  { %v4650_v2 = vpop.permute.xlu1 %4649  ;;  %4859 = vrot.lane.b32.xlu1 %v7586_v35, %s5507_s18 }
 0x56e   :  { %v4652_v56 = vunpack.i.h.bf16 %v4650_v2  ;;  %v4651_v16 = vunpack.i.l.bf16 %v4650_v2  ;;  %4864 = vrot.lane.b32.xlu0 %v7590_v7, %s5507_s18  ;;  %v4655_v54 = vpop.permute.xlu0 %4654 }
 0x56f   :  { %v4657_v5 = vunpack.i.h.bf16 %v4655_v54  ;;  %v4656_v27 = vunpack.i.l.bf16 %v4655_v54 }
 0x571   :  { %v2846_v46 = vsel %vm2828_vm2, %v4657_v5, %v4652_v56  ;;  %v2845_v42 = vsel %vm2828_vm2, %v4656_v27, %v4651_v16  ;;  %4869 = vrot.lane.b32.xlu1 %v7610_v52, %s5507_s18  ;;  %v2829_v2 = vsel %vm2828_vm2, %v4651_v16, %v4656_v27  ;;  %v2830_v50 = vsel %vm2828_vm2, %v4652_v56, %v4657_v5 }
 0x572   :  { %4874 = vrot.lane.b32.xlu0 %v7614_v33, %s5507_s18  ;;  %v2866_v38 = vpack.c.bf16 %v2830_v50, %v2829_v2  ;;  %v2865_v54 = vpack.c.bf16 %v2846_v46, %v2845_v42 }
 0x574   :  { %2893 = vmatprep.subr.bf16.mxu1 %v2866_v38 }
 0x575   :  { %4879 = vrot.lane.b32.xlu1 %v7634_v36, %s5507_s18  ;;  %2894 = vmatpush1.bf16.msra.mxu1 %v2865_v54 }
 0x576   :  { %4889 = vrot.lane.b32.xlu0 %v7638_v6, %s5507_s18 }
 0x577   :  { %v4660_v30 = vpop.permute.xlu1 %4659 }
 0x578   :  { %v4662_v23 = vunpack.i.h.bf16 %v4660_v30  ;;  %v4661_v62 = vunpack.i.l.bf16 %v4660_v30  ;;  %v4665_v27 = vpop.permute.xlu0 %4664 }
 0x579   :  { %v4667_v16 = vunpack.i.h.bf16 %v4665_v27  ;;  %v4666_v58 = vunpack.i.l.bf16 %v4665_v27  ;;  %4884 = vrot.lane.b32.xlu1 %v7466_v49, %s5508_s19 }
 0x57a   :  { %4894 = vrot.lane.b32.xlu0 %v7470_v1, %s5508_s19 }
 0x57b   :  { %v2848_v38 = vsel %vm2828_vm2, %v4667_v16, %v4662_v23  ;;  %v2847_v50 = vsel %vm2828_vm2, %v4666_v58, %v4661_v62  ;;  %v2831_v46 = vsel %vm2828_vm2, %v4661_v62, %v4666_v58  ;;  %v2832_v30 = vsel %vm2828_vm2, %v4662_v23, %v4667_v16 }
 0x57c   :  { %v2868_v5 = vpack.c.bf16 %v2832_v30, %v2831_v46  ;;  %v2867_v56 = vpack.c.bf16 %v2848_v38, %v2847_v50 }
 0x57d   :  { %4899 = vrot.lane.b32.xlu1 %v7490_v29, %s5508_s19 }
 0x57e   :  { %4904 = vrot.lane.b32.xlu0 %v7494_v60, %s5508_s19  ;;  %2895 = vmatprep.subr.bf16.mxu1 %v2868_v5 }
 0x57f   :  { %v4670_v42 = vpop.permute.xlu1 %4669  ;;  %2896 = vmatpush1.bf16.msra.mxu1 %v2867_v56 }
 0x580   :  { %v4672_v2 = vunpack.i.h.bf16 %v4670_v42  ;;  %v4671_v54 = vunpack.i.l.bf16 %v4670_v42  ;;  %v4675_v27 = vpop.permute.xlu0 %4674 }
 0x581   :  { %v4677_v12 = vunpack.i.h.bf16 %v4675_v27  ;;  %v4676_v11 = vunpack.i.l.bf16 %v4675_v27  ;;  %4909 = vrot.lane.b32.xlu1 %v7514_v59, %s5508_s19 }
 0x582   :  { %4914 = vrot.lane.b32.xlu0 %v7518_v20, %s5508_s19 }
 0x583   :  { %v2850_v58 = vsel %vm2828_vm2, %v4677_v12, %v4672_v2  ;;  %v2849_v62 = vsel %vm2828_vm2, %v4676_v11, %v4671_v54  ;;  %v2833_v23 = vsel %vm2828_vm2, %v4671_v54, %v4676_v11  ;;  %v2834_v16 = vsel %vm2828_vm2, %v4672_v2, %v4677_v12 }
 0x584   :  { %v2870_v38 = vpack.c.bf16 %v2834_v16, %v2833_v23  ;;  %v2869_v50 = vpack.c.bf16 %v2850_v58, %v2849_v62 }
 0x585   :  { %4919 = vrot.lane.b32.xlu1 %v7538_v31, %s5508_s19 }
 0x586   :  { %4924 = vrot.lane.b32.xlu0 %v7542_v21, %s5508_s19  ;;  %2897 = vmatprep.subr.bf16.mxu1 %v2870_v38 }
 0x587   :  { %v4680_v46 = vpop.permute.xlu1 %4679  ;;  %2898 = vmatpush1.bf16.msra.mxu1 %v2869_v50 }
 0x588   :  { %v4682_v30 = vunpack.i.h.bf16 %v4680_v46  ;;  %v4681_v5 = vunpack.i.l.bf16 %v4680_v46  ;;  %v4685_v56 = vpop.permute.xlu0 %4684 }
 0x589   :  { %v4687_v42 = vunpack.i.h.bf16 %v4685_v56  ;;  %v4686_v27 = vunpack.i.l.bf16 %v4685_v56  ;;  %4929 = vrot.lane.b32.xlu1 %v7562_v57, %s5508_s19 }
 0x58a   :  { %4934 = vrot.lane.b32.xlu0 %v7566_v51, %s5508_s19 }
 0x58b   :  { %v2852_v12 = vsel %vm2828_vm2, %v4687_v42, %v4682_v30  ;;  %v2851_v11 = vsel %vm2828_vm2, %v4686_v27, %v4681_v5  ;;  %v2835_v2 = vsel %vm2828_vm2, %v4681_v5, %v4686_v27  ;;  %v2836_v54 = vsel %vm2828_vm2, %v4682_v30, %v4687_v42 }
 0x58c   :  { %v2872_v58 = vpack.c.bf16 %v2836_v54, %v2835_v2  ;;  %v2871_v62 = vpack.c.bf16 %v2852_v12, %v2851_v11 }
 0x58d   :  { %4939 = vrot.lane.b32.xlu1 %v7586_v35, %s5508_s19 }
 0x58e   :  { %4944 = vrot.lane.b32.xlu0 %v7590_v7, %s5508_s19  ;;  %2899 = vmatprep.subr.bf16.mxu1 %v2872_v58 }
 0x58f   :  { %v4690_v23 = vpop.permute.xlu1 %4689  ;;  %2900 = vmatpush1.bf16.msra.mxu1 %v2871_v62 }
 0x590   :  { %v4692_v16 = vunpack.i.h.bf16 %v4690_v23  ;;  %v4691_v38 = vunpack.i.l.bf16 %v4690_v23  ;;  %v4695_v50 = vpop.permute.xlu0 %4694 }
 0x591   :  { %v4697_v46 = vunpack.i.h.bf16 %v4695_v50  ;;  %v4696_v56 = vunpack.i.l.bf16 %v4695_v50  ;;  %4949 = vrot.lane.b32.xlu1 %v7610_v52, %s5508_s19 }
 0x592   :  { %4954 = vrot.lane.b32.xlu0 %v7614_v33, %s5508_s19 }
 0x593   :  { %v2854_v30 = vsel %vm2828_vm2, %v4697_v46, %v4692_v16  ;;  %v2853_v5 = vsel %vm2828_vm2, %v4696_v56, %v4691_v38  ;;  %v2837_v42 = vsel %vm2828_vm2, %v4691_v38, %v4696_v56  ;;  %v2838_v27 = vsel %vm2828_vm2, %v4692_v16, %v4697_v46 }
 0x594   :  { %v2874_v12 = vpack.c.bf16 %v2838_v27, %v2837_v42  ;;  %v2873_v11 = vpack.c.bf16 %v2854_v30, %v2853_v5 }
 0x595   :  { %4959 = vrot.lane.b32.xlu1 %v7634_v36, %s5508_s19 }
 0x596   :  { %4964 = vrot.lane.b32.xlu0 %v7638_v6, %s5508_s19  ;;  %2901 = vmatprep.subr.bf16.mxu1 %v2874_v12 }
 0x597   :  { %v4700_v2 = vpop.permute.xlu1 %4699  ;;  %2902 = vmatpush1.bf16.msra.mxu1 %v2873_v11 }
 0x598   :  { %v4702_v54 = vunpack.i.h.bf16 %v4700_v2  ;;  %v4701_v58 = vunpack.i.l.bf16 %v4700_v2  ;;  %v4705_v62 = vpop.permute.xlu0 %4704 }
 0x599   :  { %v4707_v23 = vunpack.i.h.bf16 %v4705_v62  ;;  %v4706_v50 = vunpack.i.l.bf16 %v4705_v62  ;;  %4969 = vrot.lane.b32.xlu1 %v7466_v49, %s5509_s20 }
 0x59a   :  { %4974 = vrot.lane.b32.xlu0 %v7470_v1, %s5509_s20 }
 0x59b   :  { %v2856_v16 = vsel %vm2828_vm2, %v4707_v23, %v4702_v54  ;;  %v2855_v38 = vsel %vm2828_vm2, %v4706_v50, %v4701_v58  ;;  %v2839_v46 = vsel %vm2828_vm2, %v4701_v58, %v4706_v50  ;;  %v2840_v56 = vsel %vm2828_vm2, %v4702_v54, %v4707_v23 }
 0x59c   :  { %v2876_v30 = vpack.c.bf16 %v2840_v56, %v2839_v46  ;;  %v2875_v5 = vpack.c.bf16 %v2856_v16, %v2855_v38 }
 0x59d   :  { %4979 = vrot.lane.b32.xlu1 %v7490_v29, %s5509_s20 }
 0x59e   :  { %4984 = vrot.lane.b32.xlu0 %v7494_v60, %s5509_s20  ;;  %2903 = vmatprep.subr.bf16.mxu1 %v2876_v30 }
 0x59f   :  { %v4710_v42 = vpop.permute.xlu1 %4709  ;;  %2904 = vmatpush1.bf16.msra.mxu1 %v2875_v5 }
 0x5a0   :  { %v4712_v27 = vunpack.i.h.bf16 %v4710_v42  ;;  %v4711_v12 = vunpack.i.l.bf16 %v4710_v42  ;;  %v4715_v11 = vpop.permute.xlu0 %4714 }
 0x5a1   :  { %v4717_v2 = vunpack.i.h.bf16 %v4715_v11  ;;  %v4716_v62 = vunpack.i.l.bf16 %v4715_v11  ;;  %4989 = vrot.lane.b32.xlu1 %v7514_v59, %s5509_s20 }
 0x5a2   :  { %4994 = vrot.lane.b32.xlu0 %v7518_v20, %s5509_s20 }
 0x5a3   :  { %v2858_v54 = vsel %vm2828_vm2, %v4717_v2, %v4712_v27  ;;  %v2857_v58 = vsel %vm2828_vm2, %v4716_v62, %v4711_v12  ;;  %v2841_v23 = vsel %vm2828_vm2, %v4711_v12, %v4716_v62  ;;  %v2842_v50 = vsel %vm2828_vm2, %v4712_v27, %v4717_v2 }
 0x5a4   :  { %v2878_v16 = vpack.c.bf16 %v2842_v50, %v2841_v23  ;;  %v2877_v38 = vpack.c.bf16 %v2858_v54, %v2857_v58 }
 0x5a5   :  { %4999 = vrot.lane.b32.xlu1 %v7538_v31, %s5509_s20 }
 0x5a6   :  { %5004 = vrot.lane.b32.xlu0 %v7542_v21, %s5509_s20  ;;  %2905 = vmatprep.subr.bf16.mxu1 %v2878_v16 }
 0x5a7   :  { %v4720_v46 = vpop.permute.xlu1 %4719  ;;  %2906 = vmatpush1.bf16.msra.mxu1 %v2877_v38 }
 0x5a8   :  { %v4722_v56 = vunpack.i.h.bf16 %v4720_v46  ;;  %v4721_v30 = vunpack.i.l.bf16 %v4720_v46  ;;  %v4730_v5 = vpop.permute.xlu0 %4729 }
 0x5a9   :  { %v4732_v42 = vunpack.i.h.bf16 %v4730_v5  ;;  %v4731_v11 = vunpack.i.l.bf16 %v4730_v5  ;;  %5009 = vrot.lane.b32.xlu1 %v7562_v57, %s5509_s20 }
 0x5aa   :  { %5014 = vrot.lane.b32.xlu0 %v7566_v51, %s5509_s20 }
 0x5ab   :  { %v2860_v27 = vsel %vm2828_vm2, %v4732_v42, %v4722_v56  ;;  %v2859_v12 = vsel %vm2828_vm2, %v4731_v11, %v4721_v30  ;;  %v4725_v2 = vpop.permute.xlu1 %4724  ;;  %v2843_v62 = vsel %vm2828_vm2, %v4721_v30, %v4731_v11  ;;  %v2844_v54 = vsel %vm2828_vm2, %v4722_v56, %v4732_v42 }
 0x5ac   :  { %v4727_v58 = vunpack.i.h.bf16 %v4725_v2  ;;  %v4726_v23 = vunpack.i.l.bf16 %v4725_v2  ;;  %v4735_v50 = vpop.permute.xlu0 %4734  ;;  %v2880_v16 = vpack.c.bf16 %v2844_v54, %v2843_v62  ;;  %v2879_v38 = vpack.c.bf16 %v2860_v27, %v2859_v12  ;;  %v5454_v12 = vld [vmem:[%s8742_s2 + $0x10] sm:$0xff]  }
 0x5ad   :  { %v4737_v46 = vunpack.i.h.bf16 %v4735_v50  ;;  %v4736_v5 = vunpack.i.l.bf16 %v4735_v50  ;;  %5019 = vrot.lane.b32.xlu1 %v7586_v35, %s5509_s20 }
 0x5ae   :  { %5024 = vrot.lane.b32.xlu0 %v7590_v7, %s5509_s20  ;;  %2907 = vmatprep.subr.bf16.mxu1 %v2880_v16 }
 0x5af   :  { %v2729_v30 = vsel %vm2711_vm3, %v4737_v46, %v4727_v58  ;;  %v2728_v56 = vsel %vm2711_vm3, %v4736_v5, %v4726_v23  ;;  %v4740_v42 = vpop.permute.xlu1 %4739  ;;  %2908 = vmatpush1.bf16.msra.mxu1 %v2879_v38  ;;  %v2712_v11 = vsel %vm2711_vm3, %v4726_v23, %v4736_v5  ;;  %v2713_v27 = vsel %vm2711_vm3, %v4727_v58, %v4737_v46 }
 0x5b0   :  { %v4742_v2 = vunpack.i.h.bf16 %v4740_v42  ;;  %v4741_v62 = vunpack.i.l.bf16 %v4740_v42  ;;  %v4745_v54 = vpop.permute.xlu0 %4744  ;;  %v2749_v50 = vpack.c.bf16 %v2713_v27, %v2712_v11  ;;  %v2748_v16 = vpack.c.bf16 %v2729_v30, %v2728_v56 }
 0x5b1   :  { %v4747_v22 = vunpack.i.h.bf16 %v4745_v54  ;;  %v4746_v14 = vunpack.i.l.bf16 %v4745_v54  ;;  %5029 = vrot.lane.b32.xlu1 %v7610_v52, %s5509_s20  ;;  %v8754_v54 = vmov 0  }
 0x5b2   :  { %5034 = vrot.lane.b32.xlu0 %v7614_v33, %s5509_s20  ;;  %2958 = vmatprep.subr.bf16.mxu1 %v2749_v50 }
 0x5b3   :  { %v2731_v58 = vsel %vm2711_vm3, %v4747_v22, %v4742_v2  ;;  %v2730_v23 = vsel %vm2711_vm3, %v4746_v14, %v4741_v62  ;;  %v4750_v38 = vpop.permute.xlu1 %4749  ;;  %2926 = vmatmul.mubr.bf16.vlgmr.msra.gmra.mrb[60].mxu1 %v5454_v12  ;;  %v2714_v46 = vsel %vm2711_vm3, %v4741_v62, %v4746_v14  ;;  %v2715_v5 = vsel %vm2711_vm3, %v4742_v2, %v4747_v22 }
 0x5b4   :  { %v4752_v30 = vunpack.i.h.bf16 %v4750_v38  ;;  %v4751_v56 = vunpack.i.l.bf16 %v4750_v38  ;;  %2959 = vmatpush1.bf16.msra.mxu1 %v2748_v16  ;;  %v4755_v42 = vpop.permute.xlu0 %4754  ;;  %v2751_v11 = vpack.c.bf16 %v2715_v5, %v2714_v46  ;;  %v2750_v27 = vpack.c.bf16 %v2731_v58, %v2730_v23  ;;  %2935 = vmatprep.mubr.bf16.mxu1 %v8754_v54  ;;  %v5455_v16 = vld [vmem:[%s8742_s2 + $0x18] sm:$0xff]  }
 0x5b5   :  { %v4757_v50 = vunpack.i.h.bf16 %v4755_v42  ;;  %v4756_v44 = vunpack.i.l.bf16 %v4755_v42  ;;  %5039 = vrot.lane.b32.xlu1 %v7634_v36, %s5509_s20 }
 0x5b6   :  { %5049 = vrot.lane.b32.xlu0 %v7638_v6, %s5509_s20  ;;  %2960 = vmatprep.subr.bf16.mxu1 %v2751_v11 }
 0x5b7   :  { %v2733_v14 = vsel %vm2711_vm3, %v4757_v50, %v4752_v30  ;;  %v2732_v22 = vsel %vm2711_vm3, %v4756_v44, %v4751_v56  ;;  %v4760_v12 = vpop.permute.xlu1 %4759  ;;  %v2716_v2 = vsel %vm2711_vm3, %v4751_v56, %v4756_v44  ;;  %v2717_v62 = vsel %vm2711_vm3, %v4752_v30, %v4757_v50 }
 0x5b8   :  { %v4762_v58 = vunpack.i.h.bf16 %v4760_v12  ;;  %v4761_v23 = vunpack.i.l.bf16 %v4760_v12  ;;  %2961 = vmatpush1.bf16.msra.mxu1 %v2750_v27  ;;  %v4765_v38 = vpop.permute.xlu0 %4764  ;;  %v2753_v46 = vpack.c.bf16 %v2717_v62, %v2716_v2  ;;  %v2752_v5 = vpack.c.bf16 %v2733_v14, %v2732_v22 }
 0x5b9   :  { %v4767_v42 = vunpack.i.h.bf16 %v4765_v38  ;;  %v4766_v11 = vunpack.i.l.bf16 %v4765_v38  ;;  %5044 = vrot.lane.b32.xlu1 %v7466_v49, %s5510_s25 }
 0x5ba   :  { %5054 = vrot.lane.b32.xlu0 %v7470_v1, %s5510_s25  ;;  %2962 = vmatprep.subr.bf16.mxu1 %v2753_v46 }
 0x5bb   :  { %v2735_v44 = vsel %vm2711_vm3, %v4767_v42, %v4762_v58  ;;  %v2734_v30 = vsel %vm2711_vm3, %v4766_v11, %v4761_v23  ;;  %v4770_v56 = vpop.permute.xlu1 %4769  ;;  %v2718_v27 = vsel %vm2711_vm3, %v4761_v23, %v4766_v11  ;;  %v2719_v50 = vsel %vm2711_vm3, %v4762_v58, %v4767_v42  ;;  %2936 = vmatmul.mubr.bf16.gmra.mrb[64].mxu1 %v5455_v16 }
 0x5bc   :  { %v4772_v14 = vunpack.i.h.bf16 %v4770_v56  ;;  %v4771_v22 = vunpack.i.l.bf16 %v4770_v56  ;;  %2963 = vmatpush1.bf16.msra.mxu1 %v2752_v5  ;;  %v4775_v12 = vpop.permute.xlu0 %4774  ;;  %v2755_v2 = vpack.c.bf16 %v2719_v50, %v2718_v27  ;;  %v2754_v62 = vpack.c.bf16 %v2735_v44, %v2734_v30  ;;  %2990 = vmatprep.mubr.bf16.mxu1 %v8754_v54 }
 0x5bd   :  { %v4777_v38 = vunpack.i.h.bf16 %v4775_v12  ;;  %v4776_v46 = vunpack.i.l.bf16 %v4775_v12  ;;  %5059 = vrot.lane.b32.xlu1 %v7490_v29, %s5510_s25 }
 0x5be   :  { %5064 = vrot.lane.b32.xlu0 %v7494_v60, %s5510_s25  ;;  %2964 = vmatprep.subr.bf16.mxu1 %v2755_v2 }
 0x5bf   :  { %v2737_v16 = vsel %vm2711_vm3, %v4777_v38, %v4772_v14  ;;  %v2736_v58 = vsel %vm2711_vm3, %v4776_v46, %v4771_v22  ;;  %v4780_v23 = vpop.permute.xlu1 %4779  ;;  %v2720_v5 = vsel %vm2711_vm3, %v4771_v22, %v4776_v46  ;;  %v2721_v42 = vsel %vm2711_vm3, %v4772_v14, %v4777_v38 }
 0x5c0   :  { %v4782_v11 = vunpack.i.h.bf16 %v4780_v23  ;;  %v4781_v44 = vunpack.i.l.bf16 %v4780_v23  ;;  %2965 = vmatpush1.bf16.msra.mxu1 %v2754_v62  ;;  %v4785_v30 = vpop.permute.xlu0 %4784  ;;  %v2757_v56 = vpack.c.bf16 %v2721_v42, %v2720_v5  ;;  %v2756_v27 = vpack.c.bf16 %v2737_v16, %v2736_v58 }
 0x5c1   :  { %v4787_v50 = vunpack.i.h.bf16 %v4785_v30  ;;  %v4786_v12 = vunpack.i.l.bf16 %v4785_v30  ;;  %5069 = vrot.lane.b32.xlu1 %v7514_v59, %s5510_s25 }
 0x5c2   :  { %5074 = vrot.lane.b32.xlu0 %v7518_v20, %s5510_s25  ;;  %2966 = vmatprep.subr.bf16.mxu1 %v2757_v56 }
 0x5c3   :  { %v2739_v22 = vsel %vm2711_vm3, %v4787_v50, %v4782_v11  ;;  %v2738_v14 = vsel %vm2711_vm3, %v4786_v12, %v4781_v44  ;;  %v4790_v2 = vpop.permute.xlu1 %4789  ;;  %v2722_v62 = vsel %vm2711_vm3, %v4781_v44, %v4786_v12  ;;  %v2723_v38 = vsel %vm2711_vm3, %v4782_v11, %v4787_v50 }
 0x5c4   :  { %v4792_v46 = vunpack.i.h.bf16 %v4790_v2  ;;  %v4791_v16 = vunpack.i.l.bf16 %v4790_v2  ;;  %2967 = vmatpush1.bf16.msra.mxu1 %v2756_v27  ;;  %v4795_v58 = vpop.permute.xlu0 %4794  ;;  %v2759_v23 = vpack.c.bf16 %v2723_v38, %v2722_v62  ;;  %v2758_v5 = vpack.c.bf16 %v2739_v22, %v2738_v14 }
 0x5c5   :  { %v4797_v42 = vunpack.i.h.bf16 %v4795_v58  ;;  %v4796_v30 = vunpack.i.l.bf16 %v4795_v58  ;;  %5079 = vrot.lane.b32.xlu1 %v7538_v31, %s5510_s25 }
 0x5c6   :  { %5084 = vrot.lane.b32.xlu0 %v7542_v21, %s5510_s25  ;;  %2968 = vmatprep.subr.bf16.mxu1 %v2759_v23 }
 0x5c7   :  { %v2741_v44 = vsel %vm2711_vm3, %v4797_v42, %v4792_v46  ;;  %v2740_v11 = vsel %vm2711_vm3, %v4796_v30, %v4791_v16  ;;  %v4800_v56 = vpop.permute.xlu1 %4799  ;;  %v2724_v27 = vsel %vm2711_vm3, %v4791_v16, %v4796_v30  ;;  %v2725_v50 = vsel %vm2711_vm3, %v4792_v46, %v4797_v42 }
 0x5c8   :  { %v4802_v12 = vunpack.i.h.bf16 %v4800_v56  ;;  %v4801_v22 = vunpack.i.l.bf16 %v4800_v56  ;;  %2969 = vmatpush1.bf16.msra.mxu1 %v2758_v5  ;;  %v4810_v14 = vpop.permute.xlu0 %4809  ;;  %v2761_v2 = vpack.c.bf16 %v2725_v50, %v2724_v27  ;;  %v2760_v62 = vpack.c.bf16 %v2741_v44, %v2740_v11 }
 0x5c9   :  { %v4812_v38 = vunpack.i.h.bf16 %v4810_v14  ;;  %v4811_v58 = vunpack.i.l.bf16 %v4810_v14  ;;  %5089 = vrot.lane.b32.xlu1 %v7562_v57, %s5510_s25 }
 0x5ca   :  { %5094 = vrot.lane.b32.xlu0 %v7566_v51, %s5510_s25  ;;  %2970 = vmatprep.subr.bf16.mxu1 %v2761_v2 }
 0x5cb   :  { %v2743_v46 = vsel %vm2711_vm3, %v4812_v38, %v4802_v12  ;;  %v2742_v16 = vsel %vm2711_vm3, %v4811_v58, %v4801_v22  ;;  %v4805_v23 = vpop.permute.xlu1 %4804  ;;  %v2726_v5 = vsel %vm2711_vm3, %v4801_v22, %v4811_v58  ;;  %v2727_v42 = vsel %vm2711_vm3, %v4802_v12, %v4812_v38  ;;  %v5456_v58 = vld [vmem:[%s8742_s2] sm:$0xff]  }
 0x5cc   :  { %v2762_v30 = vpack.c.bf16 %v2743_v46, %v2742_v16  ;;  %v4807_v44 = vunpack.i.h.bf16 %v4805_v23  ;;  %v4806_v11 = vunpack.i.l.bf16 %v4805_v23  ;;  %2971 = vmatpush1.bf16.msra.mxu1 %v2760_v62  ;;  %v4815_v56 = vpop.permute.xlu0 %4814  ;;  %v2763_v27 = vpack.c.bf16 %v2727_v42, %v2726_v5 }
 0x5cd   :  { %v4817_v50 = vunpack.i.h.bf16 %v4815_v56  ;;  %v4816_v14 = vunpack.i.l.bf16 %v4815_v56  ;;  %5099 = vrot.lane.b32.xlu1 %v7586_v35, %s5510_s25 }
 0x5ce   :  { %5104 = vrot.lane.b32.xlu0 %v7590_v7, %s5510_s25  ;;  %2972 = vmatprep.subr.bf16.mxu1 %v2763_v27 }
 0x5cf   :  { %v3093_v22 = vsel %vm3075_vm4, %v4817_v50, %v4807_v44  ;;  %v3092_v12 = vsel %vm3075_vm4, %v4816_v14, %v4806_v11  ;;  %v4820_v2 = vpop.permute.xlu1 %4819  ;;  %v3076_v62 = vsel %vm3075_vm4, %v4806_v11, %v4816_v14  ;;  %v3077_v38 = vsel %vm3075_vm4, %v4807_v44, %v4817_v50 }
 0x5d0   :  { %v3112_v46 = vpack.c.bf16 %v3093_v22, %v3092_v12  ;;  %v4822_v16 = vunpack.i.h.bf16 %v4820_v2  ;;  %v4821_v23 = vunpack.i.l.bf16 %v4820_v2  ;;  %2973 = vmatpush1.bf16.msra.mxu1 %v2762_v30  ;;  %v4825_v5 = vpop.permute.xlu0 %4824  ;;  %v3113_v42 = vpack.c.bf16 %v3077_v38, %v3076_v62 }
 0x5d1   :  { %v4827_v56 = vunpack.i.h.bf16 %v4825_v5  ;;  %v4826_v27 = vunpack.i.l.bf16 %v4825_v5  ;;  %5109 = vrot.lane.b32.xlu1 %v7610_v52, %s5510_s25 }
 0x5d2   :  { %5114 = vrot.lane.b32.xlu0 %v7614_v33, %s5510_s25  ;;  %3140 = vmatprep.subr.bf16.mxu1 %v3113_v42 }
 0x5d3   :  { %v3095_v44 = vsel %vm3075_vm4, %v4827_v56, %v4822_v16  ;;  %v3094_v11 = vsel %vm3075_vm4, %v4826_v27, %v4821_v23  ;;  %v4830_v50 = vpop.permute.xlu1 %4829  ;;  %2991 = vmatmul.mubr.bf16.vlgmr.msra.gmra.mrb[60].mxu1 %v5456_v58  ;;  %v3078_v30 = vsel %vm3075_vm4, %v4821_v23, %v4826_v27  ;;  %v3079_v14 = vsel %vm3075_vm4, %v4822_v16, %v4827_v56  ;;  %v5457_v27 = vld [vmem:[%s8742_s2 + $0x8] sm:$0xff]  }
 0x5d4   :  { %v3114_v22 = vpack.c.bf16 %v3095_v44, %v3094_v11  ;;  %v4832_v12 = vunpack.i.h.bf16 %v4830_v50  ;;  %v4831_v2 = vunpack.i.l.bf16 %v4830_v50  ;;  %3141 = vmatpush1.bf16.msra.mxu1 %v3112_v46  ;;  %v4835_v62 = vpop.permute.xlu0 %4834  ;;  %v3115_v38 = vpack.c.bf16 %v3079_v14, %v3078_v30  ;;  %3000 = vmatprep.mubr.bf16.mxu1 %v8754_v54 }
 0x5d5   :  { %v4837_v5 = vunpack.i.h.bf16 %v4835_v62  ;;  %v4836_v42 = vunpack.i.l.bf16 %v4835_v62  ;;  %5119 = vrot.lane.b32.xlu1 %v7634_v36, %s5510_s25 }
 0x5d6   :  { %5129 = vrot.lane.b32.xlu0 %v7638_v6, %s5510_s25  ;;  %3142 = vmatprep.subr.bf16.mxu1 %v3115_v38 }
 0x5d7   :  { %v3097_v58 = vsel %vm3075_vm4, %v4837_v5, %v4832_v12  ;;  %v3096_v16 = vsel %vm3075_vm4, %v4836_v42, %v4831_v2  ;;  %v4840_v46 = vpop.permute.xlu1 %4839  ;;  %v3080_v23 = vsel %vm3075_vm4, %v4831_v2, %v4836_v42  ;;  %v3081_v56 = vsel %vm3075_vm4, %v4832_v12, %v4837_v5 }
 0x5d8   :  { %v3116_v44 = vpack.c.bf16 %v3097_v58, %v3096_v16  ;;  %v4842_v11 = vunpack.i.h.bf16 %v4840_v46  ;;  %v4841_v50 = vunpack.i.l.bf16 %v4840_v46  ;;  %3143 = vmatpush1.bf16.msra.mxu1 %v3114_v22  ;;  %v4845_v30 = vpop.permute.xlu0 %4844  ;;  %v3117_v14 = vpack.c.bf16 %v3081_v56, %v3080_v23 }
 0x5d9   :  { %v4847_v62 = vunpack.i.h.bf16 %v4845_v30  ;;  %v4846_v38 = vunpack.i.l.bf16 %v4845_v30  ;;  %5124 = vrot.lane.b32.xlu1 %v7466_v49, %s5511_s29 }
 0x5da   :  { %5134 = vrot.lane.b32.xlu0 %v7470_v1, %s5511_s29  ;;  %3144 = vmatprep.subr.bf16.mxu1 %v3117_v14 }
 0x5db   :  { %v3099_v12 = vsel %vm3075_vm4, %v4847_v62, %v4842_v11  ;;  %v3098_v2 = vsel %vm3075_vm4, %v4846_v38, %v4841_v50  ;;  %v4850_v5 = vpop.permute.xlu1 %4849  ;;  %v3082_v22 = vsel %vm3075_vm4, %v4841_v50, %v4846_v38  ;;  %v3083_v42 = vsel %vm3075_vm4, %v4842_v11, %v4847_v62  ;;  %3001 = vmatmul.mubr.bf16.gmra.mrb[64].mxu1 %v5457_v27 }
 0x5dc   :  { %v3118_v58 = vpack.c.bf16 %v3099_v12, %v3098_v2  ;;  %v4852_v16 = vunpack.i.h.bf16 %v4850_v5  ;;  %v4851_v46 = vunpack.i.l.bf16 %v4850_v5  ;;  %3145 = vmatpush1.bf16.msra.mxu1 %v3116_v44  ;;  %v4855_v23 = vpop.permute.xlu0 %4854  ;;  %v3119_v56 = vpack.c.bf16 %v3083_v42, %v3082_v22  ;;  %3172 = vmatprep.mubr.bf16.mxu1 %v8754_v54 }
 0x5dd   :  { %v4857_v30 = vunpack.i.h.bf16 %v4855_v23  ;;  %v4856_v14 = vunpack.i.l.bf16 %v4855_v23  ;;  %5139 = vrot.lane.b32.xlu1 %v7490_v29, %s5511_s29 }
 0x5de   :  { %5144 = vrot.lane.b32.xlu0 %v7494_v60, %s5511_s29  ;;  %3146 = vmatprep.subr.bf16.mxu1 %v3119_v56 }
 0x5df   :  { %v3101_v27 = vsel %vm3075_vm4, %v4857_v30, %v4852_v16  ;;  %v3100_v11 = vsel %vm3075_vm4, %v4856_v14, %v4851_v46  ;;  %v4860_v44 = vpop.permute.xlu1 %4859  ;;  %v3084_v50 = vsel %vm3075_vm4, %v4851_v46, %v4856_v14  ;;  %v3085_v62 = vsel %vm3075_vm4, %v4852_v16, %v4857_v30 }
 0x5e0   :  { %v3120_v38 = vpack.c.bf16 %v3101_v27, %v3100_v11  ;;  %v4862_v12 = vunpack.i.h.bf16 %v4860_v44  ;;  %v4861_v2 = vunpack.i.l.bf16 %v4860_v44  ;;  %3147 = vmatpush1.bf16.msra.mxu1 %v3118_v58  ;;  %v4865_v5 = vpop.permute.xlu0 %4864  ;;  %v3121_v22 = vpack.c.bf16 %v3085_v62, %v3084_v50 }
 0x5e1   :  { %v4867_v42 = vunpack.i.h.bf16 %v4865_v5  ;;  %v4866_v23 = vunpack.i.l.bf16 %v4865_v5  ;;  %5149 = vrot.lane.b32.xlu1 %v7514_v59, %s5511_s29 }
 0x5e2   :  { %5154 = vrot.lane.b32.xlu0 %v7518_v20, %s5511_s29  ;;  %3148 = vmatprep.subr.bf16.mxu1 %v3121_v22 }
 0x5e3   :  { %v3103_v46 = vsel %vm3075_vm4, %v4867_v42, %v4862_v12  ;;  %v3102_v16 = vsel %vm3075_vm4, %v4866_v23, %v4861_v2  ;;  %v4870_v56 = vpop.permute.xlu1 %4869  ;;  %v3086_v58 = vsel %vm3075_vm4, %v4861_v2, %v4866_v23  ;;  %v3087_v30 = vsel %vm3075_vm4, %v4862_v12, %v4867_v42 }
 0x5e4   :  { %v3122_v14 = vpack.c.bf16 %v3103_v46, %v3102_v16  ;;  %v4872_v27 = vunpack.i.h.bf16 %v4870_v56  ;;  %v4871_v11 = vunpack.i.l.bf16 %v4870_v56  ;;  %3149 = vmatpush1.bf16.msra.mxu1 %v3120_v38  ;;  %v4875_v44 = vpop.permute.xlu0 %4874  ;;  %v3123_v50 = vpack.c.bf16 %v3087_v30, %v3086_v58 }
 0x5e5   :  { %v4877_v62 = vunpack.i.h.bf16 %v4875_v44  ;;  %v4876_v5 = vunpack.i.l.bf16 %v4875_v44  ;;  %5159 = vrot.lane.b32.xlu1 %v7538_v31, %s5511_s29 }
 0x5e6   :  { %5164 = vrot.lane.b32.xlu0 %v7542_v21, %s5511_s29  ;;  %3150 = vmatprep.subr.bf16.mxu1 %v3123_v50 }
 0x5e7   :  { %v3105_v2 = vsel %vm3075_vm4, %v4877_v62, %v4872_v27  ;;  %v3104_v12 = vsel %vm3075_vm4, %v4876_v5, %v4871_v11  ;;  %v4880_v22 = vpop.permute.xlu1 %4879  ;;  %v3088_v38 = vsel %vm3075_vm4, %v4871_v11, %v4876_v5  ;;  %v3089_v42 = vsel %vm3075_vm4, %v4872_v27, %v4877_v62 }
 0x5e8   :  { %v3124_v23 = vpack.c.bf16 %v3105_v2, %v3104_v12  ;;  %v4882_v46 = vunpack.i.h.bf16 %v4880_v22  ;;  %v4881_v16 = vunpack.i.l.bf16 %v4880_v22  ;;  %3151 = vmatpush1.bf16.msra.mxu1 %v3122_v14  ;;  %v4890_v56 = vpop.permute.xlu0 %4889  ;;  %v3125_v58 = vpack.c.bf16 %v3089_v42, %v3088_v38 }
 0x5e9   :  { %v4892_v30 = vunpack.i.h.bf16 %v4890_v56  ;;  %v4891_v44 = vunpack.i.l.bf16 %v4890_v56  ;;  %5169 = vrot.lane.b32.xlu1 %v7562_v57, %s5511_s29 }
 0x5ea   :  { %5174 = vrot.lane.b32.xlu0 %v7566_v51, %s5511_s29  ;;  %3152 = vmatprep.subr.bf16.mxu1 %v3125_v58 }
 0x5eb   :  { %v3107_v27 = vsel %vm3075_vm4, %v4892_v30, %v4882_v46  ;;  %v3106_v11 = vsel %vm3075_vm4, %v4891_v44, %v4881_v16  ;;  %v4885_v14 = vpop.permute.xlu1 %4884  ;;  %v3090_v50 = vsel %vm3075_vm4, %v4881_v16, %v4891_v44  ;;  %v3091_v62 = vsel %vm3075_vm4, %v4882_v46, %v4892_v30  ;;  %v5458_v44 = vld [vmem:[%s8742_s2 + $0x20] sm:$0xff]  }
 0x5ec   :  { %v3126_v5 = vpack.c.bf16 %v3107_v27, %v3106_v11  ;;  %v4887_v2 = vunpack.i.h.bf16 %v4885_v14  ;;  %v4886_v12 = vunpack.i.l.bf16 %v4885_v14  ;;  %3153 = vmatpush1.bf16.msra.mxu1 %v3124_v23  ;;  %v4895_v22 = vpop.permute.xlu0 %4894  ;;  %v3127_v38 = vpack.c.bf16 %v3091_v62, %v3090_v50 }
 0x5ed   :  { %v4897_v42 = vunpack.i.h.bf16 %v4895_v22  ;;  %v4896_v56 = vunpack.i.l.bf16 %v4895_v22  ;;  %5179 = vrot.lane.b32.xlu1 %v7586_v35, %s5511_s29 }
 0x5ee   :  { %5184 = vrot.lane.b32.xlu0 %v7590_v7, %s5511_s29  ;;  %3154 = vmatprep.subr.bf16.mxu1 %v3127_v38 }
 0x5ef   :  { %v3283_v16 = vsel %vm3265_vm5, %v4897_v42, %v4887_v2  ;;  %v3282_v46 = vsel %vm3265_vm5, %v4896_v56, %v4886_v12  ;;  %v4900_v58 = vpop.permute.xlu1 %4899  ;;  %v3266_v23 = vsel %vm3265_vm5, %v4886_v12, %v4896_v56  ;;  %v3267_v30 = vsel %vm3265_vm5, %v4887_v2, %v4897_v42 }
 0x5f0   :  { %v3302_v27 = vpack.c.bf16 %v3283_v16, %v3282_v46  ;;  %v4902_v11 = vunpack.i.h.bf16 %v4900_v58  ;;  %v4901_v14 = vunpack.i.l.bf16 %v4900_v58  ;;  %3155 = vmatpush1.bf16.msra.mxu1 %v3126_v5  ;;  %v4905_v50 = vpop.permute.xlu0 %4904  ;;  %v3303_v62 = vpack.c.bf16 %v3267_v30, %v3266_v23 }
 0x5f1   :  { %v4907_v22 = vunpack.i.h.bf16 %v4905_v50  ;;  %v4906_v38 = vunpack.i.l.bf16 %v4905_v50  ;;  %5189 = vrot.lane.b32.xlu1 %v7610_v52, %s5511_s29 }
 0x5f2   :  { %5194 = vrot.lane.b32.xlu0 %v7614_v33, %s5511_s29  ;;  %3330 = vmatprep.subr.bf16.mxu1 %v3303_v62 }
 0x5f3   :  { %v3285_v2 = vsel %vm3265_vm5, %v4907_v22, %v4902_v11  ;;  %v3284_v12 = vsel %vm3265_vm5, %v4906_v38, %v4901_v14  ;;  %v4910_v42 = vpop.permute.xlu1 %4909  ;;  %3173 = vmatmul.mubr.bf16.vlgmr.msra.gmra.mrb[60].mxu1 %v5458_v44  ;;  %v3268_v5 = vsel %vm3265_vm5, %v4901_v14, %v4906_v38  ;;  %v3269_v56 = vsel %vm3265_vm5, %v4902_v11, %v4907_v22  ;;  %v5459_v38 = vld [vmem:[%s8742_s2 + $0x28] sm:$0xff]  }
 0x5f4   :  { %v3304_v16 = vpack.c.bf16 %v3285_v2, %v3284_v12  ;;  %v4912_v46 = vunpack.i.h.bf16 %v4910_v42  ;;  %v4911_v58 = vunpack.i.l.bf16 %v4910_v42  ;;  %3331 = vmatpush1.bf16.msra.mxu1 %v3302_v27  ;;  %v4915_v23 = vpop.permute.xlu0 %4914  ;;  %v3305_v30 = vpack.c.bf16 %v3269_v56, %v3268_v5  ;;  %3182 = vmatprep.mubr.bf16.mxu1 %v8754_v54 }
 0x5f5   :  { %v4917_v50 = vunpack.i.h.bf16 %v4915_v23  ;;  %v4916_v62 = vunpack.i.l.bf16 %v4915_v23  ;;  %5199 = vrot.lane.b32.xlu1 %v7634_v36, %s5511_s29 }
 0x5f6   :  { %5209 = vrot.lane.b32.xlu0 %v7638_v6, %s5511_s29  ;;  %3332 = vmatprep.subr.bf16.mxu1 %v3305_v30 }
 0x5f7   :  { %v3287_v44 = vsel %vm3265_vm5, %v4917_v50, %v4912_v46  ;;  %v3286_v11 = vsel %vm3265_vm5, %v4916_v62, %v4911_v58  ;;  %v4920_v27 = vpop.permute.xlu1 %4919  ;;  %v3270_v14 = vsel %vm3265_vm5, %v4911_v58, %v4916_v62  ;;  %v3271_v22 = vsel %vm3265_vm5, %v4912_v46, %v4917_v50 }
 0x5f8   :  { %v3306_v2 = vpack.c.bf16 %v3287_v44, %v3286_v11  ;;  %v4922_v12 = vunpack.i.h.bf16 %v4920_v27  ;;  %v4921_v42 = vunpack.i.l.bf16 %v4920_v27  ;;  %3333 = vmatpush1.bf16.msra.mxu1 %v3304_v16  ;;  %v4925_v5 = vpop.permute.xlu0 %4924  ;;  %v3307_v56 = vpack.c.bf16 %v3271_v22, %v3270_v14 }
 0x5f9   :  { %v4927_v23 = vunpack.i.h.bf16 %v4925_v5  ;;  %v4926_v30 = vunpack.i.l.bf16 %v4925_v5  ;;  %5204 = vrot.lane.b32.xlu1 %v7466_v49, %s5512_s9 }
 0x5fa   :  { %5214 = vrot.lane.b32.xlu0 %v7470_v1, %s5512_s9  ;;  %3334 = vmatprep.subr.bf16.mxu1 %v3307_v56 }
 0x5fb   :  { %v3289_v46 = vsel %vm3265_vm5, %v4927_v23, %v4922_v12  ;;  %v3288_v58 = vsel %vm3265_vm5, %v4926_v30, %v4921_v42  ;;  %v4930_v50 = vpop.permute.xlu1 %4929  ;;  %v3272_v16 = vsel %vm3265_vm5, %v4921_v42, %v4926_v30  ;;  %v3273_v62 = vsel %vm3265_vm5, %v4922_v12, %v4927_v23  ;;  %3183 = vmatmul.mubr.bf16.gmra.mrb[64].mxu1 %v5459_v38 }
 0x5fc   :  { %v3308_v44 = vpack.c.bf16 %v3289_v46, %v3288_v58  ;;  %v4932_v49 = vunpack.i.h.bf16 %v4930_v50  ;;  %v4931_v11 = vunpack.i.l.bf16 %v4930_v50  ;;  %3335 = vmatpush1.bf16.msra.mxu1 %v3306_v2  ;;  %v4935_v1 = vpop.permute.xlu0 %4934  ;;  %v3309_v27 = vpack.c.bf16 %v3273_v62, %v3272_v16  ;;  %3362 = vmatprep.mubr.bf16.mxu1 %v8754_v54 }
 0x5fd   :  { %v4937_v14 = vunpack.i.h.bf16 %v4935_v1  ;;  %v4936_v22 = vunpack.i.l.bf16 %v4935_v1  ;;  %5219 = vrot.lane.b32.xlu1 %v7490_v29, %s5512_s9 }
 0x5fe   :  { %5224 = vrot.lane.b32.xlu0 %v7494_v60, %s5512_s9  ;;  %3336 = vmatprep.subr.bf16.mxu1 %v3309_v27 }
 0x5ff   :  { %v3291_v38 = vsel %vm3265_vm5, %v4937_v14, %v4932_v49  ;;  %v3290_v12 = vsel %vm3265_vm5, %v4936_v22, %v4931_v11  ;;  %v4940_v2 = vpop.permute.xlu1 %4939  ;;  %v3274_v42 = vsel %vm3265_vm5, %v4931_v11, %v4936_v22  ;;  %v3275_v5 = vsel %vm3265_vm5, %v4932_v49, %v4937_v14 }
 0x600   :  { %v3310_v56 = vpack.c.bf16 %v3291_v38, %v3290_v12  ;;  %v4942_v23 = vunpack.i.h.bf16 %v4940_v2  ;;  %v4941_v29 = vunpack.i.l.bf16 %v4940_v2  ;;  %3337 = vmatpush1.bf16.msra.mxu1 %v3308_v44  ;;  %v4945_v30 = vpop.permute.xlu0 %4944  ;;  %v3311_v60 = vpack.c.bf16 %v3275_v5, %v3274_v42 }
 0x601   :  { %v4947_v46 = vunpack.i.h.bf16 %v4945_v30  ;;  %v4946_v58 = vunpack.i.l.bf16 %v4945_v30  ;;  %5229 = vrot.lane.b32.xlu1 %v7514_v59, %s5512_s9 }
 0x602   :  { %5234 = vrot.lane.b32.xlu0 %v7518_v20, %s5512_s9  ;;  %3338 = vmatprep.subr.bf16.mxu1 %v3311_v60 }
 0x603   :  { %v3293_v50 = vsel %vm3265_vm5, %v4947_v46, %v4942_v23  ;;  %v3292_v16 = vsel %vm3265_vm5, %v4946_v58, %v4941_v29  ;;  %v4950_v62 = vpop.permute.xlu1 %4949  ;;  %v3276_v44 = vsel %vm3265_vm5, %v4941_v29, %v4946_v58  ;;  %v3277_v49 = vsel %vm3265_vm5, %v4942_v23, %v4947_v46 }
 0x604   :  { %v3312_v11 = vpack.c.bf16 %v3293_v50, %v3292_v16  ;;  %v4952_v1 = vunpack.i.h.bf16 %v4950_v62  ;;  %v4951_v59 = vunpack.i.l.bf16 %v4950_v62  ;;  %3339 = vmatpush1.bf16.msra.mxu1 %v3310_v56  ;;  %v4955_v27 = vpop.permute.xlu0 %4954  ;;  %v3313_v20 = vpack.c.bf16 %v3277_v49, %v3276_v44 }
 0x605   :  { %v4957_v14 = vunpack.i.h.bf16 %v4955_v27  ;;  %v4956_v22 = vunpack.i.l.bf16 %v4955_v27  ;;  %5239 = vrot.lane.b32.xlu1 %v7538_v31, %s5512_s9 }
 0x606   :  { %5244 = vrot.lane.b32.xlu0 %v7542_v21, %s5512_s9  ;;  %3340 = vmatprep.subr.bf16.mxu1 %v3313_v20 }
 0x607   :  { %v3295_v38 = vsel %vm3265_vm5, %v4957_v14, %v4952_v1  ;;  %v3294_v12 = vsel %vm3265_vm5, %v4956_v22, %v4951_v59  ;;  %v4960_v2 = vpop.permute.xlu1 %4959  ;;  %v3278_v42 = vsel %vm3265_vm5, %v4951_v59, %v4956_v22  ;;  %v3279_v5 = vsel %vm3265_vm5, %v4952_v1, %v4957_v14 }
 0x608   :  { %v3314_v56 = vpack.c.bf16 %v3295_v38, %v3294_v12  ;;  %v4962_v23 = vunpack.i.h.bf16 %v4960_v2  ;;  %v4961_v31 = vunpack.i.l.bf16 %v4960_v2  ;;  %3341 = vmatpush1.bf16.msra.mxu1 %v3312_v11  ;;  %v4965_v29 = vpop.permute.xlu0 %4964  ;;  %v3315_v21 = vpack.c.bf16 %v3279_v5, %v3278_v42  ;;  %v5460_v11 = vld [vmem:[%s8742_s2 + $0x30] sm:$0xff]   ;;  %v8769_v2 = vld [vmem:[#allocation5_spill] sm:$0xff]  ;;  %v8770_v42 = vld [vmem:[#allocation3_spill] sm:$0xff] }
 0x609   :  { %v4967_v30 = vunpack.i.h.bf16 %v4965_v29  ;;  %v4966_v60 = vunpack.i.l.bf16 %v4965_v29  ;;  %5249 = vrot.lane.b32.xlu1 %v7562_v57, %s5512_s9  ;;  %v8755_v59 = vpack.c.bf16 %v7462_v9, %v7458_v39  ;;  %v8757_v39 = vpack.c.bf16 %v7486_v41, %v7482_v10 }
 0x60a   :  { %5254 = vrot.lane.b32.xlu0 %v7566_v51, %s5512_s9  ;;  %3342 = vmatprep.subr.bf16.mxu1 %v3315_v21  ;;  %v8759_v10 = vpack.c.bf16 %v7510_v17, %v7506_v32  ;;  %v8762_v32 = vpack.c.bf16 %v7532_v18, %v7528_v13  ;;  %v8771_v5 = vpack.c.bf16 %v8769_v2, %v8770_v42 }
 0x60b   :  { %v3297_v46 = vsel %vm3265_vm5, %v4967_v30, %v4962_v23  ;;  %v3296_v58 = vsel %vm3265_vm5, %v4966_v60, %v4961_v31  ;;  %v8126_v50 = vpop.permute.xlu1 %4969  ;;  %v3280_v16 = vsel %vm3265_vm5, %v4961_v31, %v4966_v60  ;;  %v3281_v62 = vsel %vm3265_vm5, %v4962_v23, %v4967_v30  ;;  %v5462_v60 = vld [vmem:[%s8742_s2 + $0x40] sm:$0xff]  }
 0x60c   :  { %v3316_v44 = vpack.c.bf16 %v3297_v46, %v3296_v58  ;;  %3343 = vmatpush1.bf16.msra.mxu1 %v3314_v56  ;;  %v4975_v57 = vpop.permute.xlu0 %4974  ;;  %v3317_v49 = vpack.c.bf16 %v3281_v62, %v3280_v16  ;;  %v4972_v13 = vunpack.i.h.bf16 %v8126_v50  ;;  %v4971_v18 = vunpack.i.l.bf16 %v8126_v50  ;;  %v8772_v46 = vld [vmem:[#allocation4_spill] sm:$0xff]  ;;  %v8773_v58 = vld [vmem:[#allocation2_spill] sm:$0xff] }
 0x60d   :  { %5259 = vrot.lane.b32.xlu1 %v7586_v35, %s5512_s9  ;;  %v4977_v20 = vunpack.i.h.bf16 %v4975_v57  ;;  %v4976_v14 = vunpack.i.l.bf16 %v4975_v57  ;;  %v8774_v50 = vpack.c.bf16 %v8772_v46, %v8773_v58 }
 0x60e   :  { %5264 = vrot.lane.b32.xlu0 %v7590_v7, %s5512_s9  ;;  %3344 = vmatprep.subr.bf16.mxu1 %v3317_v49  ;;  %v8756_v7 = vpack.c.bf16 %v7460_v48, %v7456_v24  ;;  %v5461_v24 = vld [vmem:[%s8742_s2 + $0x38] sm:$0xff]   ;;  %v8758_v48 = vpack.c.bf16 %v7484_v4, %v7480_v47  ;;  %v8761_v47 = vpack.c.bf16 %v7534_v45, %v7530_v0 }
 0x60f   :  { %v8136_v51 = vpop.permute.xlu1 %4979  ;;  %v8765_v45 = vpack.c.bf16 %v7582_v15, %v7578_v25  ;;  %v3565_v15 = vsel %vm3548_vm6, %v4976_v14, %v4971_v18  ;;  %v3566_v22 = vsel %vm3548_vm6, %v4977_v20, %v4972_v13  ;;  %v3550_v56 = vsel %vm3548_vm6, %v4972_v13, %v4977_v20  ;;  %v5463_v13 = vld [vmem:[%s8742_s2 + $0x48] sm:$0xff]  }
 0x610   :  { %3345 = vmatpush1.bf16.msra.mxu1 %v3316_v44  ;;  %v8141_v1 = vpop.permute.xlu0 %4984  ;;  %v4982_v38 = vunpack.i.h.bf16 %v8136_v51  ;;  %v4981_v12 = vunpack.i.l.bf16 %v8136_v51  ;;  %v3549_v23 = vsel %vm3548_vm6, %v4971_v18, %v4976_v14  ;;  %v3586_v31 = vpack.c.bf16 %v3566_v22, %v3565_v15 }
 0x611   :  { %3423 = vmatprep.subr.bf16.mxu1 %v8755_v59  ;;  %5269 = vrot.lane.b32.xlu1 %v7610_v52, %s5512_s9  ;;  %v3585_v57 = vpack.c.bf16 %v3550_v56, %v3549_v23 }
 0x612   :  { %5274 = vrot.lane.b32.xlu0 %v7614_v33, %s5512_s9  ;;  %v8760_v33 = vpack.c.bf16 %v7508_v34, %v7504_v61  ;;  %v8763_v61 = vpack.c.bf16 %v7558_v55, %v7554_v37  ;;  %v8767_v55 = vpack.c.bf16 %v7606_v19, %v7602_v26  ;;  %v8768_v26 = vpack.c.bf16 %v7604_v3, %v7600_v28 }
 0x613   :  { %v8150_v35 = vpop.permute.xlu1 %4989  ;;  %3363 = vmatmul.mubr.bf16.vlgmr.msra.gmra.mrb[60].mxu1 %v5460_v11 }
 0x614   :  { %3424 = vmatpush1.bf16.msra.mxu1 %v8756_v7  ;;  %v8155_v27 = vpop.permute.xlu0 %4994  ;;  %3372 = vmatprep.mubr.bf16.mxu1 %v8754_v54  ;;  %v4992_v29 = vunpack.i.h.bf16 %v8150_v35  ;;  %v4991_v21 = vunpack.i.l.bf16 %v8150_v35 }
 0x615   :  { %3425 = vmatprep.subr.bf16.mxu1 %v8757_v39  ;;  %5279 = vrot.lane.b32.xlu1 %v7634_v36, %s5512_s9  ;;  %v4997_v28 = vunpack.i.h.bf16 %v8155_v27  ;;  %v4996_v3 = vunpack.i.l.bf16 %v8155_v27 }
 0x616   :  { %5284 = vrot.lane.b32.xlu0 %v7638_v6, %s5512_s9  ;;  %v8764_v6 = vpack.c.bf16 %v7556_v43, %v7552_v53  ;;  %v8766_v53 = vpack.c.bf16 %v7580_v40, %v7576_v8  ;;  %v4987_v8 = vunpack.i.h.bf16 %v8141_v1  ;;  %v4986_v40 = vunpack.i.l.bf16 %v8141_v1 }
 0x617   :  { %v8165_v9 = vpop.permute.xlu1 %4999  ;;  %v3569_v59 = vsel %vm3548_vm6, %v4996_v3, %v4991_v21  ;;  %v3570_v35 = vsel %vm3548_vm6, %v4997_v28, %v4992_v29 }
 0x618   :  { %3426 = vmatpush1.bf16.msra.mxu1 %v8758_v48  ;;  %v8173_v52 = vpop.permute.xlu0 %5004  ;;  %v3567_v62 = vsel %vm3548_vm6, %v4986_v40, %v4981_v12  ;;  %v3568_v44 = vsel %vm3548_vm6, %v4987_v8, %v4982_v38  ;;  %v3552_v49 = vsel %vm3548_vm6, %v4982_v38, %v4987_v8  ;;  %v3551_v51 = vsel %vm3548_vm6, %v4981_v12, %v4986_v40 }
 0x619   :  { %3427 = vmatprep.subr.bf16.mxu1 %v8759_v10  ;;  %v3588_v1 = vpack.c.bf16 %v3568_v44, %v3567_v62  ;;  %v5002_v7 = vunpack.i.h.bf16 %v8165_v9  ;;  %v5001_v27 = vunpack.i.l.bf16 %v8165_v9  ;;  %v5007_v39 = vunpack.i.h.bf16 %v8173_v52 }
 0x61a   :  { %v3587_v10 = vpack.c.bf16 %v3552_v49, %v3551_v51 }
 0x61b   :  { %v8178_v41 = vpop.permute.xlu1 %5009  ;;  %3373 = vmatmul.mubr.bf16.gmra.mrb[64].mxu1 %v5461_v24  ;;  %v5006_v24 = vunpack.i.l.bf16 %v8173_v52  ;;  %v3572_v14 = vsel %vm3548_vm6, %v5007_v39, %v5002_v7 }
 0x61c   :  { %3428 = vmatpush1.bf16.msra.mxu1 %v8760_v33  ;;  %v8183_v36 = vpop.permute.xlu0 %5014  ;;  %3455 = vmatprep.mubr.bf16.mxu1 %v8754_v54  ;;  %v3554_v33 = vsel %vm3548_vm6, %v4992_v29, %v4997_v28  ;;  %v5012_v9 = vunpack.i.h.bf16 %v8178_v41 }
 0x61d   :  { %3429 = vmatprep.subr.bf16.mxu1 %v8761_v47  ;;  %v3553_v47 = vsel %vm3548_vm6, %v4991_v21, %v4996_v3  ;;  %v5017_v52 = vunpack.i.h.bf16 %v8183_v36  ;;  %v3571_v20 = vsel %vm3548_vm6, %v5006_v24, %v5001_v27 }
 0x61e   :  { %v3592_v15 = vpack.c.bf16 %v3572_v14, %v3571_v20 }
 0x61f   :  { %v8189_v4 = vpop.permute.xlu1 %5019  ;;  %v3574_v38 = vsel %vm3548_vm6, %v5017_v52, %v5012_v9 }
 0x620   :  { %3430 = vmatpush1.bf16.msra.mxu1 %v8762_v32  ;;  %v8194_v17 = vpop.permute.xlu0 %5024  ;;  %v3590_v32 = vpack.c.bf16 %v3570_v35, %v3569_v59  ;;  %v5022_v12 = vunpack.i.h.bf16 %v8189_v4  ;;  %v5021_v8 = vunpack.i.l.bf16 %v8189_v4 }
 0x621   :  { %3431 = vmatprep.subr.bf16.mxu1 %v8763_v61  ;;  %v5011_v61 = vunpack.i.l.bf16 %v8178_v41  ;;  %v3589_v41 = vpack.c.bf16 %v3554_v33, %v3553_v47  ;;  %v5027_v40 = vunpack.i.h.bf16 %v8194_v17 }
 0x623   :  { %v8199_v34 = vpop.permute.xlu1 %5029 }
 0x624   :  { %3432 = vmatpush1.bf16.msra.mxu1 %v8764_v6  ;;  %v8204_v0 = vpop.permute.xlu0 %5034  ;;  %v5016_v6 = vunpack.i.l.bf16 %v8183_v36  ;;  %v3556_v36 = vsel %vm3548_vm6, %v5002_v7, %v5007_v39  ;;  %v5032_v4 = vunpack.i.h.bf16 %v8199_v34 }
 0x625   :  { %3433 = vmatprep.subr.bf16.mxu1 %v8765_v45  ;;  %v5036_v29 = vunpack.i.l.bf16 %v8204_v0 }
 0x626   :  { %v3573_v22 = vsel %vm3548_vm6, %v5016_v6, %v5011_v61  ;;  %v3557_v56 = vsel %vm3548_vm6, %v5011_v61, %v5016_v6 }
 0x627   :  { %v8211_v37 = vpop.permute.xlu1 %5039  ;;  %v3594_v23 = vpack.c.bf16 %v3574_v38, %v3573_v22 }
 0x628   :  { %3434 = vmatpush1.bf16.msra.mxu1 %v8766_v53  ;;  %v8217_v43 = vpop.permute.xlu0 %5049  ;;  %v3555_v53 = vsel %vm3548_vm6, %v5001_v27, %v5006_v24  ;;  %v5041_v49 = vunpack.i.l.bf16 %v8211_v37 }
 0x629   :  { %3435 = vmatprep.subr.bf16.mxu1 %v8767_v55  ;;  %v3591_v42 = vpack.c.bf16 %v3556_v36, %v3555_v53  ;;  %v5052_v51 = vunpack.i.h.bf16 %v8217_v43 }
 0x62b   :  { %v8222_v25 = vpop.permute.xlu1 %5044 }
 0x62c   :  { %3436 = vmatpush1.bf16.msra.mxu1 %v8768_v26  ;;  %v8235_v19 = vpop.permute.xlu0 %5054  ;;  %v5026_v26 = vunpack.i.l.bf16 %v8194_v17  ;;  %v5037_v17 = vunpack.i.h.bf16 %v8204_v0  ;;  %v5047_v24 = vunpack.i.h.bf16 %v8222_v25 }
 0x62d   :  { %3437 = vmatprep.subr.bf16.mxu1 %v8771_v5  ;;  %v3558_v5 = vsel %vm3548_vm6, %v5012_v9, %v5017_v52 }
 0x62e   :  { %v3575_v3 = vsel %vm3548_vm6, %v5026_v26, %v5021_v8  ;;  %v3593_v46 = vpack.c.bf16 %v3558_v5, %v3557_v56  ;;  %v3559_v58 = vsel %vm3548_vm6, %v5021_v8, %v5026_v26  ;;  %v3578_v44 = vsel %vm3548_vm6, %v5037_v17, %v5032_v4  ;;  %v5464_v5 = vld [vmem:[%s8742_s2 + $0x50] sm:$0xff]  }
 0x62f   :  { %v8248_v30 = vpop.permute.xlu1 %5059  ;;  %v3562_v7 = vsel %vm3548_vm6, %v5032_v4, %v5037_v17 }
 0x630   :  { %3438 = vmatpush1.bf16.msra.mxu1 %v8774_v50  ;;  %v8256_v16 = vpop.permute.xlu0 %5064  ;;  %v5062_v14 = vunpack.i.h.bf16 %v8248_v30 }
 0x631   :  { %3613 = vmatprep.subr.bf16.mxu1 %v3586_v31  ;;  %v5031_v31 = vunpack.i.l.bf16 %v8199_v34  ;;  %v3560_v34 = vsel %vm3548_vm6, %v5022_v12, %v5027_v40  ;;  %v5067_v36 = vunpack.i.h.bf16 %v8256_v16  ;;  %v5066_v53 = vunpack.i.l.bf16 %v8256_v16 }
 0x632   :  { %v3595_v35 = vpack.c.bf16 %v3560_v34, %v3559_v58 }
 0x633   :  { %v8266_v11 = vpop.permute.xlu1 %5069  ;;  %3456 = vmatmul.mubr.bf16.vlgmr.msra.gmra.mrb[60].mxu1 %v5462_v60  ;;  %v3576_v60 = vsel %vm3548_vm6, %v5027_v40, %v5022_v12  ;;  %v3577_v62 = vsel %vm3548_vm6, %v5036_v29, %v5031_v31  ;;  %v3561_v27 = vsel %vm3548_vm6, %v5031_v31, %v5036_v29  ;;  %v3758_v4 = vsel %vm3738_vm7, %v5067_v36, %v5062_v14 }
 0x634   :  { %3614 = vmatpush1.bf16.msra.mxu1 %v3585_v57  ;;  %v8276_v48 = vpop.permute.xlu0 %5074  ;;  %3465 = vmatprep.mubr.bf16.mxu1 %v8754_v54  ;;  %v3596_v50 = vpack.c.bf16 %v3576_v60, %v3575_v3  ;;  %v5042_v57 = vunpack.i.h.bf16 %v8211_v37  ;;  %v3598_v39 = vpack.c.bf16 %v3578_v44, %v3577_v62  ;;  %v5046_v37 = vunpack.i.l.bf16 %v8222_v25 }
 0x635   :  { %3615 = vmatprep.subr.bf16.mxu1 %v3588_v1  ;;  %v5051_v1 = vunpack.i.l.bf16 %v8217_v43  ;;  %v5056_v43 = vunpack.i.l.bf16 %v8235_v19  ;;  %v3597_v61 = vpack.c.bf16 %v3562_v7, %v3561_v27  ;;  %v5072_v40 = vunpack.i.h.bf16 %v8266_v11  ;;  %v5465_v7 = vld [vmem:[%s8742_s2 + $0x58] sm:$0xff]  }
 0x636   :  { %v3580_v9 = vsel %vm3548_vm6, %v5052_v51, %v5042_v57  ;;  %v3564_v25 = vsel %vm3548_vm6, %v5042_v57, %v5052_v51  ;;  %v5077_v26 = vunpack.i.h.bf16 %v8276_v48  ;;  %v5076_v16 = vunpack.i.l.bf16 %v8276_v48 }
 0x637   :  { %v8287_v45 = vpop.permute.xlu1 %5079  ;;  %v3739_v12 = vsel %vm3738_vm7, %v5046_v37, %v5056_v43  ;;  %v3742_v48 = vsel %vm3738_vm7, %v5062_v14, %v5067_v36 }
 0x638   :  { %3616 = vmatpush1.bf16.msra.mxu1 %v3587_v10  ;;  %v8292_v18 = vpop.permute.xlu0 %5084  ;;  %v5057_v10 = vunpack.i.h.bf16 %v8235_v19  ;;  %v3563_v19 = vsel %vm3548_vm6, %v5041_v49, %v5051_v1  ;;  %v3760_v60 = vsel %vm3738_vm7, %v5077_v26, %v5072_v40  ;;  %v5081_v34 = vunpack.i.l.bf16 %v8287_v45 }
 0x639   :  { %3617 = vmatprep.subr.bf16.mxu1 %v3590_v32  ;;  %v3579_v32 = vsel %vm3548_vm6, %v5051_v1, %v5041_v49  ;;  %v3599_v22 = vpack.c.bf16 %v3564_v25, %v3563_v19  ;;  %v5087_v58 = vunpack.i.h.bf16 %v8292_v18  ;;  %v3744_v57 = vsel %vm3738_vm7, %v5072_v40, %v5077_v26 }
 0x63a   :  { %v3600_v6 = vpack.c.bf16 %v3580_v9, %v3579_v32  ;;  %v3756_v20 = vsel %vm3738_vm7, %v5057_v10, %v5047_v24  ;;  %v3740_v38 = vsel %vm3738_vm7, %v5047_v24, %v5057_v10 }
 0x63b   :  { %v8302_v55 = vpop.permute.xlu1 %5089  ;;  %3466 = vmatmul.mubr.bf16.gmra.mrb[64].mxu1 %v5463_v13  ;;  %v3755_v13 = vsel %vm3738_vm7, %v5056_v43, %v5046_v37 }
 0x63c   :  { %3618 = vmatpush1.bf16.msra.mxu1 %v3589_v41  ;;  %v8312_v2 = vpop.permute.xlu0 %5094  ;;  %3645 = vmatprep.mubr.bf16.mxu1 %v8754_v54  ;;  %v5061_v41 = vunpack.i.l.bf16 %v8248_v30  ;;  %v3776_v8 = vpack.c.bf16 %v3756_v20, %v3755_v13  ;;  %v5071_v30 = vunpack.i.l.bf16 %v8266_v11  ;;  %v3775_v11 = vpack.c.bf16 %v3740_v38, %v3739_v12 }
 0x63d   :  { %3619 = vmatprep.subr.bf16.mxu1 %v3592_v15  ;;  %v5091_v1 = vunpack.i.l.bf16 %v8302_v55 }
 0x63e   :  { %v3741_v31 = vsel %vm3738_vm7, %v5061_v41, %v5066_v53  ;;  %v3759_v3 = vsel %vm3738_vm7, %v5076_v16, %v5071_v30  ;;  %v3743_v49 = vsel %vm3738_vm7, %v5071_v30, %v5076_v16 }
 0x63f   :  { %v8323_v21 = vpop.permute.xlu1 %5099  ;;  %v3777_v44 = vpack.c.bf16 %v3742_v48, %v3741_v31  ;;  %v3780_v51 = vpack.c.bf16 %v3760_v60, %v3759_v3 }
 0x640   :  { %3620 = vmatpush1.bf16.msra.mxu1 %v3591_v42  ;;  %v8325_v28 = vpop.permute.xlu0 %5104  ;;  %v5101_v25 = vunpack.i.l.bf16 %v8323_v21 }
 0x641   :  { %3621 = vmatprep.subr.bf16.mxu1 %v3594_v23  ;;  %v3757_v23 = vsel %vm3738_vm7, %v5066_v53, %v5061_v41  ;;  %v5107_v19 = vunpack.i.h.bf16 %v8325_v28 }
 0x642   :  { %v3778_v29 = vpack.c.bf16 %v3758_v4, %v3757_v23 }
 0x643   :  { %v8335_v0 = vpop.permute.xlu1 %5109 }
 0x644   :  { %3622 = vmatpush1.bf16.msra.mxu1 %v3593_v46  ;;  %v8345_v59 = vpop.permute.xlu0 %5114  ;;  %v5082_v46 = vunpack.i.h.bf16 %v8287_v45  ;;  %v5092_v45 = vunpack.i.h.bf16 %v8302_v55  ;;  %v3779_v55 = vpack.c.bf16 %v3744_v57, %v3743_v49  ;;  %v5112_v36 = vunpack.i.h.bf16 %v8335_v0 }
 0x645   :  { %3623 = vmatprep.subr.bf16.mxu1 %v3596_v50  ;;  %v5086_v50 = vunpack.i.l.bf16 %v8292_v18  ;;  %v5097_v18 = vunpack.i.h.bf16 %v8312_v2  ;;  %v5117_v53 = vunpack.i.h.bf16 %v8345_v59 }
 0x647   :  { %v8355_v33 = vpop.permute.xlu1 %5119  ;;  %v3761_v27 = vsel %vm3738_vm7, %v5086_v50, %v5081_v34  ;;  %v3745_v10 = vsel %vm3738_vm7, %v5081_v34, %v5086_v50  ;;  %v3764_v9 = vsel %vm3738_vm7, %v5097_v18, %v5092_v45  ;;  %v3748_v20 = vsel %vm3738_vm7, %v5092_v45, %v5097_v18 }
 0x648   :  { %3624 = vmatpush1.bf16.msra.mxu1 %v3595_v35  ;;  %v8358_v47 = vpop.permute.xlu0 %5129  ;;  %v5096_v35 = vunpack.i.l.bf16 %v8312_v2  ;;  %v3746_v2 = vsel %vm3738_vm7, %v5082_v46, %v5087_v58  ;;  %v3768_v16 = vsel %vm3738_vm7, %v5117_v53, %v5112_v36  ;;  %v5121_v23 = vunpack.i.l.bf16 %v8355_v33 }
 0x649   :  { %3625 = vmatprep.subr.bf16.mxu1 %v3598_v39  ;;  %v3762_v39 = vsel %vm3738_vm7, %v5087_v58, %v5082_v46  ;;  %v3781_v13 = vpack.c.bf16 %v3746_v2, %v3745_v10  ;;  %v5132_v4 = vunpack.i.h.bf16 %v8358_v47  ;;  %v3752_v3 = vsel %vm3738_vm7, %v5112_v36, %v5117_v53 }
 0x64a   :  { %v3782_v43 = vpack.c.bf16 %v3762_v39, %v3761_v27  ;;  %v3763_v32 = vsel %vm3738_vm7, %v5096_v35, %v5091_v1  ;;  %v3747_v14 = vsel %vm3738_vm7, %v5091_v1, %v5096_v35 }
 0x64b   :  { %v8368_v52 = vpop.permute.xlu1 %5124  ;;  %v3784_v41 = vpack.c.bf16 %v3764_v9, %v3763_v32  ;;  %v3783_v40 = vpack.c.bf16 %v3748_v20, %v3747_v14 }
 0x64c   :  { %3626 = vmatpush1.bf16.msra.mxu1 %v3597_v61  ;;  %v8378_v15 = vpop.permute.xlu0 %5134  ;;  %v5102_v61 = vunpack.i.h.bf16 %v8323_v21  ;;  %v5111_v21 = vunpack.i.l.bf16 %v8335_v0  ;;  %v5126_v34 = vunpack.i.l.bf16 %v8368_v52 }
 0x64d   :  { %3627 = vmatprep.subr.bf16.mxu1 %v3600_v6  ;;  %v5106_v6 = vunpack.i.l.bf16 %v8325_v28  ;;  %v5116_v28 = vunpack.i.l.bf16 %v8345_v59  ;;  %v5136_v58 = vunpack.i.l.bf16 %v8378_v15 }
 0x64e   :  { %v3750_v0 = vsel %vm3738_vm7, %v5102_v61, %v5107_v19 }
 0x64f   :  { %v8388_v42 = vpop.permute.xlu1 %5139  ;;  %v3765_v12 = vsel %vm3738_vm7, %v5106_v6, %v5101_v25  ;;  %v3749_v30 = vsel %vm3738_vm7, %v5101_v25, %v5106_v6  ;;  %v3767_v26 = vsel %vm3738_vm7, %v5116_v28, %v5111_v21  ;;  %v3751_v60 = vsel %vm3738_vm7, %v5111_v21, %v5116_v28 }
 0x650   :  { %3628 = vmatpush1.bf16.msra.mxu1 %v3599_v22  ;;  %v8393_v56 = vpop.permute.xlu0 %5144  ;;  %v3788_v46 = vpack.c.bf16 %v3768_v16, %v3767_v26  ;;  %v3787_v57 = vpack.c.bf16 %v3752_v3, %v3751_v60  ;;  %v3945_v1 = vsel %vm3928_vm8, %v5136_v58, %v5126_v34  ;;  %v5142_v35 = vunpack.i.h.bf16 %v8388_v42 }
 0x651   :  { %3803 = vmatprep.subr.bf16.mxu1 %v3776_v8  ;;  %v3766_v8 = vsel %vm3738_vm7, %v5107_v19, %v5102_v61  ;;  %v5147_v27 = vunpack.i.h.bf16 %v8393_v56  ;;  %v5146_v39 = vunpack.i.l.bf16 %v8393_v56  ;;  %v3929_v10 = vsel %vm3928_vm8, %v5126_v34, %v5136_v58  ;;  %v5466_v56 = vld [vmem:[%s8742_s2 + $0x60] sm:$0xff]  }
 0x652   :  { %v3786_v59 = vpack.c.bf16 %v3766_v8, %v3765_v12 }
 0x653   :  { %v8403_v17 = vpop.permute.xlu1 %5149  ;;  %3646 = vmatmul.mubr.bf16.vlgmr.msra.gmra.mrb[60].mxu1 %v5464_v5  ;;  %v5122_v5 = vunpack.i.h.bf16 %v8355_v33  ;;  %v5127_v33 = vunpack.i.h.bf16 %v8368_v52  ;;  %v3948_v19 = vsel %vm3928_vm8, %v5147_v27, %v5142_v35 }
 0x654   :  { %3804 = vmatpush1.bf16.msra.mxu1 %v3775_v11  ;;  %v8413_v62 = vpop.permute.xlu0 %5154  ;;  %3655 = vmatprep.mubr.bf16.mxu1 %v8754_v54  ;;  %v5131_v11 = vunpack.i.l.bf16 %v8358_v47  ;;  %v5137_v47 = vunpack.i.h.bf16 %v8378_v15  ;;  %v5152_v32 = vunpack.i.h.bf16 %v8403_v17  ;;  %v5151_v9 = vunpack.i.l.bf16 %v8403_v17 }
 0x655   :  { %3805 = vmatprep.subr.bf16.mxu1 %v3778_v29  ;;  %v3785_v29 = vpack.c.bf16 %v3750_v0, %v3749_v30  ;;  %v3754_v49 = vsel %vm3738_vm7, %v5122_v5, %v5132_v4  ;;  %v5156_v61 = vunpack.i.l.bf16 %v8413_v62 }
 0x656   :  { %v3769_v50 = vsel %vm3738_vm7, %v5131_v11, %v5121_v23  ;;  %v3753_v52 = vsel %vm3738_vm7, %v5121_v23, %v5131_v11  ;;  %v3946_v18 = vsel %vm3928_vm8, %v5137_v47, %v5127_v33  ;;  %v3930_v2 = vsel %vm3928_vm8, %v5127_v33, %v5137_v47  ;;  %v5467_v23 = vld [vmem:[%s8742_s2 + $0x68] sm:$0xff]  }
 0x657   :  { %v8431_v24 = vpop.permute.xlu1 %5159  ;;  %v3965_v17 = vpack.c.bf16 %v3930_v2, %v3929_v10  ;;  %v3933_v0 = vsel %vm3928_vm8, %v5151_v9, %v5156_v61 }
 0x658   :  { %3806 = vmatpush1.bf16.msra.mxu1 %v3777_v44  ;;  %v8433_v37 = vpop.permute.xlu0 %5164  ;;  %v3770_v44 = vsel %vm3738_vm7, %v5132_v4, %v5122_v5  ;;  %v5162_v21 = vunpack.i.h.bf16 %v8431_v24  ;;  %v5161_v53 = vunpack.i.l.bf16 %v8431_v24 }
 0x659   :  { %3807 = vmatprep.subr.bf16.mxu1 %v3780_v51  ;;  %v3790_v45 = vpack.c.bf16 %v3770_v44, %v3769_v50  ;;  %v5167_v28 = vunpack.i.h.bf16 %v8433_v37  ;;  %v5166_v12 = vunpack.i.l.bf16 %v8433_v37 }
 0x65b   :  { %3656 = vmatmul.mubr.bf16.gmra.mrb[64].mxu1 %v5465_v7  ;;  %v8456_v22 = vpop.permute.xlu1 %5169  ;;  %v5141_v7 = vunpack.i.l.bf16 %v8388_v42  ;;  %v5157_v42 = vunpack.i.h.bf16 %v8413_v62  ;;  %v3932_v62 = vsel %vm3928_vm8, %v5142_v35, %v5147_v27  ;;  %v3951_v4 = vsel %vm3928_vm8, %v5166_v12, %v5161_v53 }
 0x65c   :  { %3808 = vmatpush1.bf16.msra.mxu1 %v3779_v55  ;;  %3835 = vmatprep.mubr.bf16.mxu1 %v8754_v54  ;;  %v8458_v38 = vpop.permute.xlu0 %5174  ;;  %v3789_v55 = vpack.c.bf16 %v3754_v49, %v3753_v52  ;;  %v5171_v24 = vunpack.i.l.bf16 %v8456_v22  ;;  %v3952_v11 = vsel %vm3928_vm8, %v5167_v28, %v5162_v21 }
 0x65d   :  { %3809 = vmatprep.subr.bf16.mxu1 %v3782_v43  ;;  %v3966_v43 = vpack.c.bf16 %v3946_v18, %v3945_v1  ;;  %v3947_v25 = vsel %vm3928_vm8, %v5146_v39, %v5141_v7  ;;  %v3931_v20 = vsel %vm3928_vm8, %v5141_v7, %v5146_v39  ;;  %v3950_v36 = vsel %vm3928_vm8, %v5157_v42, %v5152_v32 }
 0x65e   :  { %v3968_v14 = vpack.c.bf16 %v3948_v19, %v3947_v25  ;;  %v3967_v8 = vpack.c.bf16 %v3932_v62, %v3931_v20  ;;  %v5177_v26 = vunpack.i.h.bf16 %v8458_v38  ;;  %v5176_v37 = vunpack.i.l.bf16 %v8458_v38 }
 0x65f   :  { %v8476_v48 = vpop.permute.xlu1 %5179  ;;  %v3936_v38 = vsel %vm3928_vm8, %v5162_v21, %v5167_v28  ;;  %v3972_v3 = vpack.c.bf16 %v3952_v11, %v3951_v4 }
 0x660   :  { %3810 = vmatpush1.bf16.msra.mxu1 %v3781_v13  ;;  %v8478_v31 = vpop.permute.xlu0 %5184  ;;  %v3953_v60 = vsel %vm3928_vm8, %v5176_v37, %v5171_v24  ;;  %v5182_v33 = vunpack.i.h.bf16 %v8476_v48  ;;  %v5181_v34 = vunpack.i.l.bf16 %v8476_v48  ;;  %v3937_v52 = vsel %vm3928_vm8, %v5171_v24, %v5176_v37 }
 0x661   :  { %3811 = vmatprep.subr.bf16.mxu1 %v3784_v41  ;;  %v3949_v41 = vsel %vm3928_vm8, %v5156_v61, %v5151_v9  ;;  %v5187_v47 = vunpack.i.h.bf16 %v8478_v31  ;;  %v5186_v58 = vunpack.i.l.bf16 %v8478_v31 }
 0x662   :  { %v3970_v30 = vpack.c.bf16 %v3950_v36, %v3949_v41 }
 0x663   :  { %v8497_v51 = vpop.permute.xlu1 %5189  ;;  %v3955_v35 = vsel %vm3928_vm8, %v5186_v58, %v5181_v34  ;;  %v3956_v7 = vsel %vm3928_vm8, %v5187_v47, %v5182_v33  ;;  %v3940_v39 = vsel %vm3928_vm8, %v5182_v33, %v5187_v47 }
 0x664   :  { %3812 = vmatpush1.bf16.msra.mxu1 %v3783_v40  ;;  %v8499_v15 = vpop.permute.xlu0 %5194  ;;  %v3934_v40 = vsel %vm3928_vm8, %v5152_v32, %v5157_v42  ;;  %v5191_v31 = vunpack.i.l.bf16 %v8497_v51 }
 0x665   :  { %3813 = vmatprep.subr.bf16.mxu1 %v3786_v59  ;;  %v5172_v59 = vunpack.i.h.bf16 %v8456_v22  ;;  %v3969_v22 = vpack.c.bf16 %v3934_v40, %v3933_v0  ;;  %v5197_v1 = vunpack.i.h.bf16 %v8499_v15  ;;  %v5196_v18 = vunpack.i.l.bf16 %v8499_v15 }
 0x666   :  { %v3976_v15 = vpack.c.bf16 %v3956_v7, %v3955_v35 }
 0x667   :  { %v8524_v6 = vpop.permute.xlu1 %5199  ;;  %v3938_v49 = vsel %vm3928_vm8, %v5172_v59, %v5177_v26  ;;  %v3957_v10 = vsel %vm3928_vm8, %v5196_v18, %v5191_v31  ;;  %v3941_v19 = vsel %vm3928_vm8, %v5191_v31, %v5196_v18 }
 0x668   :  { %3814 = vmatpush1.bf16.msra.mxu1 %v3785_v29  ;;  %v8526_v13 = vpop.permute.xlu0 %5209  ;;  %v3935_v29 = vsel %vm3928_vm8, %v5161_v53, %v5166_v12  ;;  %v3973_v27 = vpack.c.bf16 %v3938_v49, %v3937_v52  ;;  %v5202_v32 = vunpack.i.h.bf16 %v8524_v6  ;;  %v5201_v9 = vunpack.i.l.bf16 %v8524_v6 }
 0x669   :  { %3815 = vmatprep.subr.bf16.mxu1 %v3788_v46  ;;  %v3954_v46 = vsel %vm3928_vm8, %v5177_v26, %v5172_v59  ;;  %v5212_v42 = vunpack.i.h.bf16 %v8526_v13  ;;  %v5211_v61 = vunpack.i.l.bf16 %v8526_v13 }
 0x66a   :  { %v3974_v48 = vpack.c.bf16 %v3954_v46, %v3953_v60  ;;  %v5468_v60 = vld [vmem:[%s8742_s2 + $0x70] sm:$0xff]  }
 0x66b   :  { %v8549_v16 = vpop.permute.xlu1 %5204  ;;  %v3959_v13 = vsel %vm3928_vm8, %v5211_v61, %v5201_v9  ;;  %v3960_v41 = vsel %vm3928_vm8, %v5212_v42, %v5202_v32  ;;  %v3944_v28 = vsel %vm3928_vm8, %v5202_v32, %v5212_v42  ;;  %v3943_v12 = vsel %vm3928_vm8, %v5201_v9, %v5211_v61 }
 0x66c   :  { %3816 = vmatpush1.bf16.msra.mxu1 %v3787_v57  ;;  %v8551_v5 = vpop.permute.xlu0 %5214  ;;  %v3971_v57 = vpack.c.bf16 %v3936_v38, %v3935_v29  ;;  %v5207_v62 = vunpack.i.h.bf16 %v8549_v16  ;;  %v5206_v20 = vunpack.i.l.bf16 %v8549_v16  ;;  %v3979_v37 = vpack.c.bf16 %v3944_v28, %v3943_v12 }
 0x66d   :  { %3817 = vmatprep.subr.bf16.mxu1 %v3790_v45  ;;  %v5192_v45 = vunpack.i.h.bf16 %v8497_v51  ;;  %v5217_v6 = vunpack.i.h.bf16 %v8551_v5 }
 0x66f   :  { %v8573_v50 = vpop.permute.xlu1 %5219  ;;  %v3942_v25 = vsel %vm3928_vm8, %v5192_v45, %v5197_v1  ;;  %v4136_v0 = vsel %vm4118_vm9, %v5217_v6, %v5207_v62  ;;  %v4120_v16 = vsel %vm4118_vm9, %v5207_v62, %v5217_v6 }
 0x670   :  { %3818 = vmatpush1.bf16.msra.mxu1 %v3789_v55  ;;  %v8575_v44 = vpop.permute.xlu0 %5224  ;;  %v3939_v55 = vsel %vm3928_vm8, %v5181_v34, %v5186_v58  ;;  %v3977_v53 = vpack.c.bf16 %v3942_v25, %v3941_v19  ;;  %v5221_v59 = vunpack.i.l.bf16 %v8573_v50 }
 0x671   :  { %3993 = vmatprep.subr.bf16.mxu1 %v3966_v43  ;;  %v3958_v43 = vsel %vm3928_vm8, %v5197_v1, %v5192_v45  ;;  %v5227_v24 = vunpack.i.h.bf16 %v8575_v44  ;;  %v5226_v26 = vunpack.i.l.bf16 %v8575_v44 }
 0x673   :  { %3836 = vmatmul.mubr.bf16.vlgmr.msra.gmra.mrb[60].mxu1 %v5466_v56  ;;  %v8593_v51 = vpop.permute.xlu1 %5229  ;;  %v3975_v56 = vpack.c.bf16 %v3940_v39, %v3939_v55  ;;  %v4137_v46 = vsel %vm4118_vm9, %v5226_v26, %v5221_v59  ;;  %v4121_v58 = vsel %vm4118_vm9, %v5221_v59, %v5226_v26 }
 0x674   :  { %3994 = vmatpush1.bf16.msra.mxu1 %v3965_v17  ;;  %3845 = vmatprep.mubr.bf16.mxu1 %v8754_v54  ;;  %v8595_v2 = vpop.permute.xlu0 %5234  ;;  %v3978_v17 = vpack.c.bf16 %v3958_v43, %v3957_v10  ;;  %v5232_v4 = vunpack.i.h.bf16 %v8593_v51  ;;  %v5231_v11 = vunpack.i.l.bf16 %v8593_v51 }
 0x675   :  { %3995 = vmatprep.subr.bf16.mxu1 %v3968_v14  ;;  %v5216_v14 = vunpack.i.l.bf16 %v8551_v5  ;;  %v5236_v38 = vunpack.i.l.bf16 %v8595_v2 }
 0x677   :  { %v8618_v36 = vpop.permute.xlu1 %5239  ;;  %v4135_v40 = vsel %vm4118_vm9, %v5216_v14, %v5206_v20  ;;  %v4119_v5 = vsel %vm4118_vm9, %v5206_v20, %v5216_v14  ;;  %v4139_v44 = vsel %vm4118_vm9, %v5236_v38, %v5231_v11  ;;  %v4123_v7 = vsel %vm4118_vm9, %v5231_v11, %v5236_v38 }
 0x678   :  { %3996 = vmatpush1.bf16.msra.mxu1 %v3967_v8  ;;  %v5245_v21 = vpop.permute.xlu0 %5244  ;;  %v3980_v8 = vpack.c.bf16 %v3960_v41, %v3959_v13  ;;  %v4155_v34 = vpack.c.bf16 %v4120_v16, %v4119_v5  ;;  %v5242_v49 = vunpack.i.h.bf16 %v8618_v36  ;;  %v5241_v52 = vunpack.i.l.bf16 %v8618_v36 }
 0x679   :  { %3997 = vmatprep.subr.bf16.mxu1 %v3970_v30  ;;  %v5222_v30 = vunpack.i.h.bf16 %v8573_v50  ;;  %v5246_v45 = vunpack.i.l.bf16 %v5245_v21 }
 0x67b   :  { %3846 = vmatmul.mubr.bf16.gmra.mrb[64].mxu1 %v5467_v23  ;;  %v4156_v23 = vpack.c.bf16 %v4136_v0, %v4135_v40  ;;  %v5250_v29 = vpop.permute.xlu1 %5249  ;;  %v4138_v33 = vsel %vm4118_vm9, %v5227_v24, %v5222_v30  ;;  %v4122_v47 = vsel %vm4118_vm9, %v5222_v30, %v5227_v24  ;;  %v4141_v10 = vsel %vm4118_vm9, %v5246_v45, %v5241_v52 }
 0x67c   :  { %3998 = vmatpush1.bf16.msra.mxu1 %v3969_v22  ;;  %4025 = vmatprep.mubr.bf16.mxu1 %v8754_v54  ;;  %v5237_v22 = vunpack.i.h.bf16 %v8595_v2  ;;  %v4158_v50 = vpack.c.bf16 %v4138_v33, %v4137_v46  ;;  %v4157_v18 = vpack.c.bf16 %v4122_v47, %v4121_v58  ;;  %v5252_v39 = vunpack.i.h.bf16 %v5250_v29 }
 0x67d   :  { %3999 = vmatprep.subr.bf16.mxu1 %v3972_v3  ;;  %v5255_v3 = vpop.permute.xlu0 %5254  ;;  %v5251_v55 = vunpack.i.l.bf16 %v5250_v29  ;;  %v4125_v42 = vsel %vm4118_vm9, %v5241_v52, %v5246_v45  ;;  %v5471_v52 = vld [vmem:[%s8742_s2 + $0x88] sm:$0xff]  }
 0x67e   :  { %v4124_v35 = vsel %vm4118_vm9, %v5232_v4, %v5237_v22  ;;  %v5257_v51 = vunpack.i.h.bf16 %v5255_v3  ;;  %v5256_v2 = vunpack.i.l.bf16 %v5255_v3 }
 0x67f   :  { %v5260_v31 = vpop.permute.xlu1 %5259  ;;  %v4159_v32 = vpack.c.bf16 %v4124_v35, %v4123_v7 }
 0x680   :  { %4000 = vmatpush1.bf16.msra.mxu1 %v3971_v57  ;;  %v4140_v57 = vsel %vm4118_vm9, %v5237_v22, %v5232_v4  ;;  %v4143_v19 = vsel %vm4118_vm9, %v5256_v2, %v5251_v55  ;;  %v5262_v62 = vunpack.i.h.bf16 %v5260_v31  ;;  %v5261_v20 = vunpack.i.l.bf16 %v5260_v31 }
 0x681   :  { %4001 = vmatprep.subr.bf16.mxu1 %v3974_v48  ;;  %v5247_v48 = vunpack.i.h.bf16 %v5245_v21  ;;  %v5265_v1 = vpop.permute.xlu0 %5264  ;;  %v4128_v41 = vsel %vm4118_vm9, %v5252_v39, %v5257_v51  ;;  %v4127_v36 = vsel %vm4118_vm9, %v5251_v55, %v5256_v2 }
 0x682   :  { %v5267_v6 = vunpack.i.h.bf16 %v5265_v1  ;;  %v5266_v14 = vunpack.i.l.bf16 %v5265_v1  ;;  %v4163_v24 = vpack.c.bf16 %v4128_v41, %v4127_v36 }
 0x683   :  { %v4142_v43 = vsel %vm4118_vm9, %v5247_v48, %v5242_v49  ;;  %v4126_v9 = vsel %vm4118_vm9, %v5242_v49, %v5247_v48  ;;  %v5270_v61 = vpop.permute.xlu1 %5269  ;;  %v5470_v49 = vld [vmem:[%s8742_s2 + $0x80] sm:$0xff]  }
 0x684   :  { %4002 = vmatpush1.bf16.msra.mxu1 %v3973_v27  ;;  %v4160_v27 = vpack.c.bf16 %v4140_v57, %v4139_v44  ;;  %v4162_v25 = vpack.c.bf16 %v4142_v43, %v4141_v10  ;;  %v4161_v13 = vpack.c.bf16 %v4126_v9, %v4125_v42  ;;  %v5271_v28 = vunpack.i.l.bf16 %v5270_v61 }
 0x685   :  { %4003 = vmatprep.subr.bf16.mxu1 %v3976_v15  ;;  %v5469_v15 = vld [vmem:[%s8742_s2 + $0x78] sm:$0xff]   ;;  %v4145_v40 = vsel %vm4118_vm9, %v5266_v14, %v5261_v20  ;;  %v4146_v0 = vsel %vm4118_vm9, %v5267_v6, %v5262_v62  ;;  %v4130_v26 = vsel %vm4118_vm9, %v5262_v62, %v5267_v6 }
 0x686   :  { %v4166_v16 = vpack.c.bf16 %v4146_v0, %v4145_v40 }
 0x687   :  { %v5280_v30 = vpop.permute.xlu1 %5279 }
 0x688   :  { %4004 = vmatpush1.bf16.msra.mxu1 %v3975_v56  ;;  %v5275_v56 = vpop.permute.xlu0 %5274  ;;  %v5282_v4 = vunpack.i.h.bf16 %v5280_v30  ;;  %v5281_v11 = vunpack.i.l.bf16 %v5280_v30 }
 0x689   :  { %4005 = vmatprep.subr.bf16.mxu1 %v3978_v17  ;;  %v4144_v17 = vsel %vm4118_vm9, %v5257_v51, %v5252_v39  ;;  %v5277_v12 = vunpack.i.h.bf16 %v5275_v56 }
 0x68a   :  { %v4164_v21 = vpack.c.bf16 %v4144_v17, %v4143_v19 }
 0x68c   :  { %4006 = vmatpush1.bf16.msra.mxu1 %v3977_v53  ;;  %v5272_v53 = vunpack.i.h.bf16 %v5270_v61  ;;  %v5285_v59 = vpop.permute.xlu0 %5284 }
 0x68d   :  { %4007 = vmatprep.subr.bf16.mxu1 %v3980_v8  ;;  %v5276_v8 = vunpack.i.l.bf16 %v5275_v56  ;;  %v5287_v22 = vunpack.i.h.bf16 %v5285_v59  ;;  %v5286_v38 = vunpack.i.l.bf16 %v5285_v59 }
 0x68e   :  { %v4132_v3 = vsel %vm4118_vm9, %v5272_v53, %v5277_v12 }
 0x68f   :  { %v4147_v5 = vsel %vm4118_vm9, %v5276_v8, %v5271_v28  ;;  %v4149_v33 = vsel %vm4118_vm9, %v5286_v38, %v5281_v11  ;;  %v4134_v58 = vsel %vm4118_vm9, %v5282_v4, %v5287_v22 }
 0x690   :  { %4008 = vmatpush1.bf16.msra.mxu1 %v3979_v37  ;;  %v4129_v37 = vsel %vm4118_vm9, %v5261_v20, %v5266_v14 }
 0x691   :  { %4183 = vmatprep.subr.bf16.mxu1 %v4156_v23  ;;  %v4148_v23 = vsel %vm4118_vm9, %v5277_v12, %v5272_v53  ;;  %v4165_v29 = vpack.c.bf16 %v4130_v26, %v4129_v37 }
 0x692   :  { %v4168_v46 = vpack.c.bf16 %v4148_v23, %v4147_v5 }
 0x693   :  { %4026 = vmatmul.mubr.bf16.vlgmr.msra.gmra.mrb[60].mxu1 %v5468_v60  ;;  %v4131_v60 = vsel %vm4118_vm9, %v5271_v28, %v5276_v8 }
 0x694   :  { %4184 = vmatpush1.bf16.msra.mxu1 %v4155_v34  ;;  %4035 = vmatprep.mubr.bf16.mxu1 %v8754_v54  ;;  %v4150_v34 = vsel %vm4118_vm9, %v5287_v22, %v5282_v4  ;;  %v4167_v47 = vpack.c.bf16 %v4132_v3, %v4131_v60 }
 0x695   :  { %4185 = vmatprep.subr.bf16.mxu1 %v4158_v50  ;;  %v4133_v50 = vsel %vm4118_vm9, %v5281_v11, %v5286_v38  ;;  %v4170_v44 = vpack.c.bf16 %v4150_v34, %v4149_v33 }
 0x696   :  { %v4169_v57 = vpack.c.bf16 %v4134_v58, %v4133_v50 }
 0x698   :  { %4186 = vmatpush1.bf16.msra.mxu1 %v4157_v18 }
 0x699   :  { %4187 = vmatprep.subr.bf16.mxu1 %v4160_v27 }
 0x69b   :  { %4036 = vmatmul.mubr.bf16.gmra.mrb[64].mxu1 %v5469_v15 }
 0x69c   :  { %4188 = vmatpush1.bf16.msra.mxu1 %v4159_v32  ;;  %4215 = vmatprep.mubr.bf16.mxu1 %v8754_v54 }
 0x69d   :  { %4189 = vmatprep.subr.bf16.mxu1 %v4162_v25 }
 0x6a0   :  { %4190 = vmatpush1.bf16.msra.mxu1 %v4161_v13 }
 0x6a1   :  { %4191 = vmatprep.subr.bf16.mxu1 %v4164_v21 }
 0x6a4   :  { %4192 = vmatpush1.bf16.msra.mxu1 %v4163_v24 }
 0x6a5   :  { %4193 = vmatprep.subr.bf16.mxu1 %v4166_v16 }
 0x6a8   :  { %4194 = vmatpush1.bf16.msra.mxu1 %v4165_v29 }
 0x6a9   :  { %4195 = vmatprep.subr.bf16.mxu1 %v4168_v46 }
 0x6ac   :  { %4196 = vmatpush1.bf16.msra.mxu1 %v4167_v47 }
 0x6ad   :  { %4197 = vmatprep.subr.bf16.mxu1 %v4170_v44 }
 0x6b0   :  { %4198 = vmatpush1.bf16.msra.mxu1 %v4169_v57 }
 0x6b3   :  { %4216 = vmatmul.mubr.bf16.vlgmr.msra.gmra.mrb[60].mxu1 %v5470_v49 }
 0x6b4   :  { %4225 = vmatprep.mubr.bf16.mxu1 %v8754_v54 }
 0x6bb   :  { %4226 = vmatmul.mubr.bf16.gmra.mrb[64].mxu1 %v5471_v52 }
 0x786   :  { %v4217_v48 = vpop.f32.mrb[60].mxu1 }
 0x787   :  { %4244 = vst [vmem:[%s8743_s6] sm:$0xff] %v4217_v48  ;;  %v4219_v63 = vpop.f32.mrb[61].mxu1 }
 0x788   :  { %4245 = vst [vmem:[%s8743_s6 + $0x8] sm:$0xff] %v4219_v63  ;;  %v4221_v45 = vpop.f32.mrb[62].mxu1 }
 0x789   :  { %4246 = vst [vmem:[%s8743_s6 + $0x10] sm:$0xff] %v4221_v45  ;;  %v4223_v54 = vpop.f32.mrb[63].mxu1 }
 0x78a   :  { %4247 = vst [vmem:[%s8743_s6 + $0x18] sm:$0xff] %v4223_v54 }
 0x78e   :  { %v4227_v31 = vpop.f32.mrb[64].mxu1 }
 0x78f   :  { %4248 = vst [vmem:[%s8743_s6 + $0x20] sm:$0xff] %v4227_v31  ;;  %v4229_v1 = vpop.f32.mrb[65].mxu1 }
 0x790   :  { %4249 = vst [vmem:[%s8743_s6 + $0x28] sm:$0xff] %v4229_v1  ;;  %v4231_v18 = vpop.f32.mrb[66].mxu1 }
 0x791   :  { %4250 = vst [vmem:[%s8743_s6 + $0x30] sm:$0xff] %v4231_v18  ;;  %v4233_v35 = vpop.f32.mrb[67].mxu1 }
 0x792   :  { %4251 = vst [vmem:[%s8743_s6 + $0x38] sm:$0xff] %v4233_v35 }

</bundles_post_ra>
